<compile_context>
chip_gen: v5e
topology: v5e:2x2
jax: 0.10.0
libtpu: 0.0.40
codegen_flags: <defaults>
</compile_context>

<pallas_src>
import functools

import jax
import jax.numpy as jnp
from jax.experimental import pallas as pl
from jax.experimental.pallas import tpu as pltpu


# ---------------------------------------------------------------------------
# Per-generation tile / VMEM configuration.
# ---------------------------------------------------------------------------
def _vmem_capacity_bytes():
    try:
        return int(pltpu.get_tpu_info().vmem_capacity_bytes)
    except Exception:
        return 64 * 1024 * 1024          # conservative (v7x per-core VMEM)


def _tile_config(HW):
    """Returns (TM, TQ, HW_pad, vmem_limit_bytes).

    TM (output/lane tile) is enlarged to amortize grid-step overhead but capped
    so the (TQ, TM) f32 slab temporary (plus a few live copies) stays well
    inside per-core VMEM: 64 MiB (v7x) -> TM<=2048, 128 MiB (v5e/v6e) ->
    TM<=4096.  HW is padded to a multiple of max(TM, TQ) so stores stay
    lane-dense and tiles stay bounded for any resolution.
    """
    phys = _vmem_capacity_bytes()
    big_vmem = phys > 96 * 1024 * 1024
    tm_cap = 4096 if big_vmem else 2048
    vmem_limit = (96 if big_vmem else 48) * 1024 * 1024
    p = 128
    while p < HW:
        p *= 2
    TM = min(tm_cap, p)                  # powers of two, TM >= TQ
    TQ = min(512, p)
    step = max(TM, TQ)
    HW_pad = ((HW + step - 1) // step) * step
    # NOTE(v7x megacore): for production HW (~1e5) HW_pad//TM stays >= 2 so
    # the "parallel" m axis can be sharded across both TensorCores.
    return TM, TQ, HW_pad, vmem_limit


# ---------------------------------------------------------------------------
# Wrapper-side precompute: lane-dense bilinear corner tables + source bands.
# ---------------------------------------------------------------------------
def _corner_tables(flow, H, W):
    """flow: (B, 2, H, W) f32 -> (idx, wgt), both (B, 4, H*W).

    idx[b, c, p]: flattened source-pixel index (int32) of corner c for output
    pixel p.  wgt[b, c, p]: its bilinear weight, zeroed for out-of-bounds
    corners (grid_sample zeros padding).  Sample coords are grid + flow, which
    is exactly backward_warp's normalize/denormalize round trip with
    align_corners=True.
    """
    B = flow.shape[0]
    HW = H * W
    gx = jnp.arange(W, dtype=jnp.float32).reshape(1, 1, W)
    gy = jnp.arange(H, dtype=jnp.float32).reshape(1, H, 1)
    sx = (gx + flow[:, 0]).reshape(B, HW)
    sy = (gy + flow[:, 1]).reshape(B, HW)

    x0f = jnp.floor(sx)
    y0f = jnp.floor(sy)
    wx1 = sx - x0f
    wx0 = 1.0 - wx1
    wy1 = sy - y0f
    wy0 = 1.0 - wy1

    # Integer corner coordinates / flat indices: exact for any frame size
    # (float-composed flat indices lose exactness beyond 2^24 pixels).
    x0 = x0f.astype(jnp.int32)
    y0 = y0f.astype(jnp.int32)
    x1 = x0 + 1
    y1 = y0 + 1

    idxs, wgts = [], []
    for yc, xc, w in ((y0, x0, wy0 * wx0), (y0, x1, wy0 * wx1),
                      (y1, x0, wy1 * wx0), (y1, x1, wy1 * wx1)):
        inb = (xc >= 0) & (xc <= W - 1) & (yc >= 0) & (yc <= H - 1)
        idxs.append(yc * W + xc)
        wgts.append(jnp.where(inb, w, 0.0))
    return jnp.stack(idxs, axis=1), jnp.stack(wgts, axis=1)


def _band_tables(idx, wgt, TM, TQ):
    """Per (batch, output-tile) source-block band [k0, k0+nk) touched by any
    in-bounds corner.  Flattened to (B*M,) int32 so SMEM stays 1-D (avoids the
    2-D SMEM (8,128) padding blow-up) and reads are single scalar loads."""
    B, _, HWp = idx.shape
    M = HWp // TM
    valid = wgt > 0.0
    lo = jnp.where(valid, idx, HWp).reshape(B, 4, M, TM).min(axis=(1, 3))
    hi = jnp.where(valid, idx, -1).reshape(B, 4, M, TM).max(axis=(1, 3))
    has = hi >= 0
    k0 = jnp.where(has, lo // TQ, 0)
    k1 = jnp.where(has, hi // TQ, -1)
    nk = jnp.maximum(k1 - k0 + 1, 0)
    return (k0.reshape(B * M).astype(jnp.int32),
            nk.reshape(B * M).astype(jnp.int32))


def _pad_lanes(x, HW_pad):
    pad = HW_pad - x.shape[-1]
    if pad == 0:
        return x
    return jnp.pad(x, ((0, 0), (0, 0), (0, pad)))


# ---------------------------------------------------------------------------
# Kernel-side helpers.
# ---------------------------------------------------------------------------
def _slab_block(idx_blk, wgt_blk, q0, TQ):
    """(TQ, TM) block of the one-hot bilinear slab for source rows
    [q0, q0 + TQ): slab[q, t] = weight of source pixel q0+q for the output
    pixel carried in lane t.  iota is loop-invariant; the per-step offset is a
    cheap (4, TM) integer subtract."""
    TM = idx_blk.shape[-1]
    iota = jax.lax.broadcasted_iota(jnp.int32, (TQ, TM), 0)
    idx_local = idx_blk - q0                         # (4, TM) int32
    slab = jnp.zeros((TQ, TM), jnp.float32)
    for c in range(4):
        slab = slab + jnp.where(iota == idx_local[c:c + 1, :],
                                wgt_blk[c:c + 1, :], 0.0)
    return slab


def _partial_warp(src_ref, idx_ref, wgt_ref, kb, TQ):
    """(C, TM) contribution of source block kb: src-tile (C, TQ) @ slab."""
    slab = _slab_block(idx_ref[0], wgt_ref[0], kb * TQ, TQ)
    return jnp.dot(src_ref[0], slab, preferred_element_type=jnp.float32)


def _warp_kernel(k0_ref, nk_ref, src_ref, idx_ref, wgt_ref, out_ref, *, TQ):
    b, m, k = pl.program_id(0), pl.program_id(1), pl.program_id(2)
    bm = b * pl.num_programs(1) + m

    @pl.when(k == 0)
    def _():
        out_ref[...] = jnp.zeros(out_ref.shape, out_ref.dtype)

    @pl.when(k < nk_ref[bm])
    def _():
        kb = k0_ref[bm] + k
        out_ref[0] += _partial_warp(src_ref, idx_ref, wgt_ref, kb, TQ)


def _warp_add_kernel(k0_ref, nk_ref, src_ref, idx_ref, wgt_ref, add_ref,
                     out_ref, *, TQ):
    b, m, k = pl.program_id(0), pl.program_id(1), pl.program_id(2)
    bm = b * pl.num_programs(1) + m

    @pl.when(k == 0)
    def _():
        out_ref[0] = add_ref[0]

    @pl.when(k < nk_ref[bm])
    def _():
        kb = k0_ref[bm] + k
        out_ref[0] += _partial_warp(src_ref, idx_ref, wgt_ref, kb, TQ)


def _propagate_kernel(k0_ref, nk_ref, src_ref, idx_ref, wgt_ref, base_ref,
                      out_ref, *, TQ, C):
    b, m, k = pl.program_id(0), pl.program_id(1), pl.program_id(2)
    bm = b * pl.num_programs(1) + m

    @pl.when(k == 0)
    def _():
        out_ref[0] = base_ref[0]

    @pl.when(k < nk_ref[bm])
    def _():
        kb = k0_ref[bm] + k
        part = _partial_warp(src_ref, idx_ref, wgt_ref, kb, TQ)
        one_minus_cnt = 1.0 - base_ref[0, C:C + 1, :]   # OLD cnt, k-invariant
        out_ref[0] += one_minus_cnt * part


# ---------------------------------------------------------------------------
# Shared pallas_call builder (band-limited reduction via scalar prefetch).
# ---------------------------------------------------------------------------
def _call_warp(kernel_fn, src_t, idx, wgt, extras, out_channels, TM, TQ,
               vmem_limit):
    """src_t: (B, Cs, HWp); idx (int32) / wgt (f32): (B, 4, HWp); extras:
    list of (B, Ce, HWp) arrays tiled like the output.  All already padded to
    HWp (a multiple of TM and TQ).  Returns (B, out_channels, HWp)."""
    B, Cs, HWp = src_t.shape
    M = HWp // TM
    n_src_blocks = HWp // TQ
    last_blk = n_src_blocks - 1

    k0, nk = _band_tables(idx, wgt, TM, TQ)

    # Static k-extent: max band length when flows are concrete (eager RGVI
    # loop); under jit fall back to the full extent -- the in-kernel
    # @pl.when(k < nk) gate still skips all slab/MXU work for extra steps.
    try:
        num_k = max(1, int(jax.device_get(jnp.max(nk))))
    except Exception:
        num_k = n_src_blocks

    def src_map(b, m, k, k0_ref, nk_ref):
        # Band-limited source block; clamped so steps past this tile's band
        # stay in range (their DMA'd block is never read thanks to the gate).
        return (b, 0, jnp.minimum(k0_ref[b * M + m] + k, last_blk))

    def lane_map(b, m, k, k0_ref, nk_ref):
        return (b, 0, m)

    in_specs = [
        pl.BlockSpec((1, Cs, TQ), src_map),
        pl.BlockSpec((1, 4, TM), lane_map),
        pl.BlockSpec((1, 4, TM), lane_map),
    ]
    inputs = [src_t, idx, wgt]
    for arr in extras:
        in_specs.append(pl.BlockSpec((1, arr.shape[1], TM), lane_map))
        inputs.append(arr)

    return pl.pallas_call(
        functools.partial(kernel_fn, TQ=TQ),
        out_shape=jax.ShapeDtypeStruct((B, out_channels, HWp), jnp.float32),
        grid_spec=pltpu.PrefetchScalarGridSpec(
            num_scalar_prefetch=2,
            grid=(B, M, num_k),
            in_specs=in_specs,
            out_specs=pl.BlockSpec((1, out_channels, TM), lane_map)),
        compiler_params=pltpu.CompilerParams(
            dimension_semantics=("parallel", "parallel", "arbitrary"),
            vmem_limit_bytes=vmem_limit),
    )(k0, nk, *inputs)


# ---------------------------------------------------------------------------
# Public wrappers (forward semantics of rgvi.backward_warp + propagation).
# ---------------------------------------------------------------------------
def backward_warp(x, flow):
    """x: (B, C, H, W) f32, flow: (B, 2, H, W) f32 -> (B, C, H, W) f32.
    Matches rgvi.backward_warp (grid_sample bilinear, align_corners=True,
    zeros padding)."""
    B, C, H, W = x.shape
    HW = H * W
    TM, TQ, HW_pad, vmem_limit = _tile_config(HW)
    idx, wgt = _corner_tables(flow, H, W)
    out = _call_warp(_warp_kernel,
                     _pad_lanes(x.reshape(B, C, HW), HW_pad),
                     _pad_lanes(idx, HW_pad), _pad_lanes(wgt, HW_pad),
                     extras=[], out_channels=C, TM=TM, TQ=TQ,
                     vmem_limit=vmem_limit)
    return out[..., :HW].reshape(B, C, H, W)


def backward_warp_add(x, flow):
    """Fused accumulated-flow update: backward_warp(x, flow) + flow.
    x and flow are both (B, 2, H, W) flow fields."""
    B, C, H, W = x.shape
    HW = H * W
    TM, TQ, HW_pad, vmem_limit = _tile_config(HW)
    idx, wgt = _corner_tables(flow, H, W)
    out = _call_warp(_warp_add_kernel,
                     _pad_lanes(x.reshape(B, C, HW), HW_pad),
                     _pad_lanes(idx, HW_pad), _pad_lanes(wgt, HW_pad),
                     extras=[_pad_lanes(flow.reshape(B, C, HW), HW_pad)],
                     out_channels=C, TM=TM, TQ=TQ, vmem_limit=vmem_limit)
    return out[..., :HW].reshape(B, C, H, W)


def propagate_step(base_img, base_cnt, src_img, src_cnt, flow):
    """One fused RGVI internal-pixel-propagation update (NCHW, batch-1 frames):
       warped    = grid_sample([src_img; src_cnt], grid + flow)
       new_img   = base_img + (1 - base_cnt) * warped_img
       new_cnt   = base_cnt + (1 - base_cnt) * warped_cnt
    Returns (new_img, new_cnt)."""
    B, C, H, W = base_img.shape
    HW = H * W
    TM, TQ, HW_pad, vmem_limit = _tile_config(HW)
    idx, wgt = _corner_tables(flow, H, W)
    base_t = jnp.concatenate([base_img, base_cnt], axis=1).reshape(B, C + 1, HW)
    src_t = jnp.concatenate([src_img, src_cnt], axis=1).reshape(B, C + 1, HW)
    out = _call_warp(functools.partial(_propagate_kernel, C=C),
                     _pad_lanes(src_t, HW_pad),
                     _pad_lanes(idx, HW_pad), _pad_lanes(wgt, HW_pad),
                     extras=[_pad_lanes(base_t, HW_pad)],
                     out_channels=C + 1, TM=TM, TQ=TQ, vmem_limit=vmem_limit)
    out = out[..., :HW].reshape(B, C + 1, H, W)
    return out[:, :C], out[:, C:C + 1]


# ---------------------------------------------------------------------------
# Pure-JAX reference (for correctness checking).
# ---------------------------------------------------------------------------
def backward_warp_ref(x, flow):
    B, C, H, W = x.shape
    gx = jnp.arange(W, dtype=jnp.float32).reshape(1, 1, W)
    gy = jnp.arange(H, dtype=jnp.float32).reshape(1, H, 1)
    sx = gx + flow[:, 0]
    sy = gy + flow[:, 1]
    x0 = jnp.floor(sx)
    y0 = jnp.floor(sy)
    x1 = x0 + 1.0
    y1 = y0 + 1.0
    wx1 = sx - x0
    wx0 = 1.0 - wx1
    wy1 = sy - y0
    wy0 = 1.0 - wy1

    def gather(yi, xi):
        inb = ((xi >= 0) & (xi <= W - 1) &
               (yi >= 0) & (yi <= H - 1)).astype(jnp.float32)
        yc = jnp.clip(yi, 0, H - 1).astype(jnp.int32)
        xc = jnp.clip(xi, 0, W - 1).astype(jnp.int32)
        v = jax.vmap(lambda img, yy, xx: img[:, yy, xx])(x, yc, xc)
        return v * inb[:, None]

    return (gather(y0, x0) * (wy0 * wx0)[:, None] +
            gather(y0, x1) * (wy0 * wx1)[:, None] +
            gather(y1, x0) * (wy1 * wx0)[:, None] +
            gather(y1, x1) * (wy1 * wx1)[:, None])


if __name__ == "__main__":
    key = jax.random.PRNGKey(0)
    k1, k2, k3, k4, k5, k6 = jax.random.split(key, 6)

    # Small shapes consistent with the module's per-frame NCHW processing.
    B, C, H, W = 2, 3, 16, 24
    L = 3

    # --- backward_warp kernel vs pure-JAX reference ---
    x = jax.random.normal(k1, (B, C, H, W), jnp.float32)
    flow = jax.random.uniform(k2, (B, 2, H, W), jnp.float32,
                              minval=-2.5, maxval=2.5)
    out = backward_warp(x, flow)
    jax.block_until_ready(out)
    ref = backward_warp_ref(x, flow)
    assert jnp.allclose(out, ref, atol=1e-4), float(jnp.max(jnp.abs(out - ref)))

    # --- convention spot check: flow (+1, 0) must fetch the right neighbour
    # (grid + flow pixel coords, zeros padding, align_corners=True). ---
    sflow = jnp.concatenate([jnp.ones((1, 1, H, W), jnp.float32),
                             jnp.zeros((1, 1, H, W), jnp.float32)], axis=1)
    shifted = backward_warp(x[:1], sflow)
    expect = jnp.concatenate([x[:1, :, :, 1:],
                              jnp.zeros((1, C, H, 1), jnp.float32)], axis=-1)
    assert jnp.allclose(shifted, expect, atol=1e-5)

    # --- non-multiple-of-128 spatial extent exercises lane padding ---
    xp = jax.random.normal(k3, (1, C, 15, 23), jnp.float32)
    fp = jax.random.uniform(k4, (1, 2, 15, 23), jnp.float32,
                            minval=-3.0, maxval=3.0)
    op = backward_warp(xp, fp)
    jax.block_until_ready(op)
    opr = backward_warp_ref(xp, fp)
    assert jnp.allclose(op, opr, atol=1e-4), float(jnp.max(jnp.abs(op - opr)))

    # --- fused warp + add kernel (acc-flow update) vs reference ---
    f2 = jax.random.uniform(k6, (B, 2, H, W), jnp.float32,
                            minval=-1.5, maxval=1.5)
    wa = backward_warp_add(f2, flow)
    jax.block_until_ready(wa)
    wa_ref = backward_warp_ref(f2, flow) + flow
    assert jnp.allclose(wa, wa_ref, atol=1e-4), \
        float(jnp.max(jnp.abs(wa - wa_ref)))

    # --- mini "internal pixel propagation" loop (as in RGVI.forward) ---
    # TODO(synk): the bicubic rescale of acc_flow (F.interpolate * s) between
    # flow resolution and frame resolution is omitted (s == 1 here).
    imgs = jax.random.normal(k3, (L, C, H, W), jnp.float32)
    masks = (jax.random.uniform(k4, (L, 1, H, W)) > 0.7).astype(jnp.float32)
    cnts = 1.0 - masks
    imgs = imgs * cnts                                  # zero out masked pixels
    flows = jax.random.uniform(k5, (L - 1, 2, H, W), jnp.float32,
                               minval=-1.5, maxval=1.5)  # stand-in inp_fw_flows

    fw_img, fw_cnt = imgs[0:1], cnts[0:1]                # kernel path
    rf_img, rf_cnt = imgs[0:1], cnts[0:1]                # pure-JAX reference
    acc = None
    racc = None
    for j in range(1, L):
        if j == 1:
            acc = flows[0:1]
            racc = flows[0:1]
        else:
            # acc_flow = backward_warp(flow[j-1], acc_flow) + acc_flow (fused)
            acc = backward_warp_add(flows[j - 1:j], acc)
            racc = backward_warp_ref(flows[j - 1:j], racc) + racc
        fw_img, fw_cnt = propagate_step(fw_img, fw_cnt,
                                        imgs[j:j + 1], cnts[j:j + 1], acc)
        wi = backward_warp_ref(imgs[j:j + 1], racc)
        wc = backward_warp_ref(cnts[j:j + 1], racc)
        rf_img = rf_img + (1.0 - rf_cnt) * wi
        rf_cnt = rf_cnt + (1.0 - rf_cnt) * wc
    jax.block_until_ready((fw_img, fw_cnt))
    assert jnp.allclose(fw_img, rf_img, atol=1e-4), \
        float(jnp.max(jnp.abs(fw_img - rf_img)))
    assert jnp.allclose(fw_cnt, rf_cnt, atol=1e-4), \
        float(jnp.max(jnp.abs(fw_cnt - rf_cnt)))

    print("KERNEL_OK")
</pallas_src>

<mosaic_0001>
module attributes {stable_mosaic.version = 11 : i64} {
  func.func @_warp_kernel(%arg0: i32, %arg1: i32, %arg2: i32, %arg3: memref<2xi32, #tpu.memory_space<smem>>, %arg4: memref<2xi32, #tpu.memory_space<smem>>, %arg5: memref<1x3x512xf32, #tpu.memory_space<vmem>>, %arg6: memref<1x4x512xi32, #tpu.memory_space<vmem>>, %arg7: memref<1x4x512xf32, #tpu.memory_space<vmem>>, %arg8: memref<1x3x512xf32, #tpu.memory_space<vmem>>) attributes {dimension_semantics = [#tpu.dimension_semantics<parallel>, #tpu.dimension_semantics<parallel>, #tpu.dimension_semantics<arbitrary>], iteration_bounds = array<i64: 2, 1, 1>, scalar_prefetch = 2 : i64, scratch_operands = 0 : i64, tpu.core_type = #tpu.core_type<tc>, window_params = [{transform_indices = @transform_0, window_bounds = array<i64: 1, 3, 512>}, {transform_indices = @transform_1, window_bounds = array<i64: 1, 4, 512>}, {transform_indices = @transform_2, window_bounds = array<i64: 1, 4, 512>}, {transform_indices = @transform_3, window_bounds = array<i64: 1, 3, 512>}]} {
    %c1_i32 = arith.constant 1 : i32
    %0 = arith.muli %arg0, %c1_i32 : i32
    %1 = arith.addi %0, %arg1 : i32
    %c0_i32 = arith.constant 0 : i32
    %2 = arith.cmpi eq, %arg2, %c0_i32 : i32
    %3 = arith.extui %2 : i1 to i32
    %c0_i32_0 = arith.constant 0 : i32
    %4 = arith.cmpi ne, %3, %c0_i32_0 : i32
    scf.if %4 {
      %cst = arith.constant 0.000000e+00 : f32
      %10 = vector.broadcast %cst : f32 to vector<1x3x512xf32>
      %c0 = arith.constant 0 : index
      %c0_2 = arith.constant 0 : index
      %c0_3 = arith.constant 0 : index
      %11 = vector.load %arg8[%c0, %c0_2, %c0_3] : memref<1x3x512xf32, #tpu.memory_space<vmem>>, vector<1x3x512xf32>
      tpu.vector_store %arg8[%c0, %c0_2, %c0_3], %10 {strides = array<i32>} : memref<1x3x512xf32, #tpu.memory_space<vmem>>, vector<1x3x512xf32>,
    } else {
    }
    %5 = arith.index_cast %1 : i32 to index
    %6 = memref.load %arg4[%5] : memref<2xi32, #tpu.memory_space<smem>>
    %7 = arith.cmpi slt, %arg2, %6 : i32
    %8 = arith.extui %7 : i1 to i32
    %c0_i32_1 = arith.constant 0 : i32
    %9 = arith.cmpi ne, %8, %c0_i32_1 : i32
    scf.if %9 {
      %10 = arith.index_cast %1 : i32 to index
      %11 = memref.load %arg3[%10] : memref<2xi32, #tpu.memory_space<smem>>
      %12 = arith.addi %11, %arg2 : i32
      %c0 = arith.constant 0 : index
      %c0_2 = arith.constant 0 : index
      %c0_3 = arith.constant 0 : index
      %13 = vector.load %arg8[%c0, %c0_2, %c0_3] : memref<1x3x512xf32, #tpu.memory_space<vmem>>, vector<1x3x512xf32>
      %14 = vector.shape_cast %13 : vector<1x3x512xf32> to vector<3x512xf32>
      %c0_4 = arith.constant 0 : index
      %c0_5 = arith.constant 0 : index
      %c0_6 = arith.constant 0 : index
      %15 = vector.load %arg6[%c0_4, %c0_5, %c0_6] : memref<1x4x512xi32, #tpu.memory_space<vmem>>, vector<1x4x512xi32>
      %16 = vector.shape_cast %15 : vector<1x4x512xi32> to vector<4x512xi32>
      %c0_7 = arith.constant 0 : index
      %c0_8 = arith.constant 0 : index
      %c0_9 = arith.constant 0 : index
      %17 = vector.load %arg7[%c0_7, %c0_8, %c0_9] : memref<1x4x512xf32, #tpu.memory_space<vmem>>, vector<1x4x512xf32>
      %18 = vector.shape_cast %17 : vector<1x4x512xf32> to vector<4x512xf32>
      %c512_i32 = arith.constant 512 : i32
      %19 = arith.muli %12, %c512_i32 : i32
      %20 = tpu.iota {dimensions = array<i32: 0>} : vector<512x512xi32>
      %21 = vector.broadcast %19 : i32 to vector<4x512xi32>
      %22 = arith.subi %16, %21 : vector<4x512xi32>
      %cst = arith.constant 0.000000e+00 : f32
      %23 = vector.broadcast %cst : f32 to vector<512x512xf32>
      %24 = vector.extract_strided_slice %22 {offsets = [0, 0], sizes = [1, 512], strides = [1, 1]} : vector<4x512xi32> to vector<1x512xi32>
      %25 = vector.broadcast %24 : vector<1x512xi32> to vector<512x512xi32>
      %26 = arith.cmpi eq, %20, %25 : vector<512x512xi32>
      %27 = vector.extract_strided_slice %18 {offsets = [0, 0], sizes = [1, 512], strides = [1, 1]} : vector<4x512xf32> to vector<1x512xf32>
      %cst_10 = arith.constant 0.000000e+00 : f32
      %28 = vector.shape_cast %27 : vector<1x512xf32> to vector<1x512xf32>
      %29 = vector.broadcast %28 : vector<1x512xf32> to vector<512x512xf32>
      %30 = vector.broadcast %cst_10 : f32 to vector<512x512xf32>
      %31 = arith.select %26, %29, %30 : vector<512x512xi1>, vector<512x512xf32>
      %32 = arith.addf %23, %31 : vector<512x512xf32>
      %33 = vector.extract_strided_slice %22 {offsets = [1, 0], sizes = [1, 512], strides = [1, 1]} : vector<4x512xi32> to vector<1x512xi32>
      %34 = vector.broadcast %33 : vector<1x512xi32> to vector<512x512xi32>
      %35 = arith.cmpi eq, %20, %34 : vector<512x512xi32>
      %36 = vector.extract_strided_slice %18 {offsets = [1, 0], sizes = [1, 512], strides = [1, 1]} : vector<4x512xf32> to vector<1x512xf32>
      %cst_11 = arith.constant 0.000000e+00 : f32
      %37 = vector.shape_cast %36 : vector<1x512xf32> to vector<1x512xf32>
      %38 = vector.broadcast %37 : vector<1x512xf32> to vector<512x512xf32>
      %39 = vector.broadcast %cst_11 : f32 to vector<512x512xf32>
      %40 = arith.select %35, %38, %39 : vector<512x512xi1>, vector<512x512xf32>
      %41 = arith.addf %32, %40 : vector<512x512xf32>
      %42 = vector.extract_strided_slice %22 {offsets = [2, 0], sizes = [1, 512], strides = [1, 1]} : vector<4x512xi32> to vector<1x512xi32>
      %43 = vector.broadcast %42 : vector<1x512xi32> to vector<512x512xi32>
      %44 = arith.cmpi eq, %20, %43 : vector<512x512xi32>
      %45 = vector.extract_strided_slice %18 {offsets = [2, 0], sizes = [1, 512], strides = [1, 1]} : vector<4x512xf32> to vector<1x512xf32>
      %cst_12 = arith.constant 0.000000e+00 : f32
      %46 = vector.shape_cast %45 : vector<1x512xf32> to vector<1x512xf32>
      %47 = vector.broadcast %46 : vector<1x512xf32> to vector<512x512xf32>
      %48 = vector.broadcast %cst_12 : f32 to vector<512x512xf32>
      %49 = arith.select %44, %47, %48 : vector<512x512xi1>, vector<512x512xf32>
      %50 = arith.addf %41, %49 : vector<512x512xf32>
      %51 = vector.extract_strided_slice %22 {offsets = [3, 0], sizes = [1, 512], strides = [1, 1]} : vector<4x512xi32> to vector<1x512xi32>
      %52 = vector.broadcast %51 : vector<1x512xi32> to vector<512x512xi32>
      %53 = arith.cmpi eq, %20, %52 : vector<512x512xi32>
      %54 = vector.extract_strided_slice %18 {offsets = [3, 0], sizes = [1, 512], strides = [1, 1]} : vector<4x512xf32> to vector<1x512xf32>
      %cst_13 = arith.constant 0.000000e+00 : f32
      %55 = vector.shape_cast %54 : vector<1x512xf32> to vector<1x512xf32>
      %56 = vector.broadcast %55 : vector<1x512xf32> to vector<512x512xf32>
      %57 = vector.broadcast %cst_13 : f32 to vector<512x512xf32>
      %58 = arith.select %53, %56, %57 : vector<512x512xi1>, vector<512x512xf32>
      %59 = arith.addf %50, %58 : vector<512x512xf32>
      %c0_14 = arith.constant 0 : index
      %c0_15 = arith.constant 0 : index
      %c0_16 = arith.constant 0 : index
      %60 = vector.load %arg5[%c0_14, %c0_15, %c0_16] : memref<1x3x512xf32, #tpu.memory_space<vmem>>, vector<1x3x512xf32>
      %61 = vector.shape_cast %60 : vector<1x3x512xf32> to vector<3x512xf32>
      %cst_17 = arith.constant dense<0.000000e+00> : vector<3x512xf32>
      %62 = tpu.matmul %61, %59, %cst_17 {dimension_numbers = #tpu.dot_dimension_numbers<[1], [0], [0], [1], [0, 0, 1, 1], [], []>} : vector<3x512xf32>, vector<512x512xf32>, vector<3x512xf32> -> vector<3x512xf32>
      %63 = arith.addf %14, %62 : vector<3x512xf32>
      %c0_18 = arith.constant 0 : index
      %c0_19 = arith.constant 0 : index
      %c0_20 = arith.constant 0 : index
      %64 = vector.load %arg8[%c0_18, %c0_19, %c0_20] : memref<1x3x512xf32, #tpu.memory_space<vmem>>, vector<1x3x512xf32>
      %65 = vector.shape_cast %64 : vector<1x3x512xf32> to vector<3x512xf32>
      %66 = vector.shape_cast %63 : vector<3x512xf32> to vector<1x3x512xf32>
      tpu.vector_store %arg8[%c0_18, %c0_19, %c0_20], %66 {strides = array<i32>} : memref<1x3x512xf32, #tpu.memory_space<vmem>>, vector<1x3x512xf32>,
    } else {
    }
    return
  }
  func.func @transform_0(%arg0: i32, %arg1: i32, %arg2: i32, %arg3: memref<2xi32, #tpu.memory_space<smem>>, %arg4: memref<2xi32, #tpu.memory_space<smem>>) -> (i32, i32, i32) {
    %c1_i32 = arith.constant 1 : i32
    %0 = arith.muli %arg0, %c1_i32 : i32
    %1 = arith.addi %0, %arg1 : i32
    %2 = arith.index_cast %1 : i32 to index
    %3 = memref.load %arg3[%2] : memref<2xi32, #tpu.memory_space<smem>>
    %4 = arith.addi %3, %arg2 : i32
    %c0_i32 = arith.constant 0 : i32
    %5 = arith.minsi %4, %c0_i32 : i32
    %c0_i32_0 = arith.constant 0 : i32
    %c0_i32_1 = arith.constant 0 : i32
    return %arg0, %c0_i32_0, %5 : i32, i32, i32
  }
  func.func @transform_1(%arg0: i32, %arg1: i32, %arg2: i32, %arg3: memref<2xi32, #tpu.memory_space<smem>>, %arg4: memref<2xi32, #tpu.memory_space<smem>>) -> (i32, i32, i32) {
    %c0_i32 = arith.constant 0 : i32
    %c0_i32_0 = arith.constant 0 : i32
    return %arg0, %c0_i32, %arg1 : i32, i32, i32
  }
  func.func @transform_2(%arg0: i32, %arg1: i32, %arg2: i32, %arg3: memref<2xi32, #tpu.memory_space<smem>>, %arg4: memref<2xi32, #tpu.memory_space<smem>>) -> (i32, i32, i32) {
    %c0_i32 = arith.constant 0 : i32
    %c0_i32_0 = arith.constant 0 : i32
    return %arg0, %c0_i32, %arg1 : i32, i32, i32
  }
  func.func @transform_3(%arg0: i32, %arg1: i32, %arg2: i32, %arg3: memref<2xi32, #tpu.memory_space<smem>>, %arg4: memref<2xi32, #tpu.memory_space<smem>>) -> (i32, i32, i32) {
    %c0_i32 = arith.constant 0 : i32
    %c0_i32_0 = arith.constant 0 : i32
    return %arg0, %c0_i32, %arg1 : i32, i32, i32
  }
}

</mosaic_0001>

<bundles_post_ra>
// kernel: tpu_custom_call.1
= control target key start
LH: loop header
LB: loop body
LE: loop exit
PB: predicated region body
PF: predicated region fallthrough
CT: control target
= control target key end

     0   :  { %s4275_s24 = smov [#allocation3]   ;;  %s4276_s25 = smov [#allocation4]   ;;  %s7801_s0 = inlined_call_operand.vmem [shape: s32[2], index: 0, kind: input, shape index: {}]   ;;  %s7802_s2 = inlined_call_operand.vmem [shape: f32[2,3,512], index: 2, kind: input, shape index: {}]   ;;  %s7803_s3 = inlined_call_operand.vmem [shape: s32[2,4,512], index: 3, kind: input, shape index: {}]   ;;  %s7804_s4 = inlined_call_operand.hbm [shape: f32[2,4,512], index: 4, kind: input, shape index: {}]   ;;  %s7805_s5 = inlined_call_operand.vmem [shape: f32[2,3,512], index: 5, kind: output, shape index: {}]   ;;  %s7806_s1 = inlined_call_operand.vmem [shape: s32[2], index: 1, kind: input, shape index: {}]  }
   0x1   :  { %s11_s20 = sshll.u32 %s7801_s0, 4  ;;  %s16_s23 = sshll.u32 %s7806_s1, 4  ;;  %s12_s20 = int_to_ptr.vmem [resolvable:$true] %s11_s20  ;;  %s17_s23 = int_to_ptr.vmem [resolvable:$true] %s16_s23 }
   0x2   :  { %14 = dma.vmem_to_smem %s12_s20, 16, %s4275_s24, [#allocation2] }
   0x3   :  { %19 = dma.vmem_to_smem %s17_s23, 16, %s4276_s25, [#allocation2] }
   0x4   :  { %4245 = dma.done.wait [#allocation2], 32 }
   0x5   :  { %4246 = vsyncadd [#allocation2], 4294967264 }
   0x6   :  { %22 = sfence }
   0x7   :  { %23 = vsyncpa [#allocation6], 0 }
   0x8   :  { %25 = vsyncpa [#allocation6 + $0x1], 0  ;;  %s4314_s26 = smov 0   ;;  %s4316_s27 = smov 0  }
   0x9   :  { %s4318_s0 = smov 0   ;;  %s4320_s28 = smov 0  }
   0xa   :  { %s4322_s1 = smov 0   ;;  %s4324_s29 = smov 0  }
   0xb LB: > { %s4075_s30 = sadd.s32 4294967295, %s4273_s29   ;;  %s50_s6 = sadd.s32 1, %s4269_s1  ;;  %s4273_s29 = sphi %s4324_s29, %s31_s29   ;;  %s4269_s1 = sphi %s4322_s1, %s8062_s1   ;;  %s4265_s28 = sphi %s4320_s28, %s8061_s28   ;;  %s4261_s0 = sphi %s4318_s0, %s8060_s0   ;;  %s4257_s27 = sphi %s4316_s27, %s8059_s27   ;;  %s4253_s26 = sphi %s4314_s26, %s8058_s26  }
   0xc   : > { %p52_p0 = scmp.ge.s32.totalorder %s50_s6, 2  ;;  %s125_s7 = sadd.s32 1, %s4261_s0 }
   0xd   : > { %p132_p1 = scmp.ne.s32.totalorder %s4261_s0, %s4257_s27  ;;  %p133_p2 = scmp.eq.s32.totalorder %s4273_s29, 0 }
   0xe   : > { %s8064_s6 = smov (%p52_p0, %s50_s6), 0  ;;  %p138_p4 = scmp.ne.s32.totalorder %s4257_s27, %s4253_s26 }
   0xf   : > { %p4350_p3 = por %p133_p2, %p132_p1  ;;  %s120_s9 = ssub.s32 %s4269_s1, %s8064_s6 }
  0x10   : > { %p139_p5 = scmp.eq.s32.totalorder %s4075_s30, 0  ;;  %p123_p6 = scmp.eq.s32.totalorder %s120_s9, 0 }
  0x11   : > { %p4105_p8 = scmp.lt.s32.totalorder %s4273_s29, 2  ;;  %s226_s12 = sand.u32 1, %s4261_s0  }
  0x12   : > { %p4357_p7 = por %p139_p5, %p138_p4  ;;  %s4096_s13 = sshll.u32 %s4269_s1, 4 }
  0x13   : > { %s4363_s11 = scalar_select %p123_p6, %s4261_s0, %s125_s7  }
  0x14   : > { %s4079_s14 = sshll.u32 %s226_s12, 4  ;;  %s237_s17 = scalar_lea.hbm %s7804_s4, %s4096_s13 }
  0x15   : > { %s239_s18 = sshll.u32 %s237_s17, 4  ;;  %s230_s19 = scalar_lea.vmem [#allocation5], %s4079_s14  ;;  %s240_s18 = int_to_ptr.hbm [resolvable:$true] %s239_s18 }
  0x16   : > { %s241_s20 = sshll.u32 %s230_s19, 4  ;;  %p4102_p9 = pnand %p4105_p8, %p4350_p3  ;;  %s242_s20 = int_to_ptr.vmem [resolvable:$true] %s241_s20 }
  0x17   : > { %p4082_p10 = scmp.ge.s32.totalorder %s4273_s29, 1  ;;  %p246_p11 = scmp.lt.s32.totalorder %s4273_s29, 3 }
  0x18   : > { %s227_s21 = scalar_lea.sflag [#allocation6], %s226_s12 }
  0x19   : > { %4104 = dma.hbm_to_vmem [thread:$0]  (!%p4102_p9), %s240_s18, 256, %s242_s20, %s227_s21  }
  0x1a   : > { %p247_p12 = pnand %p4082_p10, %p246_p11 }
  0x1b   : > { %s252_s22 = sand.u32 (!%p247_p12), 1, %s4257_s27  }
  0x1c   : > { %250 = sbr.rel (%p247_p12) target bundleno = 936 (0x3a8), region = 32  ;;  %s4083_s23 = sshll.u32 (!%p247_p12), %s252_s22, 4 }
  0x1d   : > { %s253_s24 = scalar_lea.sflag (!%p247_p12), [#allocation6], %s252_s22  ;;  %s4375_s25 = scalar_lea.vmem (!%p247_p12), [#allocation5], %s4083_s23 }
  0x21   : > { %4248 = dma.done.wait (%p4357_p7), %s253_s24, 256  }
  0x22   : > { %4250 = vsyncadd (%p4357_p7), %s253_s24, 4294967040  ;;  %p313_p13 = scmp.lt.s32.totalorder %s4265_s28, 1  ;;  %s308_s26 = sld [smem:[#allocation3 + %s4265_s28]]  ;;  %v4277_v0 = vmov 0.0  }
  0x23   : > { %s355_s30 = sld [smem:[#allocation4 + %s4265_s28]] }
  0x24   : > { %s314_s7 = scalar_select %p313_p13, %s4265_s28, 1 }
  0x26   : > { %s4097_s8 = sshll.u32 %s314_s7, 4  ;;  %s4085_s17 = sshll.u32 %s314_s7, 2 }
  0x27   : > { %s4388_s13 = scalar_lea.vmem %s7803_s3, %s4097_s8  ;;  %s4393_s16 = scalar_lea.vmem %s7805_s5, %s4097_s8 }
  0x28   : > { %p310_p0 = scmp.lt.s32.totalorder %s308_s26, 0  ;;  %353 = vst [vmem:[%s4393_s16] sm:$0x77] %v4277_v0 }
  0x29   : > { %354 = vst [vmem:[%s4393_s16 + $0x8] sm:$0x77] %v4277_v0  ;;  %p4092_p2 = scmp.le.s32.totalorder %s355_s30, 0 }
  0x2a   : > { %s8066_s26 = smov (!%p310_p0, %s308_s26), 0 }
  0x2b   : > { %s4084_s10 = sshll.u32 %s8066_s26, 2 }
  0x2c   : > { %p315_p1 = scmp.lt.s32.totalorder %s4084_s10, 3 }
  0x2d   : > { %359 = sbr.rel (%p4092_p2) target bundleno = 936 (0x3a8), region = 44 }
  0x2e   : > { %s8068_s10 = smov (!%p315_p1, %s4084_s10), 3 }
  0x2f   : > { %s318_s18 = sadd.s32 %s4085_s17, %s8068_s10 }
  0x30   : > { %s4086_s19 = sshll.u32 %s318_s18, 2 }
  0x31   : > { %s4400_s22 = scalar_lea.vmem %s7802_s2, %s4086_s19 }
  0x32   : > { %s360_s23 = sld [smem:[#allocation3 + %s4265_s28]]  ;;  %v366_v1 = vld [vmem:[%s4375_s25] sm:$0xff]  ;;  %v369_v2 = vlaneseq  ;;  %v364_v8 = vld [vmem:[%s4388_s13] sm:$0xff] }
  0x33   : > { %v703_v3 = vperm.slane %v366_v1, 0  ;;  %v1491_v4 = vperm.slane %v366_v1, 1  ;;  %v2279_v5 = vperm.slane %v366_v1, 2  ;;  %v3067_v6 = vperm.slane %v366_v1, 3  ;;  %v365_v22 = vld [vmem:[%s4388_s13 + $0x8] sm:$0xff] }
  0x34   : > { %v4404_v7 = vshrl.u32 %v369_v2, 7 }
  0x35   : > { %v4407_v9 = vperm.slane %v703_v3, 0  ;;  %v4409_v11 = vperm.slane %v1491_v4, 1  ;;  %v4411_v12 = vperm.slane %v2279_v5, 2  ;;  %v4413_v13 = vperm.slane %v3067_v6, 3 }
  0x36   : > { %v4416_v14 = vadd.s32 376, %v4404_v7  ;;  %v4421_v16 = vadd.s32 368, %v4404_v7  ;;  %v4424_v17 = vadd.s32 504, %v4404_v7  ;;  %v4427_v18 = vadd.s32 120, %v4404_v7 }
  0x37   : > { %v4430_v19 = vadd.s32 248, %v4404_v7  ;;  %v4433_v20 = vadd.s32 360, %v4404_v7  ;;  %v4436_v21 = vadd.s32 496, %v4404_v7  ;;  %v4444_v27 = vadd.s32 112, %v4404_v7 }
  0x38   : > { %s4093_s24 = sshll.u32 %s360_s23, 9  ;;  %7933 = vst [vmem:[#allocation9_spill] sm:$0xff] %v4416_v14  ;;  %v4447_v28 = vadd.s32 240, %v4404_v7  ;;  %v4450_v29 = vadd.s32 352, %v4404_v7  ;;  %v4453_v30 = vadd.s32 488, %v4404_v7  ;;  %v4466_v36 = vadd.s32 104, %v4404_v7 }
  0x39   : > { %v434_v10 = vstv %s4093_s24  ;;  %v4469_v37 = vadd.s32 232, %v4404_v7  ;;  %v4472_v38 = vadd.s32 344, %v4404_v7 }
  0x3a   : > { %v4418_v15 = vsub.s32 %v364_v8, %v434_v10  ;;  %v4463_v35 = vsub.s32 %v365_v22, %v434_v10 }
  0x3c   : > { %v437_v23 = vperm.slane %v4418_v15, 0  ;;  %v1227_v24 = vperm.slane %v4418_v15, 1  ;;  %v2015_v25 = vperm.slane %v4418_v15, 2  ;;  %v2803_v26 = vperm.slane %v4418_v15, 3  ;;  %7934 = vst [vmem:[#allocation10_spill] sm:$0xff] %v4463_v35 }
  0x3e   : > { %v4455_v31 = vperm.slane %v437_v23, 0  ;;  %v4457_v32 = vperm.slane %v1227_v24, 1  ;;  %v4459_v33 = vperm.slane %v2015_v25, 2  ;;  %v4461_v34 = vperm.slane %v2803_v26, 3 }
  0x40   : > { %vm633_vm0 = vcmp.eq.s32.totalorder %v4416_v14, %v4455_v31  ;;  %vm1423_vm1 = vcmp.eq.s32.totalorder %v4416_v14, %v4457_v32  ;;  %vm2211_vm2 = vcmp.eq.s32.totalorder %v4416_v14, %v4459_v33  ;;  %vm2999_vm3 = vcmp.eq.s32.totalorder %v4416_v14, %v4461_v34 }
  0x41   : > { %v903_v39 = vsel %vm633_vm0, %v4407_v9, 0.0  ;;  %v1691_v40 = vsel %vm1423_vm1, %v4409_v11, 0.0  ;;  %v2479_v41 = vsel %vm2211_vm2, %v4411_v12, 0.0  ;;  %v3267_v42 = vsel %vm2999_vm3, %v4413_v13, 0.0 }
  0x42   : > { %v1947_v43 = vadd.f32 %v1691_v40, %v903_v39  ;;  %vm629_vm4 = vcmp.eq.s32.totalorder %v4421_v16, %v4455_v31  ;;  %vm1419_vm5 = vcmp.eq.s32.totalorder %v4421_v16, %v4457_v32  ;;  %vm2207_vm6 = vcmp.eq.s32.totalorder %v4421_v16, %v4459_v33 }
  0x43   : > { %v899_v44 = vsel %vm629_vm4, %v4407_v9, 0.0  ;;  %v1687_v45 = vsel %vm1419_vm5, %v4409_v11, 0.0  ;;  %v2475_v46 = vsel %vm2207_vm6, %v4411_v12, 0.0  ;;  %vm2995_vm7 = vcmp.eq.s32.totalorder %v4421_v16, %v4461_v34 }
  0x44   : > { %v2735_v47 = vadd.f32 %v2479_v41, %v1947_v43  ;;  %v1943_v48 = vadd.f32 %v1687_v45, %v899_v44  ;;  %v3263_v49 = vsel %vm2995_vm7, %v4413_v13, 0.0  ;;  %vm697_vm8 = vcmp.eq.s32.totalorder %v4424_v17, %v4455_v31 }
  0x45   : > { %v967_v50 = vsel %vm697_vm8, %v4407_v9, 0.0  ;;  %vm1487_vm9 = vcmp.eq.s32.totalorder %v4424_v17, %v4457_v32  ;;  %vm2275_vm10 = vcmp.eq.s32.totalorder %v4424_v17, %v4459_v33  ;;  %vm3063_vm11 = vcmp.eq.s32.totalorder %v4424_v17, %v4461_v34 }
  0x46   : > { %v3523_v51 = vadd.f32 %v3267_v42, %v2735_v47  ;;  %v2731_v52 = vadd.f32 %v2475_v46, %v1943_v48  ;;  %v1755_v53 = vsel %vm1487_vm9, %v4409_v11, 0.0  ;;  %v2543_v54 = vsel %vm2275_vm10, %v4411_v12, 0.0 }
  0x47   : > { %v2011_v55 = vadd.f32 %v1755_v53, %v967_v50  ;;  %v3331_v56 = vsel %vm3063_vm11, %v4413_v13, 0.0  ;;  %vm505_vm12 = vcmp.eq.s32.totalorder %v4427_v18, %v4455_v31  ;;  %vm1295_vm13 = vcmp.eq.s32.totalorder %v4427_v18, %v4457_v32 }
  0x48   : > { %3646 = vmatpush.msra.mxu2 %v3523_v51  ;;  %v3519_v57 = vadd.f32 %v3263_v49, %v2731_v52  ;;  %v775_v58 = vsel %vm505_vm12, %v4407_v9, 0.0  ;;  %v1563_v59 = vsel %vm1295_vm13, %v4409_v11, 0.0  ;;  %vm2083_vm14 = vcmp.eq.s32.totalorder %v4427_v18, %v4459_v33 }
  0x49   : > { %v2799_v60 = vadd.f32 %v2543_v54, %v2011_v55  ;;  %v1819_v61 = vadd.f32 %v1563_v59, %v775_v58  ;;  %v2351_v62 = vsel %vm2083_vm14, %v4411_v12, 0.0  ;;  %vm2871_vm15 = vcmp.eq.s32.totalorder %v4427_v18, %v4461_v34 }
  0x4a   : > { %3647 = vmatpush.msra.mxu2 %v3519_v57  ;;  %v3139_v63 = vsel %vm2871_vm15, %v4413_v13, 0.0  ;;  %vm569_vm0 = vcmp.eq.s32.totalorder %v4430_v19, %v4455_v31  ;;  %vm1359_vm1 = vcmp.eq.s32.totalorder %v4430_v19, %v4457_v32  ;;  %vm2147_vm2 = vcmp.eq.s32.totalorder %v4430_v19, %v4459_v33 }
  0x4b   : > { %v3587_v0 = vadd.f32 %v3331_v56, %v2799_v60  ;;  %v2607_v1 = vadd.f32 %v2351_v62, %v1819_v61  ;;  %v839_v2 = vsel %vm569_vm0, %v4407_v9, 0.0  ;;  %v1627_v3 = vsel %vm1359_vm1, %v4409_v11, 0.0 }
  0x4c   : > { %v1883_v4 = vadd.f32 %v1627_v3, %v839_v2  ;;  %v2415_v5 = vsel %vm2147_vm2, %v4411_v12, 0.0  ;;  %vm2935_vm3 = vcmp.eq.s32.totalorder %v4430_v19, %v4461_v34  ;;  %vm625_vm4 = vcmp.eq.s32.totalorder %v4433_v20, %v4455_v31 }
  0x4d   : > { %3666 = vmatpush.msra.mxu3 %v3587_v0  ;;  %v3395_v6 = vadd.f32 %v3139_v63, %v2607_v1  ;;  %v3203_v8 = vsel %vm2935_vm3, %v4413_v13, 0.0  ;;  %v895_v10 = vsel %vm625_vm4, %v4407_v9, 0.0  ;;  %vm1415_vm5 = vcmp.eq.s32.totalorder %v4433_v20, %v4457_v32 }
  0x4e   : > { %v2671_v22 = vadd.f32 %v2415_v5, %v1883_v4  ;;  %v1683_v23 = vsel %vm1415_vm5, %v4409_v11, 0.0  ;;  %vm2203_vm6 = vcmp.eq.s32.totalorder %v4433_v20, %v4459_v33  ;;  %vm2991_vm7 = vcmp.eq.s32.totalorder %v4433_v20, %v4461_v34 }
  0x4f   : > { %3606 = vmatpush.msra.mxu0 %v3395_v6  ;;  %v1939_v24 = vadd.f32 %v1683_v23, %v895_v10  ;;  %v2471_v25 = vsel %vm2203_vm6, %v4411_v12, 0.0  ;;  %v3259_v26 = vsel %vm2991_vm7, %v4413_v13, 0.0  ;;  %vm693_vm8 = vcmp.eq.s32.totalorder %v4436_v21, %v4455_v31 }
  0x50   : > { %v3459_v39 = vadd.f32 %v3203_v8, %v2671_v22  ;;  %v963_v40 = vsel %vm693_vm8, %v4407_v9, 0.0  ;;  %vm1483_vm9 = vcmp.eq.s32.totalorder %v4436_v21, %v4457_v32  ;;  %vm2271_vm10 = vcmp.eq.s32.totalorder %v4436_v21, %v4459_v33 }
  0x51   : > { %v2727_v41 = vadd.f32 %v2471_v25, %v1939_v24  ;;  %v1751_v42 = vsel %vm1483_vm9, %v4409_v11, 0.0  ;;  %v2539_v43 = vsel %vm2271_vm10, %v4411_v12, 0.0  ;;  %vm3059_vm11 = vcmp.eq.s32.totalorder %v4436_v21, %v4461_v34 }
  0x52   : > { %3626 = vmatpush.msra.mxu1 %v3459_v39  ;;  %v2007_v44 = vadd.f32 %v1751_v42, %v963_v40  ;;  %v3327_v45 = vsel %vm3059_vm11, %v4413_v13, 0.0  ;;  %vm501_vm12 = vcmp.eq.s32.totalorder %v4444_v27, %v4455_v31  ;;  %vm1291_vm13 = vcmp.eq.s32.totalorder %v4444_v27, %v4457_v32 }
  0x53   : > { %v3515_v46 = vadd.f32 %v3259_v26, %v2727_v41  ;;  %v771_v47 = vsel %vm501_vm12, %v4407_v9, 0.0  ;;  %v1559_v48 = vsel %vm1291_vm13, %v4409_v11, 0.0  ;;  %vm2079_vm14 = vcmp.eq.s32.totalorder %v4444_v27, %v4459_v33 }
  0x54   : > { %v2795_v49 = vadd.f32 %v2539_v43, %v2007_v44  ;;  %v1815_v50 = vadd.f32 %v1559_v48, %v771_v47  ;;  %v2347_v51 = vsel %vm2079_vm14, %v4411_v12, 0.0  ;;  %vm2867_vm15 = vcmp.eq.s32.totalorder %v4444_v27, %v4461_v34 }
  0x55   : > { %3648 = vmatpush.msra.mxu2 %v3515_v46  ;;  %v3135_v52 = vsel %vm2867_vm15, %v4413_v13, 0.0  ;;  %vm565_vm0 = vcmp.eq.s32.totalorder %v4447_v28, %v4455_v31  ;;  %vm1355_vm1 = vcmp.eq.s32.totalorder %v4447_v28, %v4457_v32  ;;  %vm2143_vm2 = vcmp.eq.s32.totalorder %v4447_v28, %v4459_v33 }
  0x56   : > { %v3583_v53 = vadd.f32 %v3327_v45, %v2795_v49  ;;  %v2603_v54 = vadd.f32 %v2347_v51, %v1815_v50  ;;  %v835_v55 = vsel %vm565_vm0, %v4407_v9, 0.0  ;;  %v1623_v56 = vsel %vm1355_vm1, %v4409_v11, 0.0 }
  0x57   : > { %v1879_v57 = vadd.f32 %v1623_v56, %v835_v55  ;;  %v2411_v58 = vsel %vm2143_vm2, %v4411_v12, 0.0  ;;  %vm2931_vm3 = vcmp.eq.s32.totalorder %v4447_v28, %v4461_v34  ;;  %vm621_vm4 = vcmp.eq.s32.totalorder %v4450_v29, %v4455_v31 }
  0x58   : > { %3667 = vmatpush.msra.mxu3 %v3583_v53  ;;  %v3391_v59 = vadd.f32 %v3135_v52, %v2603_v54  ;;  %v3199_v60 = vsel %vm2931_vm3, %v4413_v13, 0.0  ;;  %v891_v61 = vsel %vm621_vm4, %v4407_v9, 0.0  ;;  %vm1411_vm5 = vcmp.eq.s32.totalorder %v4450_v29, %v4457_v32 }
  0x59   : > { %v2667_v62 = vadd.f32 %v2411_v58, %v1879_v57  ;;  %v1679_v63 = vsel %vm1411_vm5, %v4409_v11, 0.0  ;;  %vm2199_vm6 = vcmp.eq.s32.totalorder %v4450_v29, %v4459_v33  ;;  %vm2987_vm7 = vcmp.eq.s32.totalorder %v4450_v29, %v4461_v34 }
  0x5a   : > { %3607 = vmatpush.msra.mxu0 %v3391_v59  ;;  %v1935_v0 = vadd.f32 %v1679_v63, %v891_v61  ;;  %v2467_v1 = vsel %vm2199_vm6, %v4411_v12, 0.0  ;;  %v3255_v2 = vsel %vm2987_vm7, %v4413_v13, 0.0  ;;  %vm689_vm8 = vcmp.eq.s32.totalorder %v4453_v30, %v4455_v31 }
  0x5b   : > { %v3455_v3 = vadd.f32 %v3199_v60, %v2667_v62  ;;  %v959_v4 = vsel %vm689_vm8, %v4407_v9, 0.0  ;;  %vm1479_vm9 = vcmp.eq.s32.totalorder %v4453_v30, %v4457_v32  ;;  %vm2267_vm10 = vcmp.eq.s32.totalorder %v4453_v30, %v4459_v33 }
  0x5c   : > { %v2723_v5 = vadd.f32 %v2467_v1, %v1935_v0  ;;  %v1747_v6 = vsel %vm1479_vm9, %v4409_v11, 0.0  ;;  %v2535_v8 = vsel %vm2267_vm10, %v4411_v12, 0.0  ;;  %vm3055_vm11 = vcmp.eq.s32.totalorder %v4453_v30, %v4461_v34 }
  0x5d   : > { %3627 = vmatpush.msra.mxu1 %v3455_v3  ;;  %v2003_v10 = vadd.f32 %v1747_v6, %v959_v4  ;;  %v3323_v22 = vsel %vm3055_vm11, %v4413_v13, 0.0  ;;  %vm497_vm12 = vcmp.eq.s32.totalorder %v4466_v36, %v4455_v31  ;;  %vm1287_vm13 = vcmp.eq.s32.totalorder %v4466_v36, %v4457_v32 }
  0x5e   : > { %v3511_v23 = vadd.f32 %v3255_v2, %v2723_v5  ;;  %v767_v24 = vsel %vm497_vm12, %v4407_v9, 0.0  ;;  %v1555_v25 = vsel %vm1287_vm13, %v4409_v11, 0.0  ;;  %vm2075_vm14 = vcmp.eq.s32.totalorder %v4466_v36, %v4459_v33 }
  0x5f   : > { %v2791_v26 = vadd.f32 %v2535_v8, %v2003_v10  ;;  %v1811_v39 = vadd.f32 %v1555_v25, %v767_v24  ;;  %v2343_v40 = vsel %vm2075_vm14, %v4411_v12, 0.0  ;;  %vm2863_vm15 = vcmp.eq.s32.totalorder %v4466_v36, %v4461_v34 }
  0x60   : > { %3649 = vmatpush.msra.mxu2 %v3511_v23  ;;  %v3131_v41 = vsel %vm2863_vm15, %v4413_v13, 0.0  ;;  %vm561_vm0 = vcmp.eq.s32.totalorder %v4469_v37, %v4455_v31  ;;  %vm1351_vm1 = vcmp.eq.s32.totalorder %v4469_v37, %v4457_v32  ;;  %vm2139_vm2 = vcmp.eq.s32.totalorder %v4469_v37, %v4459_v33 }
  0x61   : > { %v3579_v42 = vadd.f32 %v3323_v22, %v2791_v26  ;;  %v2599_v43 = vadd.f32 %v2343_v40, %v1811_v39  ;;  %v831_v44 = vsel %vm561_vm0, %v4407_v9, 0.0  ;;  %v1619_v45 = vsel %vm1351_vm1, %v4409_v11, 0.0 }
  0x62   : > { %v1875_v46 = vadd.f32 %v1619_v45, %v831_v44  ;;  %v2407_v47 = vsel %vm2139_vm2, %v4411_v12, 0.0  ;;  %vm2927_vm3 = vcmp.eq.s32.totalorder %v4469_v37, %v4461_v34  ;;  %vm617_vm4 = vcmp.eq.s32.totalorder %v4472_v38, %v4455_v31 }
  0x63   : > { %3668 = vmatpush.msra.mxu3 %v3579_v42  ;;  %v3387_v48 = vadd.f32 %v3131_v41, %v2599_v43  ;;  %v3195_v49 = vsel %vm2927_vm3, %v4413_v13, 0.0  ;;  %v887_v50 = vsel %vm617_vm4, %v4407_v9, 0.0  ;;  %vm1407_vm5 = vcmp.eq.s32.totalorder %v4472_v38, %v4457_v32 }
  0x64   : > { %v2663_v51 = vadd.f32 %v2407_v47, %v1875_v46  ;;  %v1675_v52 = vsel %vm1407_vm5, %v4409_v11, 0.0  ;;  %vm2195_vm6 = vcmp.eq.s32.totalorder %v4472_v38, %v4459_v33  ;;  %vm2983_vm7 = vcmp.eq.s32.totalorder %v4472_v38, %v4461_v34 }
  0x65   : > { %3608 = vmatpush.msra.mxu0 %v3387_v48  ;;  %v1931_v53 = vadd.f32 %v1675_v52, %v887_v50  ;;  %v2463_v54 = vsel %vm2195_vm6, %v4411_v12, 0.0  ;;  %v3251_v55 = vsel %vm2983_vm7, %v4413_v13, 0.0  ;;  %v4643_v56 = vadd.s32 480, %v4404_v7 }
  0x66   : > { %v3451_v57 = vadd.f32 %v3195_v49, %v2663_v51  ;;  %v4646_v58 = vadd.s32 96, %v4404_v7  ;;  %v4649_v59 = vadd.s32 224, %v4404_v7  ;;  %v4652_v60 = vadd.s32 336, %v4404_v7 }
  0x67   : > { %v2719_v61 = vadd.f32 %v2463_v54, %v1931_v53  ;;  %vm685_vm8 = vcmp.eq.s32.totalorder %v4643_v56, %v4455_v31  ;;  %vm1475_vm9 = vcmp.eq.s32.totalorder %v4643_v56, %v4457_v32  ;;  %vm2263_vm10 = vcmp.eq.s32.totalorder %v4643_v56, %v4459_v33 }
  0x68   : > { %3628 = vmatpush.msra.mxu1 %v3451_v57  ;;  %v955_v62 = vsel %vm685_vm8, %v4407_v9, 0.0  ;;  %v1743_v63 = vsel %vm1475_vm9, %v4409_v11, 0.0  ;;  %v2531_v0 = vsel %vm2263_vm10, %v4411_v12, 0.0  ;;  %vm3051_vm11 = vcmp.eq.s32.totalorder %v4643_v56, %v4461_v34 }
  0x69   : > { %v3507_v1 = vadd.f32 %v3251_v55, %v2719_v61  ;;  %v1999_v2 = vadd.f32 %v1743_v63, %v955_v62  ;;  %v3319_v3 = vsel %vm3051_vm11, %v4413_v13, 0.0  ;;  %vm493_vm12 = vcmp.eq.s32.totalorder %v4646_v58, %v4455_v31 }
  0x6a   : > { %v763_v4 = vsel %vm493_vm12, %v4407_v9, 0.0  ;;  %vm1283_vm13 = vcmp.eq.s32.totalorder %v4646_v58, %v4457_v32  ;;  %vm2071_vm14 = vcmp.eq.s32.totalorder %v4646_v58, %v4459_v33  ;;  %vm2859_vm15 = vcmp.eq.s32.totalorder %v4646_v58, %v4461_v34 }
  0x6b   : > { %3650 = vmatpush.msra.mxu2 %v3507_v1  ;;  %v2787_v5 = vadd.f32 %v2531_v0, %v1999_v2  ;;  %v1551_v6 = vsel %vm1283_vm13, %v4409_v11, 0.0  ;;  %v2339_v8 = vsel %vm2071_vm14, %v4411_v12, 0.0  ;;  %v3127_v10 = vsel %vm2859_vm15, %v4413_v13, 0.0 }
  0x6c   : > { %v1807_v22 = vadd.f32 %v1551_v6, %v763_v4  ;;  %vm557_vm0 = vcmp.eq.s32.totalorder %v4649_v59, %v4455_v31  ;;  %vm1347_vm1 = vcmp.eq.s32.totalorder %v4649_v59, %v4457_v32  ;;  %vm2135_vm2 = vcmp.eq.s32.totalorder %v4649_v59, %v4459_v33 }
  0x6d   : > { %v3575_v23 = vadd.f32 %v3319_v3, %v2787_v5  ;;  %v827_v24 = vsel %vm557_vm0, %v4407_v9, 0.0  ;;  %v1615_v25 = vsel %vm1347_vm1, %v4409_v11, 0.0  ;;  %v2403_v26 = vsel %vm2135_vm2, %v4411_v12, 0.0 }
  0x6e   : > { %v2595_v39 = vadd.f32 %v2339_v8, %v1807_v22  ;;  %v1871_v40 = vadd.f32 %v1615_v25, %v827_v24  ;;  %vm2923_vm3 = vcmp.eq.s32.totalorder %v4649_v59, %v4461_v34  ;;  %vm613_vm4 = vcmp.eq.s32.totalorder %v4652_v60, %v4455_v31 }
  0x6f   : > { %3669 = vmatpush.msra.mxu3 %v3575_v23  ;;  %v3191_v41 = vsel %vm2923_vm3, %v4413_v13, 0.0  ;;  %v883_v42 = vsel %vm613_vm4, %v4407_v9, 0.0  ;;  %vm1403_vm5 = vcmp.eq.s32.totalorder %v4652_v60, %v4457_v32  ;;  %vm2191_vm6 = vcmp.eq.s32.totalorder %v4652_v60, %v4459_v33 }
  0x70   : > { %v3383_v43 = vadd.f32 %v3127_v10, %v2595_v39  ;;  %v2659_v44 = vadd.f32 %v2403_v26, %v1871_v40  ;;  %v1671_v45 = vsel %vm1403_vm5, %v4409_v11, 0.0  ;;  %v2459_v46 = vsel %vm2191_vm6, %v4411_v12, 0.0 }
  0x71   : > { %v1927_v47 = vadd.f32 %v1671_v45, %v883_v42  ;;  %vm2979_vm7 = vcmp.eq.s32.totalorder %v4652_v60, %v4461_v34  ;;  %v4702_v48 = vadd.s32 472, %v4404_v7  ;;  %v4705_v49 = vadd.s32 88, %v4404_v7 }
  0x72   : > { %3609 = vmatpush.msra.mxu0 %v3383_v43  ;;  %v3447_v50 = vadd.f32 %v3191_v41, %v2659_v44  ;;  %v3247_v51 = vsel %vm2979_vm7, %v4413_v13, 0.0  ;;  %v4709_v52 = vadd.s32 216, %v4404_v7  ;;  %v4712_v53 = vadd.s32 328, %v4404_v7 }
  0x73   : > { %v2715_v54 = vadd.f32 %v2459_v46, %v1927_v47  ;;  %vm681_vm8 = vcmp.eq.s32.totalorder %v4702_v48, %v4455_v31  ;;  %vm1471_vm9 = vcmp.eq.s32.totalorder %v4702_v48, %v4457_v32  ;;  %vm2259_vm10 = vcmp.eq.s32.totalorder %v4702_v48, %v4459_v33 }
  0x74   : > { %3629 = vmatpush.msra.mxu1 %v3447_v50  ;;  %v951_v55 = vsel %vm681_vm8, %v4407_v9, 0.0  ;;  %v1739_v57 = vsel %vm1471_vm9, %v4409_v11, 0.0  ;;  %v2527_v61 = vsel %vm2259_vm10, %v4411_v12, 0.0  ;;  %vm3047_vm11 = vcmp.eq.s32.totalorder %v4702_v48, %v4461_v34 }
  0x75   : > { %v3503_v62 = vadd.f32 %v3247_v51, %v2715_v54  ;;  %v1995_v63 = vadd.f32 %v1739_v57, %v951_v55  ;;  %v3315_v0 = vsel %vm3047_vm11, %v4413_v13, 0.0  ;;  %vm489_vm12 = vcmp.eq.s32.totalorder %v4705_v49, %v4455_v31 }
  0x76   : > { %v759_v1 = vsel %vm489_vm12, %v4407_v9, 0.0  ;;  %vm1279_vm13 = vcmp.eq.s32.totalorder %v4705_v49, %v4457_v32  ;;  %vm2067_vm14 = vcmp.eq.s32.totalorder %v4705_v49, %v4459_v33  ;;  %vm2855_vm15 = vcmp.eq.s32.totalorder %v4705_v49, %v4461_v34 }
  0x77   : > { %3651 = vmatpush.msra.mxu2 %v3503_v62  ;;  %v2783_v2 = vadd.f32 %v2527_v61, %v1995_v63  ;;  %v1547_v3 = vsel %vm1279_vm13, %v4409_v11, 0.0  ;;  %v2335_v4 = vsel %vm2067_vm14, %v4411_v12, 0.0  ;;  %v3123_v5 = vsel %vm2855_vm15, %v4413_v13, 0.0 }
  0x78   : > { %v1803_v6 = vadd.f32 %v1547_v3, %v759_v1  ;;  %vm553_vm0 = vcmp.eq.s32.totalorder %v4709_v52, %v4455_v31  ;;  %vm1343_vm1 = vcmp.eq.s32.totalorder %v4709_v52, %v4457_v32  ;;  %vm2131_vm2 = vcmp.eq.s32.totalorder %v4709_v52, %v4459_v33 }
  0x79   : > { %v3571_v8 = vadd.f32 %v3315_v0, %v2783_v2  ;;  %v823_v10 = vsel %vm553_vm0, %v4407_v9, 0.0  ;;  %v1611_v22 = vsel %vm1343_vm1, %v4409_v11, 0.0  ;;  %v2399_v23 = vsel %vm2131_vm2, %v4411_v12, 0.0 }
  0x7a   : > { %v2591_v24 = vadd.f32 %v2335_v4, %v1803_v6  ;;  %v1867_v25 = vadd.f32 %v1611_v22, %v823_v10  ;;  %vm2919_vm3 = vcmp.eq.s32.totalorder %v4709_v52, %v4461_v34  ;;  %vm609_vm4 = vcmp.eq.s32.totalorder %v4712_v53, %v4455_v31 }
  0x7b   : > { %3670 = vmatpush.msra.mxu3 %v3571_v8  ;;  %v3187_v26 = vsel %vm2919_vm3, %v4413_v13, 0.0  ;;  %v879_v39 = vsel %vm609_vm4, %v4407_v9, 0.0  ;;  %vm1399_vm5 = vcmp.eq.s32.totalorder %v4712_v53, %v4457_v32  ;;  %vm2187_vm6 = vcmp.eq.s32.totalorder %v4712_v53, %v4459_v33 }
  0x7c   : > { %v3379_v40 = vadd.f32 %v3123_v5, %v2591_v24  ;;  %v2655_v41 = vadd.f32 %v2399_v23, %v1867_v25  ;;  %v1667_v42 = vsel %vm1399_vm5, %v4409_v11, 0.0  ;;  %v2455_v43 = vsel %vm2187_vm6, %v4411_v12, 0.0 }
  0x7d   : > { %v1923_v44 = vadd.f32 %v1667_v42, %v879_v39  ;;  %vm2975_vm7 = vcmp.eq.s32.totalorder %v4712_v53, %v4461_v34  ;;  %v4762_v45 = vadd.s32 464, %v4404_v7  ;;  %v4765_v46 = vadd.s32 80, %v4404_v7 }
  0x7e   : > { %3610 = vmatpush.msra.mxu0 %v3379_v40  ;;  %v3443_v47 = vadd.f32 %v3187_v26, %v2655_v41  ;;  %v3243_v50 = vsel %vm2975_vm7, %v4413_v13, 0.0  ;;  %v4769_v51 = vadd.s32 208, %v4404_v7  ;;  %v4772_v54 = vadd.s32 320, %v4404_v7 }
  0x7f   : > { %v2711_v55 = vadd.f32 %v2455_v43, %v1923_v44  ;;  %vm677_vm8 = vcmp.eq.s32.totalorder %v4762_v45, %v4455_v31  ;;  %vm1467_vm9 = vcmp.eq.s32.totalorder %v4762_v45, %v4457_v32  ;;  %vm2255_vm10 = vcmp.eq.s32.totalorder %v4762_v45, %v4459_v33 }
  0x80   : > { %3630 = vmatpush.msra.mxu1 %v3443_v47  ;;  %v947_v57 = vsel %vm677_vm8, %v4407_v9, 0.0  ;;  %v1735_v61 = vsel %vm1467_vm9, %v4409_v11, 0.0  ;;  %v2523_v62 = vsel %vm2255_vm10, %v4411_v12, 0.0  ;;  %vm3043_vm11 = vcmp.eq.s32.totalorder %v4762_v45, %v4461_v34 }
  0x81   : > { %v3499_v63 = vadd.f32 %v3243_v50, %v2711_v55  ;;  %v1991_v0 = vadd.f32 %v1735_v61, %v947_v57  ;;  %v3311_v1 = vsel %vm3043_vm11, %v4413_v13, 0.0  ;;  %vm485_vm12 = vcmp.eq.s32.totalorder %v4765_v46, %v4455_v31 }
  0x82   : > { %v755_v2 = vsel %vm485_vm12, %v4407_v9, 0.0  ;;  %vm1275_vm13 = vcmp.eq.s32.totalorder %v4765_v46, %v4457_v32  ;;  %vm2063_vm14 = vcmp.eq.s32.totalorder %v4765_v46, %v4459_v33  ;;  %vm2851_vm15 = vcmp.eq.s32.totalorder %v4765_v46, %v4461_v34 }
  0x83   : > { %3652 = vmatpush.msra.mxu2 %v3499_v63  ;;  %v2779_v3 = vadd.f32 %v2523_v62, %v1991_v0  ;;  %v1543_v4 = vsel %vm1275_vm13, %v4409_v11, 0.0  ;;  %v2331_v5 = vsel %vm2063_vm14, %v4411_v12, 0.0  ;;  %v3119_v6 = vsel %vm2851_vm15, %v4413_v13, 0.0 }
  0x84   : > { %v1799_v8 = vadd.f32 %v1543_v4, %v755_v2  ;;  %vm549_vm0 = vcmp.eq.s32.totalorder %v4769_v51, %v4455_v31  ;;  %vm1339_vm1 = vcmp.eq.s32.totalorder %v4769_v51, %v4457_v32  ;;  %vm2127_vm2 = vcmp.eq.s32.totalorder %v4769_v51, %v4459_v33 }
  0x85   : > { %v3567_v10 = vadd.f32 %v3311_v1, %v2779_v3  ;;  %v819_v22 = vsel %vm549_vm0, %v4407_v9, 0.0  ;;  %v1607_v23 = vsel %vm1339_vm1, %v4409_v11, 0.0  ;;  %v2395_v24 = vsel %vm2127_vm2, %v4411_v12, 0.0 }
  0x86   : > { %v2587_v25 = vadd.f32 %v2331_v5, %v1799_v8  ;;  %v1863_v26 = vadd.f32 %v1607_v23, %v819_v22  ;;  %vm2915_vm3 = vcmp.eq.s32.totalorder %v4769_v51, %v4461_v34  ;;  %vm605_vm4 = vcmp.eq.s32.totalorder %v4772_v54, %v4455_v31 }
  0x87   : > { %3671 = vmatpush.msra.mxu3 %v3567_v10  ;;  %v3183_v39 = vsel %vm2915_vm3, %v4413_v13, 0.0  ;;  %v875_v40 = vsel %vm605_vm4, %v4407_v9, 0.0  ;;  %vm1395_vm5 = vcmp.eq.s32.totalorder %v4772_v54, %v4457_v32  ;;  %vm2183_vm6 = vcmp.eq.s32.totalorder %v4772_v54, %v4459_v33 }
  0x88   : > { %v3375_v41 = vadd.f32 %v3119_v6, %v2587_v25  ;;  %v2651_v42 = vadd.f32 %v2395_v24, %v1863_v26  ;;  %v1663_v43 = vsel %vm1395_vm5, %v4409_v11, 0.0  ;;  %v2451_v44 = vsel %vm2183_vm6, %v4411_v12, 0.0 }
  0x89   : > { %v1919_v47 = vadd.f32 %v1663_v43, %v875_v40  ;;  %vm2971_vm7 = vcmp.eq.s32.totalorder %v4772_v54, %v4461_v34  ;;  %v4822_v50 = vadd.s32 456, %v4404_v7  ;;  %v4825_v55 = vadd.s32 72, %v4404_v7 }
  0x8a   : > { %3611 = vmatpush.msra.mxu0 %v3375_v41  ;;  %v3439_v57 = vadd.f32 %v3183_v39, %v2651_v42  ;;  %v3239_v61 = vsel %vm2971_vm7, %v4413_v13, 0.0  ;;  %v4829_v62 = vadd.s32 200, %v4404_v7  ;;  %v4832_v63 = vadd.s32 312, %v4404_v7 }
  0x8b   : > { %v2707_v0 = vadd.f32 %v2451_v44, %v1919_v47  ;;  %vm673_vm8 = vcmp.eq.s32.totalorder %v4822_v50, %v4455_v31  ;;  %vm1463_vm9 = vcmp.eq.s32.totalorder %v4822_v50, %v4457_v32  ;;  %vm2251_vm10 = vcmp.eq.s32.totalorder %v4822_v50, %v4459_v33 }
  0x8c   : > { %7935 = vst [vmem:[#allocation11_spill] sm:$0xff] %v4832_v63  ;;  %3631 = vmatpush.msra.mxu1 %v3439_v57  ;;  %v943_v1 = vsel %vm673_vm8, %v4407_v9, 0.0  ;;  %v1731_v2 = vsel %vm1463_vm9, %v4409_v11, 0.0  ;;  %v2519_v3 = vsel %vm2251_vm10, %v4411_v12, 0.0  ;;  %vm3039_vm11 = vcmp.eq.s32.totalorder %v4822_v50, %v4461_v34 }
  0x8d   : > { %v3495_v4 = vadd.f32 %v3239_v61, %v2707_v0  ;;  %v1987_v5 = vadd.f32 %v1731_v2, %v943_v1  ;;  %v3307_v6 = vsel %vm3039_vm11, %v4413_v13, 0.0  ;;  %vm481_vm12 = vcmp.eq.s32.totalorder %v4825_v55, %v4455_v31 }
  0x8e   : > { %v751_v8 = vsel %vm481_vm12, %v4407_v9, 0.0  ;;  %vm1271_vm13 = vcmp.eq.s32.totalorder %v4825_v55, %v4457_v32  ;;  %vm2059_vm14 = vcmp.eq.s32.totalorder %v4825_v55, %v4459_v33  ;;  %vm2847_vm15 = vcmp.eq.s32.totalorder %v4825_v55, %v4461_v34 }
  0x8f   : > { %3653 = vmatpush.msra.mxu2 %v3495_v4  ;;  %v2775_v10 = vadd.f32 %v2519_v3, %v1987_v5  ;;  %v1539_v22 = vsel %vm1271_vm13, %v4409_v11, 0.0  ;;  %v2327_v23 = vsel %vm2059_vm14, %v4411_v12, 0.0  ;;  %v3115_v24 = vsel %vm2847_vm15, %v4413_v13, 0.0 }
  0x90   : > { %v1795_v25 = vadd.f32 %v1539_v22, %v751_v8  ;;  %vm545_vm0 = vcmp.eq.s32.totalorder %v4829_v62, %v4455_v31  ;;  %vm1335_vm1 = vcmp.eq.s32.totalorder %v4829_v62, %v4457_v32  ;;  %vm2123_vm2 = vcmp.eq.s32.totalorder %v4829_v62, %v4459_v33 }
  0x91   : > { %v3563_v26 = vadd.f32 %v3307_v6, %v2775_v10  ;;  %v815_v39 = vsel %vm545_vm0, %v4407_v9, 0.0  ;;  %v1603_v40 = vsel %vm1335_vm1, %v4409_v11, 0.0  ;;  %v2391_v41 = vsel %vm2123_vm2, %v4411_v12, 0.0 }
  0x92   : > { %v2583_v42 = vadd.f32 %v2327_v23, %v1795_v25  ;;  %v1859_v43 = vadd.f32 %v1603_v40, %v815_v39  ;;  %vm2911_vm3 = vcmp.eq.s32.totalorder %v4829_v62, %v4461_v34  ;;  %vm601_vm4 = vcmp.eq.s32.totalorder %v4832_v63, %v4455_v31 }
  0x93   : > { %3672 = vmatpush.msra.mxu3 %v3563_v26  ;;  %v3179_v44 = vsel %vm2911_vm3, %v4413_v13, 0.0  ;;  %v871_v47 = vsel %vm601_vm4, %v4407_v9, 0.0  ;;  %vm1391_vm5 = vcmp.eq.s32.totalorder %v4832_v63, %v4457_v32  ;;  %vm2179_vm6 = vcmp.eq.s32.totalorder %v4832_v63, %v4459_v33 }
  0x94   : > { %v3371_v57 = vadd.f32 %v3115_v24, %v2583_v42  ;;  %v2647_v61 = vadd.f32 %v2391_v41, %v1859_v43  ;;  %v1659_v0 = vsel %vm1391_vm5, %v4409_v11, 0.0  ;;  %v2447_v1 = vsel %vm2179_vm6, %v4411_v12, 0.0 }
  0x95   : > { %v1915_v2 = vadd.f32 %v1659_v0, %v871_v47  ;;  %vm2967_vm7 = vcmp.eq.s32.totalorder %v4832_v63, %v4461_v34  ;;  %v4882_v3 = vadd.s32 448, %v4404_v7  ;;  %v4885_v4 = vadd.s32 64, %v4404_v7 }
  0x96   : > { %3612 = vmatpush.msra.mxu0 %v3371_v57  ;;  %v3435_v5 = vadd.f32 %v3179_v44, %v2647_v61  ;;  %v3235_v6 = vsel %vm2967_vm7, %v4413_v13, 0.0  ;;  %v4889_v8 = vadd.s32 192, %v4404_v7  ;;  %v4892_v10 = vadd.s32 304, %v4404_v7 }
  0x97   : > { %7936 = vst [vmem:[#allocation12_spill] sm:$0xff] %v4882_v3  ;;  %v2703_v22 = vadd.f32 %v2447_v1, %v1915_v2  ;;  %vm669_vm8 = vcmp.eq.s32.totalorder %v4882_v3, %v4455_v31  ;;  %vm1459_vm9 = vcmp.eq.s32.totalorder %v4882_v3, %v4457_v32  ;;  %vm2247_vm10 = vcmp.eq.s32.totalorder %v4882_v3, %v4459_v33 }
  0x98   : > { %7937 = vst [vmem:[#allocation13_spill] sm:$0xff] %v4885_v4  ;;  %3632 = vmatpush.msra.mxu1 %v3435_v5  ;;  %v939_v23 = vsel %vm669_vm8, %v4407_v9, 0.0  ;;  %v1727_v24 = vsel %vm1459_vm9, %v4409_v11, 0.0  ;;  %v2515_v25 = vsel %vm2247_vm10, %v4411_v12, 0.0  ;;  %vm3035_vm11 = vcmp.eq.s32.totalorder %v4882_v3, %v4461_v34 }
  0x99   : > { %7938 = vst [vmem:[#allocation14_spill] sm:$0xff] %v4889_v8  ;;  %v3491_v26 = vadd.f32 %v3235_v6, %v2703_v22  ;;  %v1983_v39 = vadd.f32 %v1727_v24, %v939_v23  ;;  %v3303_v40 = vsel %vm3035_vm11, %v4413_v13, 0.0  ;;  %vm477_vm12 = vcmp.eq.s32.totalorder %v4885_v4, %v4455_v31 }
  0x9a   : > { %7939 = vst [vmem:[#allocation15_spill] sm:$0xff] %v4892_v10  ;;  %v747_v41 = vsel %vm477_vm12, %v4407_v9, 0.0  ;;  %vm1267_vm13 = vcmp.eq.s32.totalorder %v4885_v4, %v4457_v32  ;;  %vm2055_vm14 = vcmp.eq.s32.totalorder %v4885_v4, %v4459_v33  ;;  %vm2843_vm15 = vcmp.eq.s32.totalorder %v4885_v4, %v4461_v34 }
  0x9b   : > { %3654 = vmatpush.msra.mxu2 %v3491_v26  ;;  %v2771_v42 = vadd.f32 %v2515_v25, %v1983_v39  ;;  %v1535_v43 = vsel %vm1267_vm13, %v4409_v11, 0.0  ;;  %v2323_v44 = vsel %vm2055_vm14, %v4411_v12, 0.0  ;;  %v3111_v47 = vsel %vm2843_vm15, %v4413_v13, 0.0 }
  0x9c   : > { %v1791_v57 = vadd.f32 %v1535_v43, %v747_v41  ;;  %vm541_vm0 = vcmp.eq.s32.totalorder %v4889_v8, %v4455_v31  ;;  %vm1331_vm1 = vcmp.eq.s32.totalorder %v4889_v8, %v4457_v32  ;;  %vm2119_vm2 = vcmp.eq.s32.totalorder %v4889_v8, %v4459_v33 }
  0x9d   : > { %v3559_v61 = vadd.f32 %v3303_v40, %v2771_v42  ;;  %v811_v0 = vsel %vm541_vm0, %v4407_v9, 0.0  ;;  %v1599_v1 = vsel %vm1331_vm1, %v4409_v11, 0.0  ;;  %v2387_v2 = vsel %vm2119_vm2, %v4411_v12, 0.0 }
  0x9e   : > { %v2579_v5 = vadd.f32 %v2323_v44, %v1791_v57  ;;  %v1855_v6 = vadd.f32 %v1599_v1, %v811_v0  ;;  %vm2907_vm3 = vcmp.eq.s32.totalorder %v4889_v8, %v4461_v34  ;;  %vm597_vm4 = vcmp.eq.s32.totalorder %v4892_v10, %v4455_v31 }
  0x9f   : > { %3673 = vmatpush.msra.mxu3 %v3559_v61  ;;  %v3175_v22 = vsel %vm2907_vm3, %v4413_v13, 0.0  ;;  %v867_v23 = vsel %vm597_vm4, %v4407_v9, 0.0  ;;  %vm1387_vm5 = vcmp.eq.s32.totalorder %v4892_v10, %v4457_v32  ;;  %vm2175_vm6 = vcmp.eq.s32.totalorder %v4892_v10, %v4459_v33 }
  0xa0   : > { %v3367_v24 = vadd.f32 %v3111_v47, %v2579_v5  ;;  %v2643_v25 = vadd.f32 %v2387_v2, %v1855_v6  ;;  %v1655_v26 = vsel %vm1387_vm5, %v4409_v11, 0.0  ;;  %v2443_v39 = vsel %vm2175_vm6, %v4411_v12, 0.0 }
  0xa1   : > { %v1911_v40 = vadd.f32 %v1655_v26, %v867_v23  ;;  %vm2963_vm7 = vcmp.eq.s32.totalorder %v4892_v10, %v4461_v34  ;;  %v4942_v41 = vadd.s32 440, %v4404_v7  ;;  %v4945_v42 = vadd.s32 56, %v4404_v7 }
  0xa2   : > { %3613 = vmatpush.msra.mxu0 %v3367_v24  ;;  %v3431_v43 = vadd.f32 %v3175_v22, %v2643_v25  ;;  %v3231_v44 = vsel %vm2963_vm7, %v4413_v13, 0.0  ;;  %v4949_v47 = vadd.s32 184, %v4404_v7  ;;  %v4952_v57 = vadd.s32 296, %v4404_v7 }
  0xa3   : > { %7940 = vst [vmem:[#allocation16_spill] sm:$0xff] %v4942_v41  ;;  %v2699_v61 = vadd.f32 %v2443_v39, %v1911_v40  ;;  %vm665_vm8 = vcmp.eq.s32.totalorder %v4942_v41, %v4455_v31  ;;  %vm1455_vm9 = vcmp.eq.s32.totalorder %v4942_v41, %v4457_v32  ;;  %vm2243_vm10 = vcmp.eq.s32.totalorder %v4942_v41, %v4459_v33 }
  0xa4   : > { %7941 = vst [vmem:[#allocation17_spill] sm:$0xff] %v4945_v42  ;;  %3633 = vmatpush.msra.mxu1 %v3431_v43  ;;  %v935_v0 = vsel %vm665_vm8, %v4407_v9, 0.0  ;;  %v1723_v1 = vsel %vm1455_vm9, %v4409_v11, 0.0  ;;  %v2511_v2 = vsel %vm2243_vm10, %v4411_v12, 0.0  ;;  %vm3031_vm11 = vcmp.eq.s32.totalorder %v4942_v41, %v4461_v34 }
  0xa5   : > { %7942 = vst [vmem:[#allocation18_spill] sm:$0xff] %v4949_v47  ;;  %v3487_v5 = vadd.f32 %v3231_v44, %v2699_v61  ;;  %v1979_v6 = vadd.f32 %v1723_v1, %v935_v0  ;;  %v3299_v22 = vsel %vm3031_vm11, %v4413_v13, 0.0  ;;  %vm473_vm12 = vcmp.eq.s32.totalorder %v4945_v42, %v4455_v31 }
  0xa6   : > { %7943 = vst [vmem:[#allocation19_spill] sm:$0xff] %v4952_v57  ;;  %v743_v23 = vsel %vm473_vm12, %v4407_v9, 0.0  ;;  %vm1263_vm13 = vcmp.eq.s32.totalorder %v4945_v42, %v4457_v32  ;;  %vm2051_vm14 = vcmp.eq.s32.totalorder %v4945_v42, %v4459_v33  ;;  %vm2839_vm15 = vcmp.eq.s32.totalorder %v4945_v42, %v4461_v34 }
  0xa7   : > { %3655 = vmatpush.msra.mxu2 %v3487_v5  ;;  %v2767_v24 = vadd.f32 %v2511_v2, %v1979_v6  ;;  %v1531_v25 = vsel %vm1263_vm13, %v4409_v11, 0.0  ;;  %v2319_v26 = vsel %vm2051_vm14, %v4411_v12, 0.0  ;;  %v3107_v39 = vsel %vm2839_vm15, %v4413_v13, 0.0 }
  0xa8   : > { %v1787_v40 = vadd.f32 %v1531_v25, %v743_v23  ;;  %vm537_vm0 = vcmp.eq.s32.totalorder %v4949_v47, %v4455_v31  ;;  %vm1327_vm1 = vcmp.eq.s32.totalorder %v4949_v47, %v4457_v32  ;;  %vm2115_vm2 = vcmp.eq.s32.totalorder %v4949_v47, %v4459_v33 }
  0xa9   : > { %v3555_v43 = vadd.f32 %v3299_v22, %v2767_v24  ;;  %v807_v44 = vsel %vm537_vm0, %v4407_v9, 0.0  ;;  %v1595_v61 = vsel %vm1327_vm1, %v4409_v11, 0.0  ;;  %v2383_v0 = vsel %vm2115_vm2, %v4411_v12, 0.0 }
  0xaa   : > { %v2575_v1 = vadd.f32 %v2319_v26, %v1787_v40  ;;  %v1851_v2 = vadd.f32 %v1595_v61, %v807_v44  ;;  %vm2903_vm3 = vcmp.eq.s32.totalorder %v4949_v47, %v4461_v34  ;;  %vm593_vm4 = vcmp.eq.s32.totalorder %v4952_v57, %v4455_v31 }
  0xab   : > { %3674 = vmatpush.msra.mxu3 %v3555_v43  ;;  %v3171_v5 = vsel %vm2903_vm3, %v4413_v13, 0.0  ;;  %v863_v6 = vsel %vm593_vm4, %v4407_v9, 0.0  ;;  %vm1383_vm5 = vcmp.eq.s32.totalorder %v4952_v57, %v4457_v32  ;;  %vm2171_vm6 = vcmp.eq.s32.totalorder %v4952_v57, %v4459_v33 }
  0xac   : > { %v3363_v22 = vadd.f32 %v3107_v39, %v2575_v1  ;;  %v2639_v23 = vadd.f32 %v2383_v0, %v1851_v2  ;;  %v1651_v24 = vsel %vm1383_vm5, %v4409_v11, 0.0  ;;  %v2439_v25 = vsel %vm2171_vm6, %v4411_v12, 0.0 }
  0xad   : > { %v1907_v26 = vadd.f32 %v1651_v24, %v863_v6  ;;  %vm2959_vm7 = vcmp.eq.s32.totalorder %v4952_v57, %v4461_v34  ;;  %v5002_v40 = vadd.s32 432, %v4404_v7  ;;  %v5005_v43 = vadd.s32 48, %v4404_v7  ;;  %v4157_v57 = vld [vmem:[%s4375_s25] sm:$0xff] }
  0xae   : > { %3614 = vmatpush.msra.mxu0 %v3363_v22  ;;  %v3427_v44 = vadd.f32 %v3171_v5, %v2639_v23  ;;  %v3227_v61 = vsel %vm2959_vm7, %v4413_v13, 0.0  ;;  %v5009_v39 = vadd.s32 176, %v4404_v7  ;;  %v5012_v0 = vadd.s32 288, %v4404_v7 }
  0xaf   : > { %7944 = vst [vmem:[#allocation20_spill] sm:$0xff] %v5002_v40  ;;  %v2695_v1 = vadd.f32 %v2439_v25, %v1907_v26  ;;  %vm661_vm8 = vcmp.eq.s32.totalorder %v5002_v40, %v4455_v31  ;;  %vm1451_vm9 = vcmp.eq.s32.totalorder %v5002_v40, %v4457_v32  ;;  %vm2239_vm10 = vcmp.eq.s32.totalorder %v5002_v40, %v4459_v33 }
  0xb0   : > { %7945 = vst [vmem:[#allocation21_spill] sm:$0xff] %v5005_v43  ;;  %3634 = vmatpush.msra.mxu1 %v3427_v44  ;;  %v931_v2 = vsel %vm661_vm8, %v4407_v9, 0.0  ;;  %v1719_v5 = vsel %vm1451_vm9, %v4409_v11, 0.0  ;;  %v2507_v6 = vsel %vm2239_vm10, %v4411_v12, 0.0  ;;  %vm3027_vm11 = vcmp.eq.s32.totalorder %v5002_v40, %v4461_v34 }
  0xb1   : > { %7946 = vst [vmem:[#allocation22_spill] sm:$0xff] %v5009_v39  ;;  %v3483_v22 = vadd.f32 %v3227_v61, %v2695_v1  ;;  %v1975_v23 = vadd.f32 %v1719_v5, %v931_v2  ;;  %v3295_v24 = vsel %vm3027_vm11, %v4413_v13, 0.0  ;;  %vm469_vm12 = vcmp.eq.s32.totalorder %v5005_v43, %v4455_v31 }
  0xb2   : > { %7947 = vst [vmem:[#allocation23_spill] sm:$0xff] %v5012_v0  ;;  %v739_v25 = vsel %vm469_vm12, %v4407_v9, 0.0  ;;  %vm1259_vm13 = vcmp.eq.s32.totalorder %v5005_v43, %v4457_v32  ;;  %vm2047_vm14 = vcmp.eq.s32.totalorder %v5005_v43, %v4459_v33  ;;  %vm2835_vm15 = vcmp.eq.s32.totalorder %v5005_v43, %v4461_v34 }
  0xb3   : > { %3656 = vmatpush.msra.mxu2 %v3483_v22  ;;  %v2763_v26 = vadd.f32 %v2507_v6, %v1975_v23  ;;  %v1527_v44 = vsel %vm1259_vm13, %v4409_v11, 0.0  ;;  %v2315_v61 = vsel %vm2047_vm14, %v4411_v12, 0.0  ;;  %v3103_v1 = vsel %vm2835_vm15, %v4413_v13, 0.0 }
  0xb4   : > { %v1783_v2 = vadd.f32 %v1527_v44, %v739_v25  ;;  %vm533_vm0 = vcmp.eq.s32.totalorder %v5009_v39, %v4455_v31  ;;  %vm1323_vm1 = vcmp.eq.s32.totalorder %v5009_v39, %v4457_v32  ;;  %vm2111_vm2 = vcmp.eq.s32.totalorder %v5009_v39, %v4459_v33 }
  0xb5   : > { %v3551_v5 = vadd.f32 %v3295_v24, %v2763_v26  ;;  %v803_v22 = vsel %vm533_vm0, %v4407_v9, 0.0  ;;  %v1591_v6 = vsel %vm1323_vm1, %v4409_v11, 0.0  ;;  %v2379_v23 = vsel %vm2111_vm2, %v4411_v12, 0.0 }
  0xb6   : > { %v2571_v35 = vadd.f32 %v2315_v61, %v1783_v2  ;;  %v1847_v43 = vadd.f32 %v1591_v6, %v803_v22  ;;  %vm2899_vm3 = vcmp.eq.s32.totalorder %v5009_v39, %v4461_v34  ;;  %vm589_vm4 = vcmp.eq.s32.totalorder %v5012_v0, %v4455_v31 }
  0xb7   : > { %3675 = vmatpush.msra.mxu3 %v3551_v5  ;;  %v3167_v25 = vsel %vm2899_vm3, %v4413_v13, 0.0  ;;  %v859_v44 = vsel %vm589_vm4, %v4407_v9, 0.0  ;;  %vm1379_vm5 = vcmp.eq.s32.totalorder %v5012_v0, %v4457_v32  ;;  %vm2167_vm6 = vcmp.eq.s32.totalorder %v5012_v0, %v4459_v33 }
  0xb8   : > { %v3359_v24 = vadd.f32 %v3103_v1, %v2571_v35  ;;  %v2635_v26 = vadd.f32 %v2379_v23, %v1847_v43  ;;  %v1647_v61 = vsel %vm1379_vm5, %v4409_v11, 0.0  ;;  %v2435_v2 = vsel %vm2167_vm6, %v4411_v12, 0.0 }
  0xb9   : > { %v1903_v22 = vadd.f32 %v1647_v61, %v859_v44  ;;  %vm2955_vm7 = vcmp.eq.s32.totalorder %v5012_v0, %v4461_v34  ;;  %v5062_v5 = vadd.s32 424, %v4404_v7  ;;  %v5065_v6 = vadd.s32 40, %v4404_v7 }
  0xba   : > { %3615 = vmatpush.msra.mxu0 %v3359_v24  ;;  %v3423_v39 = vadd.f32 %v3167_v25, %v2635_v26  ;;  %v3223_v40 = vsel %vm2955_vm7, %v4413_v13, 0.0  ;;  %v5069_v35 = vadd.s32 168, %v4404_v7  ;;  %v5072_v43 = vadd.s32 280, %v4404_v7 }
  0xbb   : > { %7948 = vst [vmem:[#allocation24_spill] sm:$0xff] %v5062_v5  ;;  %v2691_v1 = vadd.f32 %v2435_v2, %v1903_v22  ;;  %vm657_vm8 = vcmp.eq.s32.totalorder %v5062_v5, %v4455_v31  ;;  %vm1447_vm9 = vcmp.eq.s32.totalorder %v5062_v5, %v4457_v32  ;;  %vm2235_vm10 = vcmp.eq.s32.totalorder %v5062_v5, %v4459_v33 }
  0xbc   : > { %7949 = vst [vmem:[#allocation25_spill] sm:$0xff] %v5065_v6  ;;  %3635 = vmatpush.msra.mxu1 %v3423_v39  ;;  %v927_v23 = vsel %vm657_vm8, %v4407_v9, 0.0  ;;  %v1715_v25 = vsel %vm1447_vm9, %v4409_v11, 0.0  ;;  %v2503_v44 = vsel %vm2235_vm10, %v4411_v12, 0.0  ;;  %vm3023_vm11 = vcmp.eq.s32.totalorder %v5062_v5, %v4461_v34 }
  0xbd   : > { %7950 = vst [vmem:[#allocation26_spill] sm:$0xff] %v5069_v35  ;;  %v3479_v24 = vadd.f32 %v3223_v40, %v2691_v1  ;;  %v1971_v26 = vadd.f32 %v1715_v25, %v927_v23  ;;  %v3291_v61 = vsel %vm3023_vm11, %v4413_v13, 0.0  ;;  %vm465_vm12 = vcmp.eq.s32.totalorder %v5065_v6, %v4455_v31 }
  0xbe   : > { %7951 = vst [vmem:[#allocation27_spill] sm:$0xff] %v5072_v43  ;;  %v735_v2 = vsel %vm465_vm12, %v4407_v9, 0.0  ;;  %vm1255_vm13 = vcmp.eq.s32.totalorder %v5065_v6, %v4457_v32  ;;  %vm2043_vm14 = vcmp.eq.s32.totalorder %v5065_v6, %v4459_v33  ;;  %vm2831_vm15 = vcmp.eq.s32.totalorder %v5065_v6, %v4461_v34 }
  0xbf   : > { %3657 = vmatpush.msra.mxu2 %v3479_v24  ;;  %v2759_v39 = vadd.f32 %v2503_v44, %v1971_v26  ;;  %v1523_v40 = vsel %vm1255_vm13, %v4409_v11, 0.0  ;;  %v2311_v22 = vsel %vm2043_vm14, %v4411_v12, 0.0  ;;  %v3099_v1 = vsel %vm2831_vm15, %v4413_v13, 0.0 }
  0xc0   : > { %v1779_v23 = vadd.f32 %v1523_v40, %v735_v2  ;;  %vm529_vm0 = vcmp.eq.s32.totalorder %v5069_v35, %v4455_v31  ;;  %vm1319_vm1 = vcmp.eq.s32.totalorder %v5069_v35, %v4457_v32  ;;  %vm2107_vm2 = vcmp.eq.s32.totalorder %v5069_v35, %v4459_v33 }
  0xc1   : > { %v3547_v25 = vadd.f32 %v3291_v61, %v2759_v39  ;;  %v799_v24 = vsel %vm529_vm0, %v4407_v9, 0.0  ;;  %v1587_v44 = vsel %vm1319_vm1, %v4409_v11, 0.0  ;;  %v2375_v26 = vsel %vm2107_vm2, %v4411_v12, 0.0 }
  0xc2   : > { %v2567_v6 = vadd.f32 %v2311_v22, %v1779_v23  ;;  %v1843_v5 = vadd.f32 %v1587_v44, %v799_v24  ;;  %vm2895_vm3 = vcmp.eq.s32.totalorder %v5069_v35, %v4461_v34  ;;  %vm585_vm4 = vcmp.eq.s32.totalorder %v5072_v43, %v4455_v31 }
  0xc3   : > { %3676 = vmatpush.msra.mxu3 %v3547_v25  ;;  %v3163_v2 = vsel %vm2895_vm3, %v4413_v13, 0.0  ;;  %v855_v40 = vsel %vm585_vm4, %v4407_v9, 0.0  ;;  %vm1375_vm5 = vcmp.eq.s32.totalorder %v5072_v43, %v4457_v32  ;;  %vm2163_vm6 = vcmp.eq.s32.totalorder %v5072_v43, %v4459_v33 }
  0xc4   : > { %v3355_v61 = vadd.f32 %v3099_v1, %v2567_v6  ;;  %v2631_v39 = vadd.f32 %v2375_v26, %v1843_v5  ;;  %v1643_v22 = vsel %vm1375_vm5, %v4409_v11, 0.0  ;;  %v2431_v23 = vsel %vm2163_vm6, %v4411_v12, 0.0 }
  0xc5   : > { %v1899_v24 = vadd.f32 %v1643_v22, %v855_v40  ;;  %vm2951_vm7 = vcmp.eq.s32.totalorder %v5072_v43, %v4461_v34  ;;  %v5122_v25 = vadd.s32 416, %v4404_v7  ;;  %v5125_v44 = vadd.s32 32, %v4404_v7 }
  0xc6   : > { %3616 = vmatpush.msra.mxu0 %v3355_v61  ;;  %v3419_v35 = vadd.f32 %v3163_v2, %v2631_v39  ;;  %v3219_v0 = vsel %vm2951_vm7, %v4413_v13, 0.0  ;;  %v5129_v5 = vadd.s32 160, %v4404_v7  ;;  %v5132_v6 = vadd.s32 272, %v4404_v7 }
  0xc7   : > { %7952 = vst [vmem:[#allocation28_spill] sm:$0xff] %v5122_v25  ;;  %v2687_v1 = vadd.f32 %v2431_v23, %v1899_v24  ;;  %vm653_vm8 = vcmp.eq.s32.totalorder %v5122_v25, %v4455_v31  ;;  %vm1443_vm9 = vcmp.eq.s32.totalorder %v5122_v25, %v4457_v32  ;;  %vm2231_vm10 = vcmp.eq.s32.totalorder %v5122_v25, %v4459_v33 }
  0xc8   : > { %7953 = vst [vmem:[#allocation29_spill] sm:$0xff] %v5125_v44  ;;  %3636 = vmatpush.msra.mxu1 %v3419_v35  ;;  %v923_v26 = vsel %vm653_vm8, %v4407_v9, 0.0  ;;  %v1711_v2 = vsel %vm1443_vm9, %v4409_v11, 0.0  ;;  %v2499_v40 = vsel %vm2231_vm10, %v4411_v12, 0.0  ;;  %vm3019_vm11 = vcmp.eq.s32.totalorder %v5122_v25, %v4461_v34 }
  0xc9   : > { %7954 = vst [vmem:[#allocation30_spill] sm:$0xff] %v5129_v5  ;;  %v3475_v61 = vadd.f32 %v3219_v0, %v2687_v1  ;;  %v1967_v39 = vadd.f32 %v1711_v2, %v923_v26  ;;  %v3287_v22 = vsel %vm3019_vm11, %v4413_v13, 0.0  ;;  %vm461_vm12 = vcmp.eq.s32.totalorder %v5125_v44, %v4455_v31 }
  0xca   : > { %7955 = vst [vmem:[#allocation31_spill] sm:$0xff] %v5132_v6  ;;  %v731_v23 = vsel %vm461_vm12, %v4407_v9, 0.0  ;;  %vm1251_vm13 = vcmp.eq.s32.totalorder %v5125_v44, %v4457_v32  ;;  %vm2039_vm14 = vcmp.eq.s32.totalorder %v5125_v44, %v4459_v33  ;;  %vm2827_vm15 = vcmp.eq.s32.totalorder %v5125_v44, %v4461_v34 }
  0xcb   : > { %3658 = vmatpush.msra.mxu2 %v3475_v61  ;;  %v2755_v35 = vadd.f32 %v2499_v40, %v1967_v39  ;;  %v1519_v0 = vsel %vm1251_vm13, %v4409_v11, 0.0  ;;  %v2307_v24 = vsel %vm2039_vm14, %v4411_v12, 0.0  ;;  %v3095_v1 = vsel %vm2827_vm15, %v4413_v13, 0.0 }
  0xcc   : > { %v1775_v26 = vadd.f32 %v1519_v0, %v731_v23  ;;  %vm525_vm0 = vcmp.eq.s32.totalorder %v5129_v5, %v4455_v31  ;;  %vm1315_vm1 = vcmp.eq.s32.totalorder %v5129_v5, %v4457_v32  ;;  %vm2103_vm2 = vcmp.eq.s32.totalorder %v5129_v5, %v4459_v33 }
  0xcd   : > { %v3543_v2 = vadd.f32 %v3287_v22, %v2755_v35  ;;  %v795_v61 = vsel %vm525_vm0, %v4407_v9, 0.0  ;;  %v1583_v40 = vsel %vm1315_vm1, %v4409_v11, 0.0  ;;  %v2371_v39 = vsel %vm2103_vm2, %v4411_v12, 0.0 }
  0xce   : > { %v2563_v44 = vadd.f32 %v2307_v24, %v1775_v26  ;;  %v1839_v25 = vadd.f32 %v1583_v40, %v795_v61  ;;  %vm2891_vm3 = vcmp.eq.s32.totalorder %v5129_v5, %v4461_v34  ;;  %vm581_vm4 = vcmp.eq.s32.totalorder %v5132_v6, %v4455_v31 }
  0xcf   : > { %3677 = vmatpush.msra.mxu3 %v3543_v2  ;;  %v3159_v23 = vsel %vm2891_vm3, %v4413_v13, 0.0  ;;  %v851_v0 = vsel %vm581_vm4, %v4407_v9, 0.0  ;;  %vm1371_vm5 = vcmp.eq.s32.totalorder %v5132_v6, %v4457_v32  ;;  %vm2159_vm6 = vcmp.eq.s32.totalorder %v5132_v6, %v4459_v33 }
  0xd0   : > { %v3351_v22 = vadd.f32 %v3095_v1, %v2563_v44  ;;  %v2627_v35 = vadd.f32 %v2371_v39, %v1839_v25  ;;  %v1639_v24 = vsel %vm1371_vm5, %v4409_v11, 0.0  ;;  %v2427_v26 = vsel %vm2159_vm6, %v4411_v12, 0.0 }
  0xd1   : > { %v1895_v61 = vadd.f32 %v1639_v24, %v851_v0  ;;  %vm2947_vm7 = vcmp.eq.s32.totalorder %v5132_v6, %v4461_v34  ;;  %v5182_v2 = vadd.s32 408, %v4404_v7  ;;  %v5185_v40 = vadd.s32 24, %v4404_v7 }
  0xd2   : > { %3617 = vmatpush.msra.mxu0 %v3351_v22  ;;  %v3415_v5 = vadd.f32 %v3159_v23, %v2627_v35  ;;  %v3215_v43 = vsel %vm2947_vm7, %v4413_v13, 0.0  ;;  %v5189_v25 = vadd.s32 152, %v4404_v7  ;;  %v5192_v44 = vadd.s32 264, %v4404_v7 }
  0xd3   : > { %7956 = vst [vmem:[#allocation32_spill] sm:$0xff] %v5182_v2  ;;  %v2683_v1 = vadd.f32 %v2427_v26, %v1895_v61  ;;  %vm649_vm8 = vcmp.eq.s32.totalorder %v5182_v2, %v4455_v31  ;;  %vm1439_vm9 = vcmp.eq.s32.totalorder %v5182_v2, %v4457_v32  ;;  %vm2227_vm10 = vcmp.eq.s32.totalorder %v5182_v2, %v4459_v33 }
  0xd4   : > { %7957 = vst [vmem:[#allocation33_spill] sm:$0xff] %v5185_v40  ;;  %3637 = vmatpush.msra.mxu1 %v3415_v5  ;;  %v919_v39 = vsel %vm649_vm8, %v4407_v9, 0.0  ;;  %v1707_v23 = vsel %vm1439_vm9, %v4409_v11, 0.0  ;;  %v2495_v0 = vsel %vm2227_vm10, %v4411_v12, 0.0  ;;  %vm3015_vm11 = vcmp.eq.s32.totalorder %v5182_v2, %v4461_v34 }
  0xd5   : > { %7958 = vst [vmem:[#allocation34_spill] sm:$0xff] %v5189_v25  ;;  %v3471_v22 = vadd.f32 %v3215_v43, %v2683_v1  ;;  %v1963_v35 = vadd.f32 %v1707_v23, %v919_v39  ;;  %v3283_v24 = vsel %vm3015_vm11, %v4413_v13, 0.0  ;;  %vm457_vm12 = vcmp.eq.s32.totalorder %v5185_v40, %v4455_v31 }
  0xd6   : > { %7959 = vst [vmem:[#allocation35_spill] sm:$0xff] %v5192_v44  ;;  %v727_v26 = vsel %vm457_vm12, %v4407_v9, 0.0  ;;  %vm1247_vm13 = vcmp.eq.s32.totalorder %v5185_v40, %v4457_v32  ;;  %vm2035_vm14 = vcmp.eq.s32.totalorder %v5185_v40, %v4459_v33  ;;  %vm2823_vm15 = vcmp.eq.s32.totalorder %v5185_v40, %v4461_v34 }
  0xd7   : > { %3659 = vmatpush.msra.mxu2 %v3471_v22  ;;  %v2751_v5 = vadd.f32 %v2495_v0, %v1963_v35  ;;  %v1515_v43 = vsel %vm1247_vm13, %v4409_v11, 0.0  ;;  %v2303_v61 = vsel %vm2035_vm14, %v4411_v12, 0.0  ;;  %v3091_v1 = vsel %vm2823_vm15, %v4413_v13, 0.0 }
  0xd8   : > { %v1771_v39 = vadd.f32 %v1515_v43, %v727_v26  ;;  %vm521_vm0 = vcmp.eq.s32.totalorder %v5189_v25, %v4455_v31  ;;  %vm1311_vm1 = vcmp.eq.s32.totalorder %v5189_v25, %v4457_v32  ;;  %vm2099_vm2 = vcmp.eq.s32.totalorder %v5189_v25, %v4459_v33 }
  0xd9   : > { %v3539_v23 = vadd.f32 %v3283_v24, %v2751_v5  ;;  %v791_v22 = vsel %vm521_vm0, %v4407_v9, 0.0  ;;  %v1579_v0 = vsel %vm1311_vm1, %v4409_v11, 0.0  ;;  %v2367_v35 = vsel %vm2099_vm2, %v4411_v12, 0.0 }
  0xda   : > { %v2559_v40 = vadd.f32 %v2303_v61, %v1771_v39  ;;  %v1835_v2 = vadd.f32 %v1579_v0, %v791_v22  ;;  %vm2887_vm3 = vcmp.eq.s32.totalorder %v5189_v25, %v4461_v34  ;;  %vm577_vm4 = vcmp.eq.s32.totalorder %v5192_v44, %v4455_v31 }
  0xdb   : > { %3678 = vmatpush.msra.mxu3 %v3539_v23  ;;  %v3155_v26 = vsel %vm2887_vm3, %v4413_v13, 0.0  ;;  %v847_v43 = vsel %vm577_vm4, %v4407_v9, 0.0  ;;  %vm1367_vm5 = vcmp.eq.s32.totalorder %v5192_v44, %v4457_v32  ;;  %vm2155_vm6 = vcmp.eq.s32.totalorder %v5192_v44, %v4459_v33 }
  0xdc   : > { %v3347_v24 = vadd.f32 %v3091_v1, %v2559_v40  ;;  %v2623_v5 = vadd.f32 %v2367_v35, %v1835_v2  ;;  %v1635_v61 = vsel %vm1367_vm5, %v4409_v11, 0.0  ;;  %v2423_v39 = vsel %vm2155_vm6, %v4411_v12, 0.0 }
  0xdd   : > { %v1891_v22 = vadd.f32 %v1635_v61, %v847_v43  ;;  %vm2943_vm7 = vcmp.eq.s32.totalorder %v5192_v44, %v4461_v34  ;;  %v5242_v23 = vadd.s32 400, %v4404_v7  ;;  %v5245_v0 = vadd.s32 16, %v4404_v7 }
  0xde   : > { %3618 = vmatpush.msra.mxu0 %v3347_v24  ;;  %v3411_v25 = vadd.f32 %v3155_v26, %v2623_v5  ;;  %v3211_v6 = vsel %vm2943_vm7, %v4413_v13, 0.0  ;;  %v5249_v2 = vadd.s32 144, %v4404_v7  ;;  %v5252_v40 = vadd.s32 256, %v4404_v7 }
  0xdf   : > { %7960 = vst [vmem:[#allocation36_spill] sm:$0xff] %v5242_v23  ;;  %v2679_v1 = vadd.f32 %v2423_v39, %v1891_v22  ;;  %vm645_vm8 = vcmp.eq.s32.totalorder %v5242_v23, %v4455_v31  ;;  %vm1435_vm9 = vcmp.eq.s32.totalorder %v5242_v23, %v4457_v32  ;;  %vm2223_vm10 = vcmp.eq.s32.totalorder %v5242_v23, %v4459_v33 }
  0xe0   : > { %7961 = vst [vmem:[#allocation37_spill] sm:$0xff] %v5245_v0  ;;  %3638 = vmatpush.msra.mxu1 %v3411_v25  ;;  %v915_v35 = vsel %vm645_vm8, %v4407_v9, 0.0  ;;  %v1703_v26 = vsel %vm1435_vm9, %v4409_v11, 0.0  ;;  %v2491_v43 = vsel %vm2223_vm10, %v4411_v12, 0.0  ;;  %vm3011_vm11 = vcmp.eq.s32.totalorder %v5242_v23, %v4461_v34 }
  0xe1   : > { %7962 = vst [vmem:[#allocation38_spill] sm:$0xff] %v5249_v2  ;;  %v3467_v24 = vadd.f32 %v3211_v6, %v2679_v1  ;;  %v1959_v5 = vadd.f32 %v1703_v26, %v915_v35  ;;  %v3279_v61 = vsel %vm3011_vm11, %v4413_v13, 0.0  ;;  %vm453_vm12 = vcmp.eq.s32.totalorder %v5245_v0, %v4455_v31 }
  0xe2   : > { %7963 = vst [vmem:[#allocation39_spill] sm:$0xff] %v5252_v40  ;;  %v723_v39 = vsel %vm453_vm12, %v4407_v9, 0.0  ;;  %vm1243_vm13 = vcmp.eq.s32.totalorder %v5245_v0, %v4457_v32  ;;  %vm2031_vm14 = vcmp.eq.s32.totalorder %v5245_v0, %v4459_v33  ;;  %vm2819_vm15 = vcmp.eq.s32.totalorder %v5245_v0, %v4461_v34 }
  0xe3   : > { %3660 = vmatpush.msra.mxu2 %v3467_v24  ;;  %v2747_v25 = vadd.f32 %v2491_v43, %v1959_v5  ;;  %v1511_v6 = vsel %vm1243_vm13, %v4409_v11, 0.0  ;;  %v2299_v22 = vsel %vm2031_vm14, %v4411_v12, 0.0  ;;  %v3087_v1 = vsel %vm2819_vm15, %v4413_v13, 0.0 }
  0xe4   : > { %v1767_v35 = vadd.f32 %v1511_v6, %v723_v39  ;;  %vm517_vm0 = vcmp.eq.s32.totalorder %v5249_v2, %v4455_v31  ;;  %vm1307_vm1 = vcmp.eq.s32.totalorder %v5249_v2, %v4457_v32  ;;  %vm2095_vm2 = vcmp.eq.s32.totalorder %v5249_v2, %v4459_v33 }
  0xe5   : > { %v3535_v26 = vadd.f32 %v3279_v61, %v2747_v25  ;;  %v787_v24 = vsel %vm517_vm0, %v4407_v9, 0.0  ;;  %v1575_v43 = vsel %vm1307_vm1, %v4409_v11, 0.0  ;;  %v2363_v5 = vsel %vm2095_vm2, %v4411_v12, 0.0 }
  0xe6   : > { %v2555_v0 = vadd.f32 %v2299_v22, %v1767_v35  ;;  %v1831_v23 = vadd.f32 %v1575_v43, %v787_v24  ;;  %vm2883_vm3 = vcmp.eq.s32.totalorder %v5249_v2, %v4461_v34  ;;  %vm573_vm4 = vcmp.eq.s32.totalorder %v5252_v40, %v4455_v31 }
  0xe7   : > { %3679 = vmatpush.msra.mxu3 %v3535_v26  ;;  %v3151_v39 = vsel %vm2883_vm3, %v4413_v13, 0.0  ;;  %v843_v61 = vsel %vm573_vm4, %v4407_v9, 0.0  ;;  %vm1363_vm5 = vcmp.eq.s32.totalorder %v5252_v40, %v4457_v32  ;;  %vm2151_vm6 = vcmp.eq.s32.totalorder %v5252_v40, %v4459_v33 }
  0xe8   : > { %v3343_v25 = vadd.f32 %v3087_v1, %v2555_v0  ;;  %v2619_v6 = vadd.f32 %v2363_v5, %v1831_v23  ;;  %v1631_v22 = vsel %vm1363_vm5, %v4409_v11, 0.0  ;;  %v2419_v35 = vsel %vm2151_vm6, %v4411_v12, 0.0 }
  0xe9   : > { %v1887_v24 = vadd.f32 %v1631_v22, %v843_v61  ;;  %vm2939_vm7 = vcmp.eq.s32.totalorder %v5252_v40, %v4461_v34  ;;  %v5302_v26 = vadd.s32 392, %v4404_v7  ;;  %v438_v43 = vperm.slane %v4418_v15, 4 }
  0xea   : > { %3619 = vmatpush.msra.mxu0 %v3343_v25  ;;  %v3407_v2 = vadd.f32 %v3151_v39, %v2619_v6  ;;  %v3207_v44 = vsel %vm2939_vm7, %v4413_v13, 0.0  ;;  %v704_v0 = vperm.slane %v4157_v57, 4  ;;  %v1228_v23 = vperm.slane %v4418_v15, 5 }
  0xeb   : > { %7964 = vst [vmem:[#allocation40_spill] sm:$0xff] %v5302_v26  ;;  %v2675_v1 = vadd.f32 %v2419_v35, %v1887_v24  ;;  %vm641_vm8 = vcmp.eq.s32.totalorder %v5302_v26, %v4455_v31  ;;  %vm1431_vm9 = vcmp.eq.s32.totalorder %v5302_v26, %v4457_v32  ;;  %vm2219_vm10 = vcmp.eq.s32.totalorder %v5302_v26, %v4459_v33 }
  0xec   : > { %3639 = vmatpush.msra.mxu1 %v3407_v2  ;;  %v911_v5 = vsel %vm641_vm8, %v4407_v9, 0.0  ;;  %v1699_v39 = vsel %vm1431_vm9, %v4409_v11, 0.0  ;;  %v2487_v61 = vsel %vm2219_vm10, %v4411_v12, 0.0  ;;  %vm3007_vm11 = vcmp.eq.s32.totalorder %v5302_v26, %v4461_v34 }
  0xed   : > { %v3463_v25 = vadd.f32 %v3207_v44, %v2675_v1  ;;  %v1955_v6 = vadd.f32 %v1699_v39, %v911_v5  ;;  %v3275_v22 = vsel %vm3007_vm11, %v4413_v13, 0.0  ;;  %v5320_v35 = vperm.slane %v438_v43, 0 }
  0xee   : > { %v5322_v24 = vperm.slane %v704_v0, 0  ;;  %v5324_v40 = vperm.slane %v1228_v23, 1  ;;  %v1492_v2 = vperm.slane %v4157_v57, 5  ;;  %v2016_v47 = vperm.slane %v4418_v15, 6 }
  0xef   : > { %3661 = vmatpush.msra.mxu2 %v3463_v25  ;;  %v2743_v42 = vadd.f32 %v2487_v61, %v1955_v6  ;;  %vm634_vm12 = vcmp.eq.s32.totalorder %v4416_v14, %v5320_v35  ;;  %v2280_v41 = vperm.slane %v4157_v57, 6  ;;  %v2804_v44 = vperm.slane %v4418_v15, 7 }
  0xf0   : > { %v904_v1 = vsel %vm634_vm12, %v5322_v24, 0.0  ;;  %vm1424_vm13 = vcmp.eq.s32.totalorder %v4416_v14, %v5324_v40  ;;  %v5333_v43 = vperm.slane %v1492_v2, 1  ;;  %v5335_v0 = vperm.slane %v2016_v47, 2 }
  0xf1   : > { %v3531_v23 = vadd.f32 %v3275_v22, %v2743_v42  ;;  %v5337_v5 = vperm.slane %v2280_v41, 2  ;;  %v5339_v39 = vperm.slane %v2804_v44, 3  ;;  %v3068_v61 = vperm.slane %v4157_v57, 7 }
  0xf2   : > { %v1692_v25 = vsel %vm1424_vm13, %v5333_v43, 0.0  ;;  %vm2212_vm14 = vcmp.eq.s32.totalorder %v4416_v14, %v5335_v0  ;;  %v5345_v15 = vadd.s32 8, %v4404_v7  ;;  %v5348_v6 = vadd.s32 136, %v4404_v7 }
  0xf3   : > { %3680 = vmatpush.msra.mxu3 %v3531_v23  ;;  %v1948_v47 = vadd.f32 %v1692_v25, %v904_v1  ;;  %v2480_v42 = vsel %vm2212_vm14, %v5337_v5, 0.0  ;;  %vm3000_vm15 = vcmp.eq.s32.totalorder %v4416_v14, %v5339_v39  ;;  %v5353_v41 = vperm.slane %v3068_v61, 3 }
  0xf4   : > { %7965 = vst [vmem:[#allocation41_spill] sm:$0xff] %v5345_v15  ;;  %vm449_vm0 = vcmp.eq.s32.totalorder %v5345_v15, %v4455_v31  ;;  %vm1239_vm1 = vcmp.eq.s32.totalorder %v5345_v15, %v4457_v32  ;;  %vm2027_vm2 = vcmp.eq.s32.totalorder %v5345_v15, %v4459_v33  ;;  %vm2815_vm3 = vcmp.eq.s32.totalorder %v5345_v15, %v4461_v34 }
  0xf5   : > { %7966 = vst [vmem:[#allocation42_spill] sm:$0xff] %v5348_v6  ;;  %v2736_v57 = vadd.f32 %v2480_v42, %v1948_v47  ;;  %v3268_v22 = vsel %vm3000_vm15, %v5353_v41, 0.0  ;;  %v719_v2 = vsel %vm449_vm0, %v4407_v9, 0.0  ;;  %v1507_v44 = vsel %vm1239_vm1, %v4409_v11, 0.0 }
  0xf6   : > { %v1763_v1 = vadd.f32 %v1507_v44, %v719_v2  ;;  %v2295_v23 = vsel %vm2027_vm2, %v4411_v12, 0.0  ;;  %v3083_v61 = vsel %vm2815_vm3, %v4413_v13, 0.0  ;;  %vm513_vm4 = vcmp.eq.s32.totalorder %v5348_v6, %v4455_v31 }
  0xf7   : > { %v3524_v25 = vadd.f32 %v3268_v22, %v2736_v57  ;;  %v783_v14 = vsel %vm513_vm4, %v4407_v9, 0.0  ;;  %vm1303_vm5 = vcmp.eq.s32.totalorder %v5348_v6, %v4457_v32  ;;  %vm2091_vm6 = vcmp.eq.s32.totalorder %v5348_v6, %v4459_v33 }
  0xf8   : > { %v2551_v47 = vadd.f32 %v2295_v23, %v1763_v1  ;;  %v1571_v42 = vsel %vm1303_vm5, %v4409_v11, 0.0  ;;  %v2359_v2 = vsel %vm2091_vm6, %v4411_v12, 0.0  ;;  %vm2879_vm7 = vcmp.eq.s32.totalorder %v5348_v6, %v4461_v34 }
  0xf9   : > { %3726 = vmatpush.msrb.mxu2 %v3524_v25  ;;  %v1827_v44 = vadd.f32 %v1571_v42, %v783_v14  ;;  %v3147_v57 = vsel %vm2879_vm7, %v4413_v13, 0.0  ;;  %v5381_v22 = vadd.s32 384, %v4404_v7  ;;  %vm630_vm8 = vcmp.eq.s32.totalorder %v4421_v16, %v5320_v35 }
  0xfa   : > { %v3339_v15 = vadd.f32 %v3083_v61, %v2551_v47  ;;  %v900_v1 = vsel %vm630_vm8, %v5322_v24, 0.0  ;;  %vm1420_vm9 = vcmp.eq.s32.totalorder %v4421_v16, %v5324_v40  ;;  %vm2208_vm10 = vcmp.eq.s32.totalorder %v4421_v16, %v5335_v0 }
  0xfb   : > { %v2615_v23 = vadd.f32 %v2359_v2, %v1827_v44  ;;  %vm637_vm11 = vcmp.eq.s32.totalorder %v5381_v22, %v4455_v31  ;;  %vm1427_vm12 = vcmp.eq.s32.totalorder %v5381_v22, %v4457_v32  ;;  %vm2215_vm13 = vcmp.eq.s32.totalorder %v5381_v22, %v4459_v33 }
  0xfc   : > { %3620 = vmatpush.msra.mxu0 %v3339_v15  ;;  %v907_v14 = vsel %vm637_vm11, %v4407_v9, 0.0  ;;  %v1695_v61 = vsel %vm1427_vm12, %v4409_v11, 0.0  ;;  %v2483_v25 = vsel %vm2215_vm13, %v4411_v12, 0.0  ;;  %vm3003_vm14 = vcmp.eq.s32.totalorder %v5381_v22, %v4461_v34 }
  0xfd   : > { %v3403_v47 = vadd.f32 %v3147_v57, %v2615_v23  ;;  %v1951_v42 = vadd.f32 %v1695_v61, %v907_v14  ;;  %v3271_v2 = vsel %vm3003_vm14, %v4413_v13, 0.0  ;;  %v1688_v44 = vsel %vm1420_vm9, %v5333_v43, 0.0 }
  0xfe   : > { %v1944_v6 = vadd.f32 %v1688_v44, %v900_v1  ;;  %v2476_v26 = vsel %vm2208_vm10, %v5337_v5, 0.0  ;;  %vm2996_vm15 = vcmp.eq.s32.totalorder %v4421_v16, %v5339_v39  ;;  %vm698_vm0 = vcmp.eq.s32.totalorder %v4424_v17, %v5320_v35 }
  0xff   : > { %3640 = vmatpush.msra.mxu1 %v3403_v47  ;;  %v2739_v15 = vadd.f32 %v2483_v25, %v1951_v42  ;;  %v3264_v10 = vsel %vm2996_vm15, %v5353_v41, 0.0  ;;  %v968_v57 = vsel %vm698_vm0, %v5322_v24, 0.0  ;;  %vm1488_vm1 = vcmp.eq.s32.totalorder %v4424_v17, %v5324_v40 }
 0x100   : > { %v2732_v23 = vadd.f32 %v2476_v26, %v1944_v6  ;;  %v1756_v1 = vsel %vm1488_vm1, %v5333_v43, 0.0  ;;  %vm2276_vm2 = vcmp.eq.s32.totalorder %v4424_v17, %v5335_v0  ;;  %vm3064_vm3 = vcmp.eq.s32.totalorder %v4424_v17, %v5339_v39 }
 0x101   : > { %v3527_v14 = vadd.f32 %v3271_v2, %v2739_v15  ;;  %v2012_v61 = vadd.f32 %v1756_v1, %v968_v57  ;;  %v2544_v25 = vsel %vm2276_vm2, %v5337_v5, 0.0  ;;  %v3332_v47 = vsel %vm3064_vm3, %v5353_v41, 0.0 }
 0x102   : > { %v3520_v42 = vadd.f32 %v3264_v10, %v2732_v23  ;;  %vm445_vm4 = vcmp.eq.s32.totalorder %v4404_v7, %v4455_v31  ;;  %vm1235_vm5 = vcmp.eq.s32.totalorder %v4404_v7, %v4457_v32  ;;  %vm2023_vm6 = vcmp.eq.s32.totalorder %v4404_v7, %v4459_v33 }
 0x103   : > { %3681 = vmatpush.msra.mxu3 %v3527_v14  ;;  %v2800_v26 = vadd.f32 %v2544_v25, %v2012_v61  ;;  %v715_v6 = vsel %vm445_vm4, %v4407_v9, 0.0  ;;  %v1503_v2 = vsel %vm1235_vm5, %v4409_v11, 0.0  ;;  %v2291_v44 = vsel %vm2023_vm6, %v4411_v12, 0.0 }
 0x104   : > { %3727 = vmatpush.msrb.mxu2 %v3520_v42  ;;  %v1759_v15 = vadd.f32 %v1503_v2, %v715_v6  ;;  %vm2811_vm7 = vcmp.eq.s32.totalorder %v4404_v7, %v4461_v34  ;;  %v5431_v10 = vadd.s32 128, %v4404_v7  ;;  %vm506_vm8 = vcmp.eq.s32.totalorder %v4427_v18, %v5320_v35 }
 0x105   : > { %v3588_v57 = vadd.f32 %v3332_v47, %v2800_v26  ;;  %v3079_v23 = vsel %vm2811_vm7, %v4413_v13, 0.0  ;;  %v776_v1 = vsel %vm506_vm8, %v5322_v24, 0.0  ;;  %vm1296_vm9 = vcmp.eq.s32.totalorder %v4427_v18, %v5324_v40 }
 0x106   : > { %v2547_v14 = vadd.f32 %v2291_v44, %v1759_v15  ;;  %vm509_vm10 = vcmp.eq.s32.totalorder %v5431_v10, %v4455_v31  ;;  %vm1299_vm11 = vcmp.eq.s32.totalorder %v5431_v10, %v4457_v32  ;;  %vm2087_vm12 = vcmp.eq.s32.totalorder %v5431_v10, %v4459_v33 }
 0x107   : > { %3746 = vmatpush.msrb.mxu3 %v3588_v57  ;;  %v779_v61 = vsel %vm509_vm10, %v4407_v9, 0.0  ;;  %v1567_v25 = vsel %vm1299_vm11, %v4409_v11, 0.0  ;;  %v2355_v47 = vsel %vm2087_vm12, %v4411_v12, 0.0  ;;  %vm2875_vm13 = vcmp.eq.s32.totalorder %v5431_v10, %v4461_v34 }
 0x108   : > { %v3335_v42 = vadd.f32 %v3079_v23, %v2547_v14  ;;  %v1823_v26 = vadd.f32 %v1567_v25, %v779_v61  ;;  %v3143_v31 = vsel %vm2875_vm13, %v4413_v13, 0.0  ;;  %v1564_v6 = vsel %vm1296_vm9, %v5333_v43, 0.0 }
 0x109   : > { %v1820_v32 = vadd.f32 %v1564_v6, %v776_v1  ;;  %vm2084_vm14 = vcmp.eq.s32.totalorder %v4427_v18, %v5335_v0  ;;  %vm2872_vm15 = vcmp.eq.s32.totalorder %v4427_v18, %v5339_v39  ;;  %vm570_vm0 = vcmp.eq.s32.totalorder %v4430_v19, %v5320_v35 }
 0x10a   : > { %3621 = vmatpush.msra.mxu0 %v3335_v42  ;;  %v2611_v9 = vadd.f32 %v2355_v47, %v1823_v26  ;;  %v2352_v11 = vsel %vm2084_vm14, %v5337_v5, 0.0  ;;  %v3140_v12 = vsel %vm2872_vm15, %v5353_v41, 0.0  ;;  %v840_v13 = vsel %vm570_vm0, %v5322_v24, 0.0 }
 0x10b   : > { %v2608_v33 = vadd.f32 %v2352_v11, %v1820_v32  ;;  %vm1360_vm1 = vcmp.eq.s32.totalorder %v4430_v19, %v5324_v40  ;;  %vm2148_vm2 = vcmp.eq.s32.totalorder %v4430_v19, %v5335_v0  ;;  %vm2936_vm3 = vcmp.eq.s32.totalorder %v4430_v19, %v5339_v39 }
 0x10c   : > { %v3399_v34 = vadd.f32 %v3143_v31, %v2611_v9  ;;  %v1628_v2 = vsel %vm1360_vm1, %v5333_v43, 0.0  ;;  %v2416_v44 = vsel %vm2148_vm2, %v5337_v5, 0.0  ;;  %v3204_v15 = vsel %vm2936_vm3, %v5353_v41, 0.0 }
 0x10d   : > { %v3396_v57 = vadd.f32 %v3140_v12, %v2608_v33  ;;  %v1884_v23 = vadd.f32 %v1628_v2, %v840_v13  ;;  %vm626_vm4 = vcmp.eq.s32.totalorder %v4433_v20, %v5320_v35  ;;  %vm1416_vm5 = vcmp.eq.s32.totalorder %v4433_v20, %v5324_v40 }
 0x10e   : > { %3641 = vmatpush.msra.mxu1 %v3399_v34  ;;  %v896_v1 = vsel %vm626_vm4, %v5322_v24, 0.0  ;;  %v1684_v14 = vsel %vm1416_vm5, %v5333_v43, 0.0  ;;  %vm2204_vm6 = vcmp.eq.s32.totalorder %v4433_v20, %v5335_v0  ;;  %vm2992_vm7 = vcmp.eq.s32.totalorder %v4433_v20, %v5339_v39 }
 0x10f   : > { %3686 = vmatpush.msrb.mxu0 %v3396_v57  ;;  %v2672_v61 = vadd.f32 %v2416_v44, %v1884_v23  ;;  %v1940_v25 = vadd.f32 %v1684_v14, %v896_v1  ;;  %v2472_v47 = vsel %vm2204_vm6, %v5337_v5, 0.0  ;;  %v3260_v42 = vsel %vm2992_vm7, %v5353_v41, 0.0 }
 0x110   : > { %vm694_vm8 = vcmp.eq.s32.totalorder %v4436_v21, %v5320_v35  ;;  %vm1484_vm9 = vcmp.eq.s32.totalorder %v4436_v21, %v5324_v40  ;;  %vm2272_vm10 = vcmp.eq.s32.totalorder %v4436_v21, %v5335_v0  ;;  %vm3060_vm11 = vcmp.eq.s32.totalorder %v4436_v21, %v5339_v39 }
 0x111   : > { %v3460_v26 = vadd.f32 %v3204_v15, %v2672_v61  ;;  %v2728_v31 = vadd.f32 %v2472_v47, %v1940_v25  ;;  %v964_v6 = vsel %vm694_vm8, %v5322_v24, 0.0  ;;  %v1752_v32 = vsel %vm1484_vm9, %v5333_v43, 0.0 }
 0x112   : > { %v2008_v9 = vadd.f32 %v1752_v32, %v964_v6  ;;  %v2540_v11 = vsel %vm2272_vm10, %v5337_v5, 0.0  ;;  %v3328_v12 = vsel %vm3060_vm11, %v5353_v41, 0.0  ;;  %vm502_vm12 = vcmp.eq.s32.totalorder %v4444_v27, %v5320_v35 }
 0x113   : > { %3706 = vmatpush.msrb.mxu1 %v3460_v26  ;;  %v3516_v13 = vadd.f32 %v3260_v42, %v2728_v31  ;;  %v772_v33 = vsel %vm502_vm12, %v5322_v24, 0.0  ;;  %vm1292_vm13 = vcmp.eq.s32.totalorder %v4444_v27, %v5324_v40  ;;  %vm2080_vm14 = vcmp.eq.s32.totalorder %v4444_v27, %v5335_v0 }
 0x114   : > { %v2796_v34 = vadd.f32 %v2540_v11, %v2008_v9  ;;  %v1560_v2 = vsel %vm1292_vm13, %v5333_v43, 0.0  ;;  %v2348_v44 = vsel %vm2080_vm14, %v5337_v5, 0.0  ;;  %vm2868_vm15 = vcmp.eq.s32.totalorder %v4444_v27, %v5339_v39 }
 0x115   : > { %3728 = vmatpush.msrb.mxu2 %v3516_v13  ;;  %v1816_v15 = vadd.f32 %v1560_v2, %v772_v33  ;;  %v3136_v57 = vsel %vm2868_vm15, %v5353_v41, 0.0  ;;  %vm566_vm0 = vcmp.eq.s32.totalorder %v4447_v28, %v5320_v35  ;;  %vm1356_vm1 = vcmp.eq.s32.totalorder %v4447_v28, %v5324_v40 }
 0x116   : > { %v3584_v23 = vadd.f32 %v3328_v12, %v2796_v34  ;;  %v836_v1 = vsel %vm566_vm0, %v5322_v24, 0.0  ;;  %v1624_v14 = vsel %vm1356_vm1, %v5333_v43, 0.0  ;;  %vm2144_vm2 = vcmp.eq.s32.totalorder %v4447_v28, %v5335_v0 }
 0x117   : > { %v2604_v61 = vadd.f32 %v2348_v44, %v1816_v15  ;;  %v1880_v25 = vadd.f32 %v1624_v14, %v836_v1  ;;  %v2412_v47 = vsel %vm2144_vm2, %v5337_v5, 0.0  ;;  %vm2932_vm3 = vcmp.eq.s32.totalorder %v4447_v28, %v5339_v39 }
 0x118   : > { %3747 = vmatpush.msrb.mxu3 %v3584_v23  ;;  %v3200_v42 = vsel %vm2932_vm3, %v5353_v41, 0.0  ;;  %vm622_vm4 = vcmp.eq.s32.totalorder %v4450_v29, %v5320_v35  ;;  %vm1412_vm5 = vcmp.eq.s32.totalorder %v4450_v29, %v5324_v40  ;;  %vm2200_vm6 = vcmp.eq.s32.totalorder %v4450_v29, %v5335_v0 }
 0x119   : > { %v3392_v26 = vadd.f32 %v3136_v57, %v2604_v61  ;;  %v2668_v31 = vadd.f32 %v2412_v47, %v1880_v25  ;;  %v892_v6 = vsel %vm622_vm4, %v5322_v24, 0.0  ;;  %v1680_v32 = vsel %vm1412_vm5, %v5333_v43, 0.0 }
 0x11a   : > { %v1936_v9 = vadd.f32 %v1680_v32, %v892_v6  ;;  %v2468_v11 = vsel %vm2200_vm6, %v5337_v5, 0.0  ;;  %vm2988_vm7 = vcmp.eq.s32.totalorder %v4450_v29, %v5339_v39  ;;  %vm690_vm8 = vcmp.eq.s32.totalorder %v4453_v30, %v5320_v35 }
 0x11b   : > { %3687 = vmatpush.msrb.mxu0 %v3392_v26  ;;  %v3456_v12 = vadd.f32 %v3200_v42, %v2668_v31  ;;  %v3256_v13 = vsel %vm2988_vm7, %v5353_v41, 0.0  ;;  %v960_v33 = vsel %vm690_vm8, %v5322_v24, 0.0  ;;  %vm1480_vm9 = vcmp.eq.s32.totalorder %v4453_v30, %v5324_v40 }
 0x11c   : > { %v2724_v34 = vadd.f32 %v2468_v11, %v1936_v9  ;;  %v1748_v2 = vsel %vm1480_vm9, %v5333_v43, 0.0  ;;  %vm2268_vm10 = vcmp.eq.s32.totalorder %v4453_v30, %v5335_v0  ;;  %vm3056_vm11 = vcmp.eq.s32.totalorder %v4453_v30, %v5339_v39 }
 0x11d   : > { %3707 = vmatpush.msrb.mxu1 %v3456_v12  ;;  %v2004_v44 = vadd.f32 %v1748_v2, %v960_v33  ;;  %v2536_v15 = vsel %vm2268_vm10, %v5337_v5, 0.0  ;;  %v3324_v57 = vsel %vm3056_vm11, %v5353_v41, 0.0  ;;  %vm498_vm12 = vcmp.eq.s32.totalorder %v4466_v36, %v5320_v35 }
 0x11e   : > { %v3512_v23 = vadd.f32 %v3256_v13, %v2724_v34  ;;  %v768_v1 = vsel %vm498_vm12, %v5322_v24, 0.0  ;;  %vm1288_vm13 = vcmp.eq.s32.totalorder %v4466_v36, %v5324_v40  ;;  %vm2076_vm14 = vcmp.eq.s32.totalorder %v4466_v36, %v5335_v0 }
 0x11f   : > { %v2792_v14 = vadd.f32 %v2536_v15, %v2004_v44  ;;  %v1556_v61 = vsel %vm1288_vm13, %v5333_v43, 0.0  ;;  %v2344_v25 = vsel %vm2076_vm14, %v5337_v5, 0.0  ;;  %vm2864_vm15 = vcmp.eq.s32.totalorder %v4466_v36, %v5339_v39 }
 0x120   : > { %3729 = vmatpush.msrb.mxu2 %v3512_v23  ;;  %v1812_v47 = vadd.f32 %v1556_v61, %v768_v1  ;;  %v3132_v42 = vsel %vm2864_vm15, %v5353_v41, 0.0  ;;  %vm562_vm0 = vcmp.eq.s32.totalorder %v4469_v37, %v5320_v35  ;;  %vm1352_vm1 = vcmp.eq.s32.totalorder %v4469_v37, %v5324_v40 }
 0x121   : > { %v3580_v26 = vadd.f32 %v3324_v57, %v2792_v14  ;;  %v832_v31 = vsel %vm562_vm0, %v5322_v24, 0.0  ;;  %v1620_v6 = vsel %vm1352_vm1, %v5333_v43, 0.0  ;;  %vm2140_vm2 = vcmp.eq.s32.totalorder %v4469_v37, %v5335_v0 }
 0x122   : > { %v2600_v32 = vadd.f32 %v2344_v25, %v1812_v47  ;;  %v1876_v9 = vadd.f32 %v1620_v6, %v832_v31  ;;  %v2408_v11 = vsel %vm2140_vm2, %v5337_v5, 0.0  ;;  %vm2928_vm3 = vcmp.eq.s32.totalorder %v4469_v37, %v5339_v39 }
 0x123   : > { %3748 = vmatpush.msrb.mxu3 %v3580_v26  ;;  %v3196_v12 = vsel %vm2928_vm3, %v5353_v41, 0.0  ;;  %vm618_vm4 = vcmp.eq.s32.totalorder %v4472_v38, %v5320_v35  ;;  %vm1408_vm5 = vcmp.eq.s32.totalorder %v4472_v38, %v5324_v40  ;;  %vm2196_vm6 = vcmp.eq.s32.totalorder %v4472_v38, %v5335_v0 }
 0x124   : > { %v3388_v13 = vadd.f32 %v3132_v42, %v2600_v32  ;;  %v2664_v33 = vadd.f32 %v2408_v11, %v1876_v9  ;;  %v888_v34 = vsel %vm618_vm4, %v5322_v24, 0.0  ;;  %v1676_v2 = vsel %vm1408_vm5, %v5333_v43, 0.0 }
 0x125   : > { %v1932_v44 = vadd.f32 %v1676_v2, %v888_v34  ;;  %v2464_v15 = vsel %vm2196_vm6, %v5337_v5, 0.0  ;;  %vm2984_vm7 = vcmp.eq.s32.totalorder %v4472_v38, %v5339_v39  ;;  %vm686_vm8 = vcmp.eq.s32.totalorder %v4643_v56, %v5320_v35 }
 0x126   : > { %3688 = vmatpush.msrb.mxu0 %v3388_v13  ;;  %v3452_v57 = vadd.f32 %v3196_v12, %v2664_v33  ;;  %v3252_v23 = vsel %vm2984_vm7, %v5353_v41, 0.0  ;;  %v956_v1 = vsel %vm686_vm8, %v5322_v24, 0.0  ;;  %vm1476_vm9 = vcmp.eq.s32.totalorder %v4643_v56, %v5324_v40 }
 0x127   : > { %v2720_v14 = vadd.f32 %v2464_v15, %v1932_v44  ;;  %v1744_v61 = vsel %vm1476_vm9, %v5333_v43, 0.0  ;;  %vm2264_vm10 = vcmp.eq.s32.totalorder %v4643_v56, %v5335_v0  ;;  %vm3052_vm11 = vcmp.eq.s32.totalorder %v4643_v56, %v5339_v39 }
 0x128   : > { %3708 = vmatpush.msrb.mxu1 %v3452_v57  ;;  %v2000_v25 = vadd.f32 %v1744_v61, %v956_v1  ;;  %v2532_v47 = vsel %vm2264_vm10, %v5337_v5, 0.0  ;;  %v3320_v42 = vsel %vm3052_vm11, %v5353_v41, 0.0  ;;  %vm494_vm12 = vcmp.eq.s32.totalorder %v4646_v58, %v5320_v35 }
 0x129   : > { %v3508_v26 = vadd.f32 %v3252_v23, %v2720_v14  ;;  %v764_v31 = vsel %vm494_vm12, %v5322_v24, 0.0  ;;  %vm1284_vm13 = vcmp.eq.s32.totalorder %v4646_v58, %v5324_v40  ;;  %vm2072_vm14 = vcmp.eq.s32.totalorder %v4646_v58, %v5335_v0 }
 0x12a   : > { %v2788_v6 = vadd.f32 %v2532_v47, %v2000_v25  ;;  %v1552_v32 = vsel %vm1284_vm13, %v5333_v43, 0.0  ;;  %v2340_v9 = vsel %vm2072_vm14, %v5337_v5, 0.0  ;;  %vm2860_vm15 = vcmp.eq.s32.totalorder %v4646_v58, %v5339_v39 }
 0x12b   : > { %3730 = vmatpush.msrb.mxu2 %v3508_v26  ;;  %v1808_v11 = vadd.f32 %v1552_v32, %v764_v31  ;;  %v3128_v12 = vsel %vm2860_vm15, %v5353_v41, 0.0  ;;  %vm558_vm0 = vcmp.eq.s32.totalorder %v4649_v59, %v5320_v35  ;;  %vm1348_vm1 = vcmp.eq.s32.totalorder %v4649_v59, %v5324_v40 }
 0x12c   : > { %v3576_v13 = vadd.f32 %v3320_v42, %v2788_v6  ;;  %v828_v33 = vsel %vm558_vm0, %v5322_v24, 0.0  ;;  %v1616_v34 = vsel %vm1348_vm1, %v5333_v43, 0.0  ;;  %vm2136_vm2 = vcmp.eq.s32.totalorder %v4649_v59, %v5335_v0 }
 0x12d   : > { %v2596_v2 = vadd.f32 %v2340_v9, %v1808_v11  ;;  %v1872_v44 = vadd.f32 %v1616_v34, %v828_v33  ;;  %v2404_v15 = vsel %vm2136_vm2, %v5337_v5, 0.0  ;;  %vm2924_vm3 = vcmp.eq.s32.totalorder %v4649_v59, %v5339_v39 }
 0x12e   : > { %3749 = vmatpush.msrb.mxu3 %v3576_v13  ;;  %v3192_v57 = vsel %vm2924_vm3, %v5353_v41, 0.0  ;;  %vm614_vm4 = vcmp.eq.s32.totalorder %v4652_v60, %v5320_v35  ;;  %vm1404_vm5 = vcmp.eq.s32.totalorder %v4652_v60, %v5324_v40  ;;  %vm2192_vm6 = vcmp.eq.s32.totalorder %v4652_v60, %v5335_v0 }
 0x12f   : > { %v3384_v23 = vadd.f32 %v3128_v12, %v2596_v2  ;;  %v2660_v1 = vadd.f32 %v2404_v15, %v1872_v44  ;;  %v884_v14 = vsel %vm614_vm4, %v5322_v24, 0.0  ;;  %v1672_v61 = vsel %vm1404_vm5, %v5333_v43, 0.0 }
 0x130   : > { %v1928_v25 = vadd.f32 %v1672_v61, %v884_v14  ;;  %v2460_v47 = vsel %vm2192_vm6, %v5337_v5, 0.0  ;;  %vm2980_vm7 = vcmp.eq.s32.totalorder %v4652_v60, %v5339_v39  ;;  %vm682_vm8 = vcmp.eq.s32.totalorder %v4702_v48, %v5320_v35 }
 0x131   : > { %3689 = vmatpush.msrb.mxu0 %v3384_v23  ;;  %v3448_v42 = vadd.f32 %v3192_v57, %v2660_v1  ;;  %v3248_v26 = vsel %vm2980_vm7, %v5353_v41, 0.0  ;;  %v952_v31 = vsel %vm682_vm8, %v5322_v24, 0.0  ;;  %vm1472_vm9 = vcmp.eq.s32.totalorder %v4702_v48, %v5324_v40 }
 0x132   : > { %v2716_v6 = vadd.f32 %v2460_v47, %v1928_v25  ;;  %v1740_v32 = vsel %vm1472_vm9, %v5333_v43, 0.0  ;;  %vm2260_vm10 = vcmp.eq.s32.totalorder %v4702_v48, %v5335_v0  ;;  %vm3048_vm11 = vcmp.eq.s32.totalorder %v4702_v48, %v5339_v39 }
 0x133   : > { %3709 = vmatpush.msrb.mxu1 %v3448_v42  ;;  %v1996_v9 = vadd.f32 %v1740_v32, %v952_v31  ;;  %v2528_v11 = vsel %vm2260_vm10, %v5337_v5, 0.0  ;;  %v3316_v12 = vsel %vm3048_vm11, %v5353_v41, 0.0  ;;  %vm490_vm12 = vcmp.eq.s32.totalorder %v4705_v49, %v5320_v35 }
 0x134   : > { %v3504_v13 = vadd.f32 %v3248_v26, %v2716_v6  ;;  %v760_v33 = vsel %vm490_vm12, %v5322_v24, 0.0  ;;  %vm1280_vm13 = vcmp.eq.s32.totalorder %v4705_v49, %v5324_v40  ;;  %vm2068_vm14 = vcmp.eq.s32.totalorder %v4705_v49, %v5335_v0 }
 0x135   : > { %v2784_v34 = vadd.f32 %v2528_v11, %v1996_v9  ;;  %v1548_v2 = vsel %vm1280_vm13, %v5333_v43, 0.0  ;;  %v2336_v44 = vsel %vm2068_vm14, %v5337_v5, 0.0  ;;  %vm2856_vm15 = vcmp.eq.s32.totalorder %v4705_v49, %v5339_v39 }
 0x136   : > { %3731 = vmatpush.msrb.mxu2 %v3504_v13  ;;  %v1804_v15 = vadd.f32 %v1548_v2, %v760_v33  ;;  %v3124_v57 = vsel %vm2856_vm15, %v5353_v41, 0.0  ;;  %vm554_vm0 = vcmp.eq.s32.totalorder %v4709_v52, %v5320_v35  ;;  %vm1344_vm1 = vcmp.eq.s32.totalorder %v4709_v52, %v5324_v40 }
 0x137   : > { %v3572_v23 = vadd.f32 %v3316_v12, %v2784_v34  ;;  %v824_v1 = vsel %vm554_vm0, %v5322_v24, 0.0  ;;  %v1612_v14 = vsel %vm1344_vm1, %v5333_v43, 0.0  ;;  %vm2132_vm2 = vcmp.eq.s32.totalorder %v4709_v52, %v5335_v0 }
 0x138   : > { %v2592_v61 = vadd.f32 %v2336_v44, %v1804_v15  ;;  %v1868_v25 = vadd.f32 %v1612_v14, %v824_v1  ;;  %v2400_v47 = vsel %vm2132_vm2, %v5337_v5, 0.0  ;;  %vm2920_vm3 = vcmp.eq.s32.totalorder %v4709_v52, %v5339_v39 }
 0x139   : > { %3750 = vmatpush.msrb.mxu3 %v3572_v23  ;;  %v3188_v42 = vsel %vm2920_vm3, %v5353_v41, 0.0  ;;  %vm610_vm4 = vcmp.eq.s32.totalorder %v4712_v53, %v5320_v35  ;;  %vm1400_vm5 = vcmp.eq.s32.totalorder %v4712_v53, %v5324_v40  ;;  %vm2188_vm6 = vcmp.eq.s32.totalorder %v4712_v53, %v5335_v0 }
 0x13a   : > { %v3380_v26 = vadd.f32 %v3124_v57, %v2592_v61  ;;  %v2656_v31 = vadd.f32 %v2400_v47, %v1868_v25  ;;  %v880_v6 = vsel %vm610_vm4, %v5322_v24, 0.0  ;;  %v1668_v32 = vsel %vm1400_vm5, %v5333_v43, 0.0 }
 0x13b   : > { %v1924_v9 = vadd.f32 %v1668_v32, %v880_v6  ;;  %v2456_v11 = vsel %vm2188_vm6, %v5337_v5, 0.0  ;;  %vm2976_vm7 = vcmp.eq.s32.totalorder %v4712_v53, %v5339_v39  ;;  %vm678_vm8 = vcmp.eq.s32.totalorder %v4762_v45, %v5320_v35 }
 0x13c   : > { %3690 = vmatpush.msrb.mxu0 %v3380_v26  ;;  %v3444_v12 = vadd.f32 %v3188_v42, %v2656_v31  ;;  %v3244_v13 = vsel %vm2976_vm7, %v5353_v41, 0.0  ;;  %v948_v33 = vsel %vm678_vm8, %v5322_v24, 0.0  ;;  %vm1468_vm9 = vcmp.eq.s32.totalorder %v4762_v45, %v5324_v40 }
 0x13d   : > { %v2712_v34 = vadd.f32 %v2456_v11, %v1924_v9  ;;  %v1736_v2 = vsel %vm1468_vm9, %v5333_v43, 0.0  ;;  %vm2256_vm10 = vcmp.eq.s32.totalorder %v4762_v45, %v5335_v0  ;;  %vm3044_vm11 = vcmp.eq.s32.totalorder %v4762_v45, %v5339_v39 }
 0x13e   : > { %3710 = vmatpush.msrb.mxu1 %v3444_v12  ;;  %v1992_v44 = vadd.f32 %v1736_v2, %v948_v33  ;;  %v2524_v15 = vsel %vm2256_vm10, %v5337_v5, 0.0  ;;  %v3312_v57 = vsel %vm3044_vm11, %v5353_v41, 0.0  ;;  %vm486_vm12 = vcmp.eq.s32.totalorder %v4765_v46, %v5320_v35 }
 0x13f   : > { %v3500_v23 = vadd.f32 %v3244_v13, %v2712_v34  ;;  %v756_v1 = vsel %vm486_vm12, %v5322_v24, 0.0  ;;  %vm1276_vm13 = vcmp.eq.s32.totalorder %v4765_v46, %v5324_v40  ;;  %vm2064_vm14 = vcmp.eq.s32.totalorder %v4765_v46, %v5335_v0 }
 0x140   : > { %v2780_v14 = vadd.f32 %v2524_v15, %v1992_v44  ;;  %v1544_v61 = vsel %vm1276_vm13, %v5333_v43, 0.0  ;;  %v2332_v25 = vsel %vm2064_vm14, %v5337_v5, 0.0  ;;  %vm2852_vm15 = vcmp.eq.s32.totalorder %v4765_v46, %v5339_v39 }
 0x141   : > { %3732 = vmatpush.msrb.mxu2 %v3500_v23  ;;  %v1800_v47 = vadd.f32 %v1544_v61, %v756_v1  ;;  %v3120_v42 = vsel %vm2852_vm15, %v5353_v41, 0.0  ;;  %vm550_vm0 = vcmp.eq.s32.totalorder %v4769_v51, %v5320_v35  ;;  %vm1340_vm1 = vcmp.eq.s32.totalorder %v4769_v51, %v5324_v40 }
 0x142   : > { %v3568_v26 = vadd.f32 %v3312_v57, %v2780_v14  ;;  %v820_v31 = vsel %vm550_vm0, %v5322_v24, 0.0  ;;  %v1608_v6 = vsel %vm1340_vm1, %v5333_v43, 0.0  ;;  %vm2128_vm2 = vcmp.eq.s32.totalorder %v4769_v51, %v5335_v0 }
 0x143   : > { %v2588_v32 = vadd.f32 %v2332_v25, %v1800_v47  ;;  %v1864_v9 = vadd.f32 %v1608_v6, %v820_v31  ;;  %v2396_v11 = vsel %vm2128_vm2, %v5337_v5, 0.0  ;;  %vm2916_vm3 = vcmp.eq.s32.totalorder %v4769_v51, %v5339_v39 }
 0x144   : > { %3751 = vmatpush.msrb.mxu3 %v3568_v26  ;;  %v3184_v12 = vsel %vm2916_vm3, %v5353_v41, 0.0  ;;  %vm606_vm4 = vcmp.eq.s32.totalorder %v4772_v54, %v5320_v35  ;;  %vm1396_vm5 = vcmp.eq.s32.totalorder %v4772_v54, %v5324_v40  ;;  %vm2184_vm6 = vcmp.eq.s32.totalorder %v4772_v54, %v5335_v0 }
 0x145   : > { %v3376_v13 = vadd.f32 %v3120_v42, %v2588_v32  ;;  %v2652_v33 = vadd.f32 %v2396_v11, %v1864_v9  ;;  %v876_v34 = vsel %vm606_vm4, %v5322_v24, 0.0  ;;  %v1664_v2 = vsel %vm1396_vm5, %v5333_v43, 0.0 }
 0x146   : > { %v1920_v44 = vadd.f32 %v1664_v2, %v876_v34  ;;  %v2452_v15 = vsel %vm2184_vm6, %v5337_v5, 0.0  ;;  %vm2972_vm7 = vcmp.eq.s32.totalorder %v4772_v54, %v5339_v39  ;;  %vm674_vm8 = vcmp.eq.s32.totalorder %v4822_v50, %v5320_v35 }
 0x147   : > { %3691 = vmatpush.msrb.mxu0 %v3376_v13  ;;  %v3440_v57 = vadd.f32 %v3184_v12, %v2652_v33  ;;  %v3240_v23 = vsel %vm2972_vm7, %v5353_v41, 0.0  ;;  %v944_v1 = vsel %vm674_vm8, %v5322_v24, 0.0  ;;  %vm1464_vm9 = vcmp.eq.s32.totalorder %v4822_v50, %v5324_v40 }
 0x148   : > { %v2708_v14 = vadd.f32 %v2452_v15, %v1920_v44  ;;  %v1732_v61 = vsel %vm1464_vm9, %v5333_v43, 0.0  ;;  %vm2252_vm10 = vcmp.eq.s32.totalorder %v4822_v50, %v5335_v0  ;;  %vm3040_vm11 = vcmp.eq.s32.totalorder %v4822_v50, %v5339_v39 }
 0x149   : > { %3711 = vmatpush.msrb.mxu1 %v3440_v57  ;;  %v1988_v25 = vadd.f32 %v1732_v61, %v944_v1  ;;  %v2520_v47 = vsel %vm2252_vm10, %v5337_v5, 0.0  ;;  %v3308_v42 = vsel %vm3040_vm11, %v5353_v41, 0.0  ;;  %vm482_vm12 = vcmp.eq.s32.totalorder %v4825_v55, %v5320_v35 }
 0x14a   : > { %v3496_v26 = vadd.f32 %v3240_v23, %v2708_v14  ;;  %v752_v31 = vsel %vm482_vm12, %v5322_v24, 0.0  ;;  %vm1272_vm13 = vcmp.eq.s32.totalorder %v4825_v55, %v5324_v40  ;;  %vm2060_vm14 = vcmp.eq.s32.totalorder %v4825_v55, %v5335_v0 }
 0x14b   : > { %v2776_v6 = vadd.f32 %v2520_v47, %v1988_v25  ;;  %v1540_v32 = vsel %vm1272_vm13, %v5333_v43, 0.0  ;;  %v2328_v9 = vsel %vm2060_vm14, %v5337_v5, 0.0  ;;  %vm2848_vm15 = vcmp.eq.s32.totalorder %v4825_v55, %v5339_v39 }
 0x14c   : > { %3733 = vmatpush.msrb.mxu2 %v3496_v26  ;;  %v1796_v11 = vadd.f32 %v1540_v32, %v752_v31  ;;  %v3116_v12 = vsel %vm2848_vm15, %v5353_v41, 0.0  ;;  %vm546_vm0 = vcmp.eq.s32.totalorder %v4829_v62, %v5320_v35  ;;  %vm1336_vm1 = vcmp.eq.s32.totalorder %v4829_v62, %v5324_v40 }
 0x14d   : > { %v3564_v13 = vadd.f32 %v3308_v42, %v2776_v6  ;;  %v816_v33 = vsel %vm546_vm0, %v5322_v24, 0.0  ;;  %v1604_v34 = vsel %vm1336_vm1, %v5333_v43, 0.0  ;;  %vm2124_vm2 = vcmp.eq.s32.totalorder %v4829_v62, %v5335_v0 }
 0x14e   : > { %v2584_v2 = vadd.f32 %v2328_v9, %v1796_v11  ;;  %v1860_v44 = vadd.f32 %v1604_v34, %v816_v33  ;;  %v2392_v15 = vsel %vm2124_vm2, %v5337_v5, 0.0  ;;  %vm2912_vm3 = vcmp.eq.s32.totalorder %v4829_v62, %v5339_v39  ;;  %v3592_v9 = vld [vmem:[%s4400_s22 + $0x8] sm:$0x77] }
 0x14f   : > { %3752 = vmatpush.msrb.mxu3 %v3564_v13  ;;  %v3180_v57 = vsel %vm2912_vm3, %v5353_v41, 0.0  ;;  %vm602_vm4 = vcmp.eq.s32.totalorder %v4832_v63, %v5320_v35  ;;  %vm1392_vm5 = vcmp.eq.s32.totalorder %v4832_v63, %v5324_v40  ;;  %vm2180_vm6 = vcmp.eq.s32.totalorder %v4832_v63, %v5335_v0  ;;  %3597 = vst [vmem:[#allocation1 + $0x10] ss:$2 sm:$0xff] %v3592_v9 }
 0x150   : > { %v3372_v23 = vadd.f32 %v3116_v12, %v2584_v2  ;;  %v2648_v1 = vadd.f32 %v2392_v15, %v1860_v44  ;;  %v872_v14 = vsel %vm602_vm4, %v5322_v24, 0.0  ;;  %v1660_v61 = vsel %vm1392_vm5, %v5333_v43, 0.0 }
 0x151   : > { %v1916_v25 = vadd.f32 %v1660_v61, %v872_v14  ;;  %v2448_v47 = vsel %vm2180_vm6, %v5337_v5, 0.0  ;;  %vm2968_vm7 = vcmp.eq.s32.totalorder %v4832_v63, %v5339_v39  ;;  %vm670_vm8 = vcmp.eq.s32.totalorder %v4882_v3, %v5320_v35 }
 0x152   : > { %3692 = vmatpush.msrb.mxu0 %v3372_v23  ;;  %v3436_v42 = vadd.f32 %v3180_v57, %v2648_v1  ;;  %v3236_v26 = vsel %vm2968_vm7, %v5353_v41, 0.0  ;;  %v940_v31 = vsel %vm670_vm8, %v5322_v24, 0.0  ;;  %vm1460_vm9 = vcmp.eq.s32.totalorder %v4882_v3, %v5324_v40 }
 0x153   : > { %v2704_v6 = vadd.f32 %v2448_v47, %v1916_v25  ;;  %v1728_v32 = vsel %vm1460_vm9, %v5333_v43, 0.0  ;;  %vm2248_vm10 = vcmp.eq.s32.totalorder %v4882_v3, %v5335_v0  ;;  %vm3036_vm11 = vcmp.eq.s32.totalorder %v4882_v3, %v5339_v39 }
 0x154   : > { %3712 = vmatpush.msrb.mxu1 %v3436_v42  ;;  %v1984_v11 = vadd.f32 %v1728_v32, %v940_v31  ;;  %v2516_v12 = vsel %vm2248_vm10, %v5337_v5, 0.0  ;;  %v3304_v13 = vsel %vm3036_vm11, %v5353_v41, 0.0  ;;  %vm478_vm12 = vcmp.eq.s32.totalorder %v4885_v4, %v5320_v35  ;;  %v7967_v31 = vld [vmem:[#allocation15_spill] sm:$0xff] }
 0x155   : > { %v3492_v33 = vadd.f32 %v3236_v26, %v2704_v6  ;;  %v748_v34 = vsel %vm478_vm12, %v5322_v24, 0.0  ;;  %vm1268_vm13 = vcmp.eq.s32.totalorder %v4885_v4, %v5324_v40  ;;  %vm2056_vm14 = vcmp.eq.s32.totalorder %v4885_v4, %v5335_v0 }
 0x156   : > { %v2772_v2 = vadd.f32 %v2516_v12, %v1984_v11  ;;  %v1536_v44 = vsel %vm1268_vm13, %v5333_v43, 0.0  ;;  %v2324_v15 = vsel %vm2056_vm14, %v5337_v5, 0.0  ;;  %vm2844_vm15 = vcmp.eq.s32.totalorder %v4885_v4, %v5339_v39  ;;  %v5815_v12 = vld.sshfl [vmem:[#allocation1 + $0x10] sm:$0xff pattern:$0x75316420] }
 0x157   : > { %3734 = vmatpush.msrb.mxu2 %v3492_v33  ;;  %v1792_v57 = vadd.f32 %v1536_v44, %v748_v34  ;;  %v3112_v23 = vsel %vm2844_vm15, %v5353_v41, 0.0  ;;  %vm542_vm0 = vcmp.eq.s32.totalorder %v4889_v8, %v5320_v35  ;;  %vm1332_vm1 = vcmp.eq.s32.totalorder %v4889_v8, %v5324_v40  ;;  %v7968_v34 = vld [vmem:[#allocation16_spill] sm:$0xff] }
 0x158   : > { %v3560_v1 = vadd.f32 %v3304_v13, %v2772_v2  ;;  %v812_v14 = vsel %vm542_vm0, %v5322_v24, 0.0  ;;  %v1600_v61 = vsel %vm1332_vm1, %v5333_v43, 0.0  ;;  %vm2120_vm2 = vcmp.eq.s32.totalorder %v4889_v8, %v5335_v0  ;;  %3662 = vmatmul.f32.vlgmr.msra.gmra.mxu2 %v5815_v12 }
 0x159   : > { %v2580_v25 = vadd.f32 %v2324_v15, %v1792_v57  ;;  %v1856_v47 = vadd.f32 %v1600_v61, %v812_v14  ;;  %v2388_v42 = vsel %vm2120_vm2, %v5337_v5, 0.0  ;;  %vm2908_vm3 = vcmp.eq.s32.totalorder %v4889_v8, %v5339_v39 }
 0x15a   : > { %3753 = vmatpush.msrb.mxu3 %v3560_v1  ;;  %v3176_v26 = vsel %vm2908_vm3, %v5353_v41, 0.0  ;;  %vm598_vm4 = vcmp.eq.s32.totalorder %v7967_v31, %v5320_v35  ;;  %vm1388_vm5 = vcmp.eq.s32.totalorder %v7967_v31, %v5324_v40  ;;  %vm2176_vm6 = vcmp.eq.s32.totalorder %v7967_v31, %v5335_v0 }
 0x15b   : > { %v3368_v6 = vadd.f32 %v3112_v23, %v2580_v25  ;;  %v2644_v32 = vadd.f32 %v2388_v42, %v1856_v47  ;;  %v868_v9 = vsel %vm598_vm4, %v5322_v24, 0.0  ;;  %v1656_v11 = vsel %vm1388_vm5, %v5333_v43, 0.0  ;;  %v7969_v25 = vld [vmem:[#allocation17_spill] sm:$0xff] }
 0x15c   : > { %v1912_v13 = vadd.f32 %v1656_v11, %v868_v9  ;;  %v2444_v33 = vsel %vm2176_vm6, %v5337_v5, 0.0  ;;  %vm2964_vm7 = vcmp.eq.s32.totalorder %v7967_v31, %v5339_v39  ;;  %vm666_vm8 = vcmp.eq.s32.totalorder %v7968_v34, %v5320_v35 }
 0x15d   : > { %3693 = vmatpush.msrb.mxu0 %v3368_v6  ;;  %v3432_v2 = vadd.f32 %v3176_v26, %v2644_v32  ;;  %v3232_v44 = vsel %vm2964_vm7, %v5353_v41, 0.0  ;;  %v936_v15 = vsel %vm666_vm8, %v5322_v24, 0.0  ;;  %vm1456_vm9 = vcmp.eq.s32.totalorder %v7968_v34, %v5324_v40 }
 0x15e   : > { %v2700_v57 = vadd.f32 %v2444_v33, %v1912_v13  ;;  %v1724_v23 = vsel %vm1456_vm9, %v5333_v43, 0.0  ;;  %vm2244_vm10 = vcmp.eq.s32.totalorder %v7968_v34, %v5335_v0  ;;  %vm3032_vm11 = vcmp.eq.s32.totalorder %v7968_v34, %v5339_v39  ;;  %v7970_v13 = vld [vmem:[#allocation18_spill] sm:$0xff] }
 0x15f   : > { %3713 = vmatpush.msrb.mxu1 %v3432_v2  ;;  %v1980_v1 = vadd.f32 %v1724_v23, %v936_v15  ;;  %v2512_v14 = vsel %vm2244_vm10, %v5337_v5, 0.0  ;;  %v3300_v61 = vsel %vm3032_vm11, %v5353_v41, 0.0  ;;  %vm474_vm12 = vcmp.eq.s32.totalorder %v7969_v25, %v5320_v35 }
 0x160   : > { %v3488_v47 = vadd.f32 %v3232_v44, %v2700_v57  ;;  %v744_v42 = vsel %vm474_vm12, %v5322_v24, 0.0  ;;  %vm1264_vm13 = vcmp.eq.s32.totalorder %v7969_v25, %v5324_v40  ;;  %vm2052_vm14 = vcmp.eq.s32.totalorder %v7969_v25, %v5335_v0 }
 0x161   : > { %v2768_v26 = vadd.f32 %v2512_v14, %v1980_v1  ;;  %v1532_v6 = vsel %vm1264_vm13, %v5333_v43, 0.0  ;;  %v2320_v32 = vsel %vm2052_vm14, %v5337_v5, 0.0  ;;  %vm2840_vm15 = vcmp.eq.s32.totalorder %v7969_v25, %v5339_v39  ;;  %v7971_v14 = vld [vmem:[#allocation19_spill] sm:$0xff] }
 0x162   : > { %3735 = vmatpush.msrb.mxu2 %v3488_v47  ;;  %v1788_v9 = vadd.f32 %v1532_v6, %v744_v42  ;;  %v3108_v11 = vsel %vm2840_vm15, %v5353_v41, 0.0  ;;  %vm538_vm0 = vcmp.eq.s32.totalorder %v7970_v13, %v5320_v35  ;;  %vm1328_vm1 = vcmp.eq.s32.totalorder %v7970_v13, %v5324_v40  ;;  %v5866_v6 = vld.sshfl [vmem:[#allocation1 + $0x18] sm:$0xff pattern:$0x75316420] }
 0x163   : > { %v3556_v33 = vadd.f32 %v3300_v61, %v2768_v26  ;;  %v808_v2 = vsel %vm538_vm0, %v5322_v24, 0.0  ;;  %v1596_v44 = vsel %vm1328_vm1, %v5333_v43, 0.0  ;;  %vm2116_vm2 = vcmp.eq.s32.totalorder %v7970_v13, %v5335_v0  ;;  %3682 = vmatmul.f32.vlgmr.msra.gmra.mxu3 %v5866_v6 }
 0x164   : > { %v2576_v15 = vadd.f32 %v2320_v32, %v1788_v9  ;;  %v1852_v57 = vadd.f32 %v1596_v44, %v808_v2  ;;  %v2384_v23 = vsel %vm2116_vm2, %v5337_v5, 0.0  ;;  %vm2904_vm3 = vcmp.eq.s32.totalorder %v7970_v13, %v5339_v39 }
 0x165   : > { %3754 = vmatpush.msrb.mxu3 %v3556_v33  ;;  %v3172_v1 = vsel %vm2904_vm3, %v5353_v41, 0.0  ;;  %vm594_vm4 = vcmp.eq.s32.totalorder %v7971_v14, %v5320_v35  ;;  %vm1384_vm5 = vcmp.eq.s32.totalorder %v7971_v14, %v5324_v40  ;;  %vm2172_vm6 = vcmp.eq.s32.totalorder %v7971_v14, %v5335_v0  ;;  %v7972_v33 = vld [vmem:[#allocation20_spill] sm:$0xff] }
 0x166   : > { %v3364_v61 = vadd.f32 %v3108_v11, %v2576_v15  ;;  %v2640_v47 = vadd.f32 %v2384_v23, %v1852_v57  ;;  %v864_v42 = vsel %vm594_vm4, %v5322_v24, 0.0  ;;  %v1652_v26 = vsel %vm1384_vm5, %v5333_v43, 0.0  ;;  %v3591_v23 = vld [vmem:[%s4400_s22] sm:$0x77] }
 0x167   : > { %v1908_v32 = vadd.f32 %v1652_v26, %v864_v42  ;;  %v2440_v9 = vsel %vm2172_vm6, %v5337_v5, 0.0  ;;  %vm2960_vm7 = vcmp.eq.s32.totalorder %v7971_v14, %v5339_v39  ;;  %vm662_vm8 = vcmp.eq.s32.totalorder %v7972_v33, %v5320_v35  ;;  %v7973_v42 = vld [vmem:[#allocation21_spill] sm:$0xff]  ;;  %3595 = vst [vmem:[#allocation1] ss:$2 sm:$0xff] %v3591_v23 }
 0x168   : > { %3694 = vmatpush.msrb.mxu0 %v3364_v61  ;;  %v3428_v11 = vadd.f32 %v3172_v1, %v2640_v47  ;;  %v3228_v2 = vsel %vm2960_vm7, %v5353_v41, 0.0  ;;  %v932_v44 = vsel %vm662_vm8, %v5322_v24, 0.0  ;;  %vm1452_vm9 = vcmp.eq.s32.totalorder %v7972_v33, %v5324_v40 }
 0x169   : > { %v2696_v15 = vadd.f32 %v2440_v9, %v1908_v32  ;;  %v1720_v57 = vsel %vm1452_vm9, %v5333_v43, 0.0  ;;  %vm2240_vm10 = vcmp.eq.s32.totalorder %v7972_v33, %v5335_v0  ;;  %vm3028_vm11 = vcmp.eq.s32.totalorder %v7972_v33, %v5339_v39 }
 0x16a   : > { %3714 = vmatpush.msrb.mxu1 %v3428_v11  ;;  %v1976_v61 = vadd.f32 %v1720_v57, %v932_v44  ;;  %v2508_v1 = vsel %vm2240_vm10, %v5337_v5, 0.0  ;;  %v3296_v47 = vsel %vm3028_vm11, %v5353_v41, 0.0  ;;  %vm470_vm12 = vcmp.eq.s32.totalorder %v7973_v42, %v5320_v35 }
 0x16b   : > { %v3484_v26 = vadd.f32 %v3228_v2, %v2696_v15  ;;  %v740_v32 = vsel %vm470_vm12, %v5322_v24, 0.0  ;;  %vm1260_vm13 = vcmp.eq.s32.totalorder %v7973_v42, %v5324_v40  ;;  %vm2048_vm14 = vcmp.eq.s32.totalorder %v7973_v42, %v5335_v0  ;;  %v7974_v15 = vld [vmem:[#allocation22_spill] sm:$0xff] }
 0x16c   : > { %v2764_v9 = vadd.f32 %v2508_v1, %v1976_v61  ;;  %v1528_v11 = vsel %vm1260_vm13, %v5333_v43, 0.0  ;;  %v2316_v44 = vsel %vm2048_vm14, %v5337_v5, 0.0  ;;  %vm2836_vm15 = vcmp.eq.s32.totalorder %v7973_v42, %v5339_v39 }
 0x16d   : > { %3736 = vmatpush.msrb.mxu2 %v3484_v26  ;;  %v1784_v57 = vadd.f32 %v1528_v11, %v740_v32  ;;  %v3104_v2 = vsel %vm2836_vm15, %v5353_v41, 0.0  ;;  %vm534_vm0 = vcmp.eq.s32.totalorder %v7974_v15, %v5320_v35  ;;  %vm1324_vm1 = vcmp.eq.s32.totalorder %v7974_v15, %v5324_v40  ;;  %v7975_v11 = vld [vmem:[#allocation23_spill] sm:$0xff] }
 0x16e   : > { %v3552_v23 = vadd.f32 %v3296_v47, %v2764_v9  ;;  %v804_v61 = vsel %vm534_vm0, %v5322_v24, 0.0  ;;  %v1592_v1 = vsel %vm1324_vm1, %v5333_v43, 0.0  ;;  %vm2112_vm2 = vcmp.eq.s32.totalorder %v7974_v15, %v5335_v0  ;;  %v5926_v14 = vld.sshfl [vmem:[#allocation1 + $0x8] sm:$0xff pattern:$0x75316420] }
 0x16f   : > { %v2572_v33 = vadd.f32 %v2316_v44, %v1784_v57  ;;  %v1848_v42 = vadd.f32 %v1592_v1, %v804_v61  ;;  %v2380_v26 = vsel %vm2112_vm2, %v5337_v5, 0.0  ;;  %vm2900_vm3 = vcmp.eq.s32.totalorder %v7974_v15, %v5339_v39  ;;  %v5918_v61 = vld.sshfl [vmem:[#allocation1] sm:$0xff pattern:$0x75316420]  ;;  %3642 = vmatmul.f32.vlgmr.msra.gmra.mxu1 %v5926_v14 }
 0x170   : > { %3755 = vmatpush.msrb.mxu3 %v3552_v23  ;;  %v3168_v32 = vsel %vm2900_vm3, %v5353_v41, 0.0  ;;  %vm590_vm4 = vcmp.eq.s32.totalorder %v7975_v11, %v5320_v35  ;;  %vm1380_vm5 = vcmp.eq.s32.totalorder %v7975_v11, %v5324_v40  ;;  %vm2168_vm6 = vcmp.eq.s32.totalorder %v7975_v11, %v5335_v0  ;;  %v7976_v15 = vld [vmem:[#allocation24_spill] sm:$0xff]  ;;  %3622 = vmatmul.f32.vlgmr.msra.gmra.mxu0 %v5918_v61 }
 0x171   : > { %v3360_v47 = vadd.f32 %v3104_v2, %v2572_v33  ;;  %v2636_v9 = vadd.f32 %v2380_v26, %v1848_v42  ;;  %v860_v44 = vsel %vm590_vm4, %v5322_v24, 0.0  ;;  %v1648_v57 = vsel %vm1380_vm5, %v5333_v43, 0.0 }
 0x172   : > { %v1904_v23 = vadd.f32 %v1648_v57, %v860_v44  ;;  %v2436_v1 = vsel %vm2168_vm6, %v5337_v5, 0.0  ;;  %vm2956_vm7 = vcmp.eq.s32.totalorder %v7975_v11, %v5339_v39  ;;  %vm658_vm8 = vcmp.eq.s32.totalorder %v7976_v15, %v5320_v35  ;;  %v7977_v57 = vld [vmem:[#allocation25_spill] sm:$0xff] }
 0x173   : > { %3695 = vmatpush.msrb.mxu0 %v3360_v47  ;;  %v3424_v33 = vadd.f32 %v3168_v32, %v2636_v9  ;;  %v3224_v42 = vsel %vm2956_vm7, %v5353_v41, 0.0  ;;  %v928_v2 = vsel %vm658_vm8, %v5322_v24, 0.0  ;;  %vm1448_vm9 = vcmp.eq.s32.totalorder %v7976_v15, %v5324_v40 }
 0x174   : > { %v2692_v26 = vadd.f32 %v2436_v1, %v1904_v23  ;;  %v1716_v44 = vsel %vm1448_vm9, %v5333_v43, 0.0  ;;  %vm2236_vm10 = vcmp.eq.s32.totalorder %v7976_v15, %v5335_v0  ;;  %vm3024_vm11 = vcmp.eq.s32.totalorder %v7976_v15, %v5339_v39 }
 0x175   : > { %3715 = vmatpush.msrb.mxu1 %v3424_v33  ;;  %v1972_v32 = vadd.f32 %v1716_v44, %v928_v2  ;;  %v2504_v47 = vsel %vm2236_vm10, %v5337_v5, 0.0  ;;  %v3292_v9 = vsel %vm3024_vm11, %v5353_v41, 0.0  ;;  %vm466_vm12 = vcmp.eq.s32.totalorder %v7977_v57, %v5320_v35 }
 0x176   : > { %v3480_v11 = vadd.f32 %v3224_v42, %v2692_v26  ;;  %v736_v23 = vsel %vm466_vm12, %v5322_v24, 0.0  ;;  %vm1256_vm13 = vcmp.eq.s32.totalorder %v7977_v57, %v5324_v40  ;;  %vm2044_vm14 = vcmp.eq.s32.totalorder %v7977_v57, %v5335_v0  ;;  %v7978_v26 = vld [vmem:[#allocation26_spill] sm:$0xff] }
 0x177   : > { %v2760_v1 = vadd.f32 %v2504_v47, %v1972_v32  ;;  %v1524_v33 = vsel %vm1256_vm13, %v5333_v43, 0.0  ;;  %v2312_v2 = vsel %vm2044_vm14, %v5337_v5, 0.0  ;;  %vm2832_vm15 = vcmp.eq.s32.totalorder %v7977_v57, %v5339_v39 }
 0x178   : > { %3737 = vmatpush.msrb.mxu2 %v3480_v11  ;;  %v1780_v44 = vadd.f32 %v1524_v33, %v736_v23  ;;  %v3100_v42 = vsel %vm2832_vm15, %v5353_v41, 0.0  ;;  %vm530_vm0 = vcmp.eq.s32.totalorder %v7978_v26, %v5320_v35  ;;  %vm1320_vm1 = vcmp.eq.s32.totalorder %v7978_v26, %v5324_v40  ;;  %v7979_v33 = vld [vmem:[#allocation27_spill] sm:$0xff] }
 0x179   : > { %v3548_v15 = vadd.f32 %v3292_v9, %v2760_v1  ;;  %v800_v32 = vsel %vm530_vm0, %v5322_v24, 0.0  ;;  %v1588_v47 = vsel %vm1320_vm1, %v5333_v43, 0.0  ;;  %vm2108_vm2 = vcmp.eq.s32.totalorder %v7978_v26, %v5335_v0 }
 0x17a   : > { %v2568_v13 = vadd.f32 %v2312_v2, %v1780_v44  ;;  %v1844_v57 = vadd.f32 %v1588_v47, %v800_v32  ;;  %v2376_v11 = vsel %vm2108_vm2, %v5337_v5, 0.0  ;;  %vm2896_vm3 = vcmp.eq.s32.totalorder %v7978_v26, %v5339_v39  ;;  %v7980_v47 = vld [vmem:[#allocation28_spill] sm:$0xff] }
 0x17b   : > { %3756 = vmatpush.msrb.mxu3 %v3548_v15  ;;  %v3164_v23 = vsel %vm2896_vm3, %v5353_v41, 0.0  ;;  %vm586_vm4 = vcmp.eq.s32.totalorder %v7979_v33, %v5320_v35  ;;  %vm1376_vm5 = vcmp.eq.s32.totalorder %v7979_v33, %v5324_v40  ;;  %vm2164_vm6 = vcmp.eq.s32.totalorder %v7979_v33, %v5335_v0 }
 0x17c   : > { %v3356_v9 = vadd.f32 %v3100_v42, %v2568_v13  ;;  %v2632_v1 = vadd.f32 %v2376_v11, %v1844_v57  ;;  %v856_v2 = vsel %vm586_vm4, %v5322_v24, 0.0  ;;  %v1644_v44 = vsel %vm1376_vm5, %v5333_v43, 0.0 }
 0x17d   : > { %v1900_v32 = vadd.f32 %v1644_v44, %v856_v2  ;;  %v2432_v15 = vsel %vm2164_vm6, %v5337_v5, 0.0  ;;  %vm2952_vm7 = vcmp.eq.s32.totalorder %v7979_v33, %v5339_v39  ;;  %vm654_vm8 = vcmp.eq.s32.totalorder %v7980_v47, %v5320_v35 }
 0x17e   : > { %3696 = vmatpush.msrb.mxu0 %v3356_v9  ;;  %v3420_v26 = vadd.f32 %v3164_v23, %v2632_v1  ;;  %v3220_v25 = vsel %vm2952_vm7, %v5353_v41, 0.0  ;;  %v924_v13 = vsel %vm654_vm8, %v5322_v24, 0.0  ;;  %vm1444_vm9 = vcmp.eq.s32.totalorder %v7980_v47, %v5324_v40  ;;  %v7981_v1 = vld [vmem:[#allocation29_spill] sm:$0xff] }
 0x17f   : > { %v2688_v57 = vadd.f32 %v2432_v15, %v1900_v32  ;;  %v1712_v42 = vsel %vm1444_vm9, %v5333_v43, 0.0  ;;  %vm2232_vm10 = vcmp.eq.s32.totalorder %v7980_v47, %v5335_v0  ;;  %vm3020_vm11 = vcmp.eq.s32.totalorder %v7980_v47, %v5339_v39 }
 0x180   : > { %3716 = vmatpush.msrb.mxu1 %v3420_v26  ;;  %v1968_v11 = vadd.f32 %v1712_v42, %v924_v13  ;;  %v2500_v23 = vsel %vm2232_vm10, %v5337_v5, 0.0  ;;  %v3288_v9 = vsel %vm3020_vm11, %v5353_v41, 0.0  ;;  %vm462_vm12 = vcmp.eq.s32.totalorder %v7981_v1, %v5320_v35 }
 0x181   : > { %v3476_v2 = vadd.f32 %v3220_v25, %v2688_v57  ;;  %v732_v44 = vsel %vm462_vm12, %v5322_v24, 0.0  ;;  %vm1252_vm13 = vcmp.eq.s32.totalorder %v7981_v1, %v5324_v40  ;;  %vm2040_vm14 = vcmp.eq.s32.totalorder %v7981_v1, %v5335_v0  ;;  %v7982_v57 = vld [vmem:[#allocation30_spill] sm:$0xff] }
 0x182   : > { %v2756_v32 = vadd.f32 %v2500_v23, %v1968_v11  ;;  %v1520_v26 = vsel %vm1252_vm13, %v5333_v43, 0.0  ;;  %v2308_v15 = vsel %vm2040_vm14, %v5337_v5, 0.0  ;;  %vm2828_vm15 = vcmp.eq.s32.totalorder %v7981_v1, %v5339_v39 }
 0x183   : > { %3738 = vmatpush.msrb.mxu2 %v3476_v2  ;;  %v1776_v13 = vadd.f32 %v1520_v26, %v732_v44  ;;  %v3096_v25 = vsel %vm2828_vm15, %v5353_v41, 0.0  ;;  %vm526_vm0 = vcmp.eq.s32.totalorder %v7982_v57, %v5320_v35  ;;  %vm1316_vm1 = vcmp.eq.s32.totalorder %v7982_v57, %v5324_v40  ;;  %v7983_v26 = vld [vmem:[#allocation31_spill] sm:$0xff] }
 0x184   : > { %v3544_v42 = vadd.f32 %v3288_v9, %v2756_v32  ;;  %v796_v11 = vsel %vm526_vm0, %v5322_v24, 0.0  ;;  %v1584_v23 = vsel %vm1316_vm1, %v5333_v43, 0.0  ;;  %vm2104_vm2 = vcmp.eq.s32.totalorder %v7982_v57, %v5335_v0 }
 0x185   : > { %v2564_v47 = vadd.f32 %v2308_v15, %v1776_v13  ;;  %v1840_v1 = vadd.f32 %v1584_v23, %v796_v11  ;;  %v2372_v2 = vsel %vm2104_vm2, %v5337_v5, 0.0  ;;  %vm2892_vm3 = vcmp.eq.s32.totalorder %v7982_v57, %v5339_v39  ;;  %v7984_v23 = vld [vmem:[#allocation32_spill] sm:$0xff] }
 0x186   : > { %3757 = vmatpush.msrb.mxu3 %v3544_v42  ;;  %v3160_v44 = vsel %vm2892_vm3, %v5353_v41, 0.0  ;;  %vm582_vm4 = vcmp.eq.s32.totalorder %v7983_v26, %v5320_v35  ;;  %vm1372_vm5 = vcmp.eq.s32.totalorder %v7983_v26, %v5324_v40  ;;  %vm2160_vm6 = vcmp.eq.s32.totalorder %v7983_v26, %v5335_v0 }
 0x187   : > { %v3352_v9 = vadd.f32 %v3096_v25, %v2564_v47  ;;  %v2628_v32 = vadd.f32 %v2372_v2, %v1840_v1  ;;  %v852_v15 = vsel %vm582_vm4, %v5322_v24, 0.0  ;;  %v1640_v13 = vsel %vm1372_vm5, %v5333_v43, 0.0 }
 0x188   : > { %v1896_v11 = vadd.f32 %v1640_v13, %v852_v15  ;;  %v2428_v42 = vsel %vm2160_vm6, %v5337_v5, 0.0  ;;  %vm2948_vm7 = vcmp.eq.s32.totalorder %v7983_v26, %v5339_v39  ;;  %vm650_vm8 = vcmp.eq.s32.totalorder %v7984_v23, %v5320_v35 }
 0x189   : > { %3697 = vmatpush.msrb.mxu0 %v3352_v9  ;;  %v3416_v57 = vadd.f32 %v3160_v44, %v2628_v32  ;;  %v3216_v33 = vsel %vm2948_vm7, %v5353_v41, 0.0  ;;  %v920_v47 = vsel %vm650_vm8, %v5322_v24, 0.0  ;;  %vm1440_vm9 = vcmp.eq.s32.totalorder %v7984_v23, %v5324_v40  ;;  %v7985_v32 = vld [vmem:[#allocation33_spill] sm:$0xff] }
 0x18a   : > { %v2684_v1 = vadd.f32 %v2428_v42, %v1896_v11  ;;  %v1708_v25 = vsel %vm1440_vm9, %v5333_v43, 0.0  ;;  %vm2228_vm10 = vcmp.eq.s32.totalorder %v7984_v23, %v5335_v0  ;;  %vm3016_vm11 = vcmp.eq.s32.totalorder %v7984_v23, %v5339_v39 }
 0x18b   : > { %3717 = vmatpush.msrb.mxu1 %v3416_v57  ;;  %v1964_v2 = vadd.f32 %v1708_v25, %v920_v47  ;;  %v2496_v44 = vsel %vm2228_vm10, %v5337_v5, 0.0  ;;  %v3284_v9 = vsel %vm3016_vm11, %v5353_v41, 0.0  ;;  %vm458_vm12 = vcmp.eq.s32.totalorder %v7985_v32, %v5320_v35 }
 0x18c   : > { %v3472_v15 = vadd.f32 %v3216_v33, %v2684_v1  ;;  %v728_v13 = vsel %vm458_vm12, %v5322_v24, 0.0  ;;  %vm1248_vm13 = vcmp.eq.s32.totalorder %v7985_v32, %v5324_v40  ;;  %vm2036_vm14 = vcmp.eq.s32.totalorder %v7985_v32, %v5335_v0  ;;  %v7986_v1 = vld [vmem:[#allocation34_spill] sm:$0xff] }
 0x18d   : > { %v2752_v11 = vadd.f32 %v2496_v44, %v1964_v2  ;;  %v1516_v57 = vsel %vm1248_vm13, %v5333_v43, 0.0  ;;  %v2304_v42 = vsel %vm2036_vm14, %v5337_v5, 0.0  ;;  %vm2824_vm15 = vcmp.eq.s32.totalorder %v7985_v32, %v5339_v39 }
 0x18e   : > { %3739 = vmatpush.msrb.mxu2 %v3472_v15  ;;  %v1772_v47 = vadd.f32 %v1516_v57, %v728_v13  ;;  %v3092_v33 = vsel %vm2824_vm15, %v5353_v41, 0.0  ;;  %vm522_vm0 = vcmp.eq.s32.totalorder %v7986_v1, %v5320_v35  ;;  %vm1312_vm1 = vcmp.eq.s32.totalorder %v7986_v1, %v5324_v40  ;;  %v7987_v57 = vld [vmem:[#allocation35_spill] sm:$0xff] }
 0x18f   : > { %v3540_v25 = vadd.f32 %v3284_v9, %v2752_v11  ;;  %v792_v2 = vsel %vm522_vm0, %v5322_v24, 0.0  ;;  %v1580_v44 = vsel %vm1312_vm1, %v5333_v43, 0.0  ;;  %vm2100_vm2 = vcmp.eq.s32.totalorder %v7986_v1, %v5335_v0 }
 0x190   : > { %v2560_v23 = vadd.f32 %v2304_v42, %v1772_v47  ;;  %v1836_v32 = vadd.f32 %v1580_v44, %v792_v2  ;;  %v2368_v15 = vsel %vm2100_vm2, %v5337_v5, 0.0  ;;  %vm2888_vm3 = vcmp.eq.s32.totalorder %v7986_v1, %v5339_v39  ;;  %v7988_v44 = vld [vmem:[#allocation36_spill] sm:$0xff] }
 0x191   : > { %3758 = vmatpush.msrb.mxu3 %v3540_v25  ;;  %v3156_v13 = vsel %vm2888_vm3, %v5353_v41, 0.0  ;;  %vm578_vm4 = vcmp.eq.s32.totalorder %v7987_v57, %v5320_v35  ;;  %vm1368_vm5 = vcmp.eq.s32.totalorder %v7987_v57, %v5324_v40  ;;  %vm2156_vm6 = vcmp.eq.s32.totalorder %v7987_v57, %v5335_v0 }
 0x192   : > { %v3348_v9 = vadd.f32 %v3092_v33, %v2560_v23  ;;  %v2624_v11 = vadd.f32 %v2368_v15, %v1836_v32  ;;  %v848_v42 = vsel %vm578_vm4, %v5322_v24, 0.0  ;;  %v1636_v47 = vsel %vm1368_vm5, %v5333_v43, 0.0 }
 0x193   : > { %v1892_v2 = vadd.f32 %v1636_v47, %v848_v42  ;;  %v2424_v25 = vsel %vm2156_vm6, %v5337_v5, 0.0  ;;  %vm2944_vm7 = vcmp.eq.s32.totalorder %v7987_v57, %v5339_v39  ;;  %vm646_vm8 = vcmp.eq.s32.totalorder %v7988_v44, %v5320_v35 }
 0x194   : > { %3698 = vmatpush.msrb.mxu0 %v3348_v9  ;;  %v3412_v1 = vadd.f32 %v3156_v13, %v2624_v11  ;;  %v3212_v26 = vsel %vm2944_vm7, %v5353_v41, 0.0  ;;  %v916_v23 = vsel %vm646_vm8, %v5322_v24, 0.0  ;;  %vm1436_vm9 = vcmp.eq.s32.totalorder %v7988_v44, %v5324_v40  ;;  %v7989_v11 = vld [vmem:[#allocation37_spill] sm:$0xff] }
 0x195   : > { %v2680_v32 = vadd.f32 %v2424_v25, %v1892_v2  ;;  %v1704_v33 = vsel %vm1436_vm9, %v5333_v43, 0.0  ;;  %vm2224_vm10 = vcmp.eq.s32.totalorder %v7988_v44, %v5335_v0  ;;  %vm3012_vm11 = vcmp.eq.s32.totalorder %v7988_v44, %v5339_v39 }
 0x196   : > { %3718 = vmatpush.msrb.mxu1 %v3412_v1  ;;  %v1960_v15 = vadd.f32 %v1704_v33, %v916_v23  ;;  %v2492_v13 = vsel %vm2224_vm10, %v5337_v5, 0.0  ;;  %v3280_v9 = vsel %vm3012_vm11, %v5353_v41, 0.0  ;;  %vm454_vm12 = vcmp.eq.s32.totalorder %v7989_v11, %v5320_v35 }
 0x197   : > { %v3468_v42 = vadd.f32 %v3212_v26, %v2680_v32  ;;  %v724_v47 = vsel %vm454_vm12, %v5322_v24, 0.0  ;;  %vm1244_vm13 = vcmp.eq.s32.totalorder %v7989_v11, %v5324_v40  ;;  %vm2032_vm14 = vcmp.eq.s32.totalorder %v7989_v11, %v5335_v0  ;;  %v7990_v32 = vld [vmem:[#allocation38_spill] sm:$0xff] }
 0x198   : > { %v2748_v2 = vadd.f32 %v2492_v13, %v1960_v15  ;;  %v1512_v1 = vsel %vm1244_vm13, %v5333_v43, 0.0  ;;  %v2300_v25 = vsel %vm2032_vm14, %v5337_v5, 0.0  ;;  %vm2820_vm15 = vcmp.eq.s32.totalorder %v7989_v11, %v5339_v39 }
 0x199   : > { %3740 = vmatpush.msrb.mxu2 %v3468_v42  ;;  %v1768_v23 = vadd.f32 %v1512_v1, %v724_v47  ;;  %v3088_v26 = vsel %vm2820_vm15, %v5353_v41, 0.0  ;;  %vm518_vm0 = vcmp.eq.s32.totalorder %v7990_v32, %v5320_v35  ;;  %vm1308_vm1 = vcmp.eq.s32.totalorder %v7990_v32, %v5324_v40  ;;  %v7991_v1 = vld [vmem:[#allocation39_spill] sm:$0xff] }
 0x19a   : > { %v3536_v33 = vadd.f32 %v3280_v9, %v2748_v2  ;;  %v788_v15 = vsel %vm518_vm0, %v5322_v24, 0.0  ;;  %v1576_v13 = vsel %vm1308_vm1, %v5333_v43, 0.0  ;;  %vm2096_vm2 = vcmp.eq.s32.totalorder %v7990_v32, %v5335_v0 }
 0x19b   : > { %v2556_v44 = vadd.f32 %v2300_v25, %v1768_v23  ;;  %v1832_v11 = vadd.f32 %v1576_v13, %v788_v15  ;;  %v2364_v42 = vsel %vm2096_vm2, %v5337_v5, 0.0  ;;  %vm2884_vm3 = vcmp.eq.s32.totalorder %v7990_v32, %v5339_v39  ;;  %v7992_v13 = vld [vmem:[#allocation40_spill] sm:$0xff] }
 0x19c   : > { %3759 = vmatpush.msrb.mxu3 %v3536_v33  ;;  %v3152_v47 = vsel %vm2884_vm3, %v5353_v41, 0.0  ;;  %vm574_vm4 = vcmp.eq.s32.totalorder %v7991_v1, %v5320_v35  ;;  %vm1364_vm5 = vcmp.eq.s32.totalorder %v7991_v1, %v5324_v40  ;;  %vm2152_vm6 = vcmp.eq.s32.totalorder %v7991_v1, %v5335_v0 }
 0x19d   : > { %v3344_v9 = vadd.f32 %v3088_v26, %v2556_v44  ;;  %v2620_v2 = vadd.f32 %v2364_v42, %v1832_v11  ;;  %v844_v25 = vsel %vm574_vm4, %v5322_v24, 0.0  ;;  %v1632_v23 = vsel %vm1364_vm5, %v5333_v43, 0.0  ;;  %v367_v11 = vld [vmem:[%s4375_s25 + $0x8] sm:$0xff] }
 0x19e   : > { %v1888_v15 = vadd.f32 %v1632_v23, %v844_v25  ;;  %v2420_v33 = vsel %vm2152_vm6, %v5337_v5, 0.0  ;;  %vm2940_vm7 = vcmp.eq.s32.totalorder %v7991_v1, %v5339_v39  ;;  %vm642_vm8 = vcmp.eq.s32.totalorder %v7992_v13, %v5320_v35  ;;  %v7993_v25 = vld [vmem:[#allocation10_spill] sm:$0xff] }
 0x19f   : > { %3699 = vmatpush.msrb.mxu0 %v3344_v9  ;;  %v3408_v32 = vadd.f32 %v3152_v47, %v2620_v2  ;;  %v3208_v57 = vsel %vm2940_vm7, %v5353_v41, 0.0  ;;  %v912_v44 = vsel %vm642_vm8, %v5322_v24, 0.0  ;;  %vm1432_vm9 = vcmp.eq.s32.totalorder %v7992_v13, %v5324_v40 }
 0x1a0   : > { %v2676_v26 = vadd.f32 %v2420_v33, %v1888_v15  ;;  %v1700_v42 = vsel %vm1432_vm9, %v5333_v43, 0.0  ;;  %vm2220_vm10 = vcmp.eq.s32.totalorder %v7992_v13, %v5335_v0  ;;  %vm3008_vm11 = vcmp.eq.s32.totalorder %v7992_v13, %v5339_v39 }
 0x1a1   : > { %3719 = vmatpush.msrb.mxu1 %v3408_v32  ;;  %v1956_v9 = vadd.f32 %v1700_v42, %v912_v44  ;;  %v2488_v47 = vsel %vm2220_vm10, %v5337_v5, 0.0  ;;  %v3276_v2 = vsel %vm3008_vm11, %v5353_v41, 0.0  ;;  %v439_v23 = vperm.slane %v7993_v25, 0 }
 0x1a2   : > { %v3464_v1 = vadd.f32 %v3208_v57, %v2676_v26  ;;  %v705_v34 = vperm.slane %v367_v11, 0  ;;  %v1229_v15 = vperm.slane %v7993_v25, 1  ;;  %v1493_v33 = vperm.slane %v367_v11, 1  ;;  %v7994_v26 = vld [vmem:[#allocation9_spill] sm:$0xff] }
 0x1a3   : > { %v2744_v31 = vadd.f32 %v2488_v47, %v1956_v9  ;;  %v6135_v8 = vperm.slane %v439_v23, 0  ;;  %v2017_v4 = vperm.slane %v7993_v25, 2  ;;  %v2281_v3 = vperm.slane %v367_v11, 2 }
 0x1a4   : > { %3741 = vmatpush.msrb.mxu2 %v3464_v1  ;;  %v6138_v32 = vperm.slane %v705_v34, 0  ;;  %v6140_v44 = vperm.slane %v1229_v15, 1  ;;  %v6142_v42 = vperm.slane %v1493_v33, 1  ;;  %v2805_v13 = vperm.slane %v7993_v25, 3 }
 0x1a5   : > { %v3532_v57 = vadd.f32 %v3276_v2, %v2744_v31  ;;  %3742 = vmatmul.f32.vlgmr.msrb.gmra.mxu2 %v5815_v12  ;;  %vm635_vm12 = vcmp.eq.s32.totalorder %v7994_v26, %v6135_v8  ;;  %v6148_v9 = vperm.slane %v2017_v4, 2  ;;  %v6150_v47 = vperm.slane %v2281_v3, 2  ;;  %v7995_v12 = vld [vmem:[#allocation41_spill] sm:$0xff] }
 0x1a6   : > { %v905_v1 = vsel %vm635_vm12, %v6138_v32, 0.0  ;;  %vm1425_vm13 = vcmp.eq.s32.totalorder %v7994_v26, %v6140_v44  ;;  %v6155_v34 = vperm.slane %v2805_v13, 3  ;;  %v3069_v23 = vperm.slane %v367_v11, 3 }
 0x1a7   : > { %3760 = vmatpush.msrb.mxu3 %v3532_v57  ;;  %v1693_v31 = vsel %vm1425_vm13, %v6142_v42, 0.0  ;;  %vm2213_vm14 = vcmp.eq.s32.totalorder %v7994_v26, %v6148_v9  ;;  %vm450_vm15 = vcmp.eq.s32.totalorder %v7995_v12, %v5320_v35  ;;  %vm1240_vm0 = vcmp.eq.s32.totalorder %v7995_v12, %v5324_v40 }
 0x1a8   : > { %v1949_v3 = vadd.f32 %v1693_v31, %v905_v1  ;;  %v2481_v4 = vsel %vm2213_vm14, %v6150_v47, 0.0  ;;  %vm3001_vm1 = vcmp.eq.s32.totalorder %v7994_v26, %v6155_v34  ;;  %v6167_v13 = vperm.slane %v3069_v23, 3  ;;  %v7996_v23 = vld [vmem:[#allocation42_spill] sm:$0xff] }
 0x1a9   : > { %v720_v11 = vsel %vm450_vm15, %v5322_v24, 0.0  ;;  %v1508_v2 = vsel %vm1240_vm0, %v5333_v43, 0.0  ;;  %vm2028_vm2 = vcmp.eq.s32.totalorder %v7995_v12, %v5335_v0  ;;  %vm2816_vm3 = vcmp.eq.s32.totalorder %v7995_v12, %v5339_v39 }
 0x1aa   : > { %v2737_v15 = vadd.f32 %v2481_v4, %v1949_v3  ;;  %v3269_v33 = vsel %vm3001_vm1, %v6167_v13, 0.0  ;;  %v1764_v57 = vadd.f32 %v1508_v2, %v720_v11  ;;  %v2296_v1 = vsel %vm2028_vm2, %v5337_v5, 0.0 }
 0x1ab   : > { %v3084_v31 = vsel %vm2816_vm3, %v5353_v41, 0.0  ;;  %vm514_vm4 = vcmp.eq.s32.totalorder %v7996_v23, %v5320_v35  ;;  %vm1304_vm5 = vcmp.eq.s32.totalorder %v7996_v23, %v5324_v40  ;;  %vm2092_vm6 = vcmp.eq.s32.totalorder %v7996_v23, %v5335_v0 }
 0x1ac   : > { %v3525_v26 = vadd.f32 %v3269_v33, %v2737_v15  ;;  %v2552_v25 = vadd.f32 %v2296_v1, %v1764_v57  ;;  %v784_v3 = vsel %vm514_vm4, %v5322_v24, 0.0  ;;  %v1572_v4 = vsel %vm1304_vm5, %v5333_v43, 0.0 }
 0x1ad   : > { %v1828_v11 = vadd.f32 %v1572_v4, %v784_v3  ;;  %v2360_v2 = vsel %vm2092_vm6, %v5337_v5, 0.0  ;;  %vm2880_vm7 = vcmp.eq.s32.totalorder %v7996_v23, %v5339_v39  ;;  %vm638_vm8 = vcmp.eq.s32.totalorder %v5381_v22, %v5320_v35 }
 0x1ae   : > { %3806 = vmatpush.msra.mxu2 %v3525_v26  ;;  %v3340_v12 = vadd.f32 %v3084_v31, %v2552_v25  ;;  %v3148_v63 = vsel %vm2880_vm7, %v5353_v41, 0.0  ;;  %v908_v15 = vsel %vm638_vm8, %v5322_v24, 0.0  ;;  %vm1428_vm9 = vcmp.eq.s32.totalorder %v5381_v22, %v5324_v40 }
 0x1af   : > { %v2616_v33 = vadd.f32 %v2360_v2, %v1828_v11  ;;  %v1696_v57 = vsel %vm1428_vm9, %v5333_v43, 0.0  ;;  %vm2216_vm10 = vcmp.eq.s32.totalorder %v5381_v22, %v5335_v0  ;;  %vm3004_vm11 = vcmp.eq.s32.totalorder %v5381_v22, %v5339_v39 }
 0x1b0   : > { %3700 = vmatpush.msrb.mxu0 %v3340_v12  ;;  %v1952_v1 = vadd.f32 %v1696_v57, %v908_v15  ;;  %v2484_v25 = vsel %vm2216_vm10, %v5337_v5, 0.0  ;;  %v3272_v26 = vsel %vm3004_vm11, %v5353_v41, 0.0  ;;  %vm631_vm12 = vcmp.eq.s32.totalorder %v4421_v16, %v6135_v8 }
 0x1b1   : > { %v3404_v31 = vadd.f32 %v3148_v63, %v2616_v33  ;;  %v901_v3 = vsel %vm631_vm12, %v6138_v32, 0.0  ;;  %vm1421_vm13 = vcmp.eq.s32.totalorder %v4421_v16, %v6140_v44  ;;  %vm2209_vm14 = vcmp.eq.s32.totalorder %v4421_v16, %v6148_v9 }
 0x1b2   : > { %v2740_v4 = vadd.f32 %v2484_v25, %v1952_v1  ;;  %v1689_v12 = vsel %vm1421_vm13, %v6142_v42, 0.0  ;;  %v2477_v11 = vsel %vm2209_vm14, %v6150_v47, 0.0  ;;  %vm2997_vm15 = vcmp.eq.s32.totalorder %v4421_v16, %v6155_v34 }
 0x1b3   : > { %3720 = vmatpush.msrb.mxu1 %v3404_v31  ;;  %v1945_v2 = vadd.f32 %v1689_v12, %v901_v3  ;;  %v3265_v63 = vsel %vm2997_vm15, %v6167_v13, 0.0  ;;  %vm699_vm0 = vcmp.eq.s32.totalorder %v4424_v17, %v6135_v8  ;;  %vm1489_vm1 = vcmp.eq.s32.totalorder %v4424_v17, %v6140_v44 }
 0x1b4   : > { %v3528_v15 = vadd.f32 %v3272_v26, %v2740_v4  ;;  %v969_v33 = vsel %vm699_vm0, %v6138_v32, 0.0  ;;  %v1757_v57 = vsel %vm1489_vm1, %v6142_v42, 0.0  ;;  %vm2277_vm2 = vcmp.eq.s32.totalorder %v4424_v17, %v6148_v9 }
 0x1b5   : > { %v2733_v1 = vadd.f32 %v2477_v11, %v1945_v2  ;;  %v2013_v25 = vadd.f32 %v1757_v57, %v969_v33  ;;  %v2545_v31 = vsel %vm2277_vm2, %v6150_v47, 0.0  ;;  %vm3065_vm3 = vcmp.eq.s32.totalorder %v4424_v17, %v6155_v34 }
 0x1b6   : > { %3761 = vmatpush.msrb.mxu3 %v3528_v15  ;;  %v3333_v3 = vsel %vm3065_vm3, %v6167_v13, 0.0  ;;  %vm446_vm4 = vcmp.eq.s32.totalorder %v4404_v7, %v5320_v35  ;;  %vm1236_vm5 = vcmp.eq.s32.totalorder %v4404_v7, %v5324_v40  ;;  %vm2024_vm6 = vcmp.eq.s32.totalorder %v4404_v7, %v5335_v0 }
 0x1b7   : > { %3762 = vmatmul.f32.vlgmr.msrb.gmra.mxu3 %v5866_v6  ;;  %v3521_v26 = vadd.f32 %v3265_v63, %v2733_v1  ;;  %v2801_v4 = vadd.f32 %v2545_v31, %v2013_v25  ;;  %v716_v12 = vsel %vm446_vm4, %v5322_v24, 0.0  ;;  %v1504_v11 = vsel %vm1236_vm5, %v5333_v43, 0.0 }
 0x1b8   : > { %v1760_v2 = vadd.f32 %v1504_v11, %v716_v12  ;;  %v2292_v15 = vsel %vm2024_vm6, %v5337_v5, 0.0  ;;  %vm2812_vm7 = vcmp.eq.s32.totalorder %v4404_v7, %v5339_v39  ;;  %vm510_vm8 = vcmp.eq.s32.totalorder %v5431_v10, %v5320_v35 }
 0x1b9   : > { %3807 = vmatpush.msra.mxu2 %v3521_v26  ;;  %v3589_v33 = vadd.f32 %v3333_v3, %v2801_v4  ;;  %v3080_v57 = vsel %vm2812_vm7, %v5353_v41, 0.0  ;;  %v780_v6 = vsel %vm510_vm8, %v5322_v24, 0.0  ;;  %vm1300_vm9 = vcmp.eq.s32.totalorder %v5431_v10, %v5324_v40 }
 0x1ba   : > { %v2548_v63 = vadd.f32 %v2292_v15, %v1760_v2  ;;  %v1568_v1 = vsel %vm1300_vm9, %v5333_v43, 0.0  ;;  %vm2088_vm10 = vcmp.eq.s32.totalorder %v5431_v10, %v5335_v0  ;;  %vm2876_vm11 = vcmp.eq.s32.totalorder %v5431_v10, %v5339_v39 }
 0x1bb   : > { %3826 = vmatpush.msra.mxu3 %v3589_v33  ;;  %v1824_v35 = vadd.f32 %v1568_v1, %v780_v6  ;;  %v2356_v25 = vsel %vm2088_vm10, %v5337_v5, 0.0  ;;  %v3144_v31 = vsel %vm2876_vm11, %v5353_v41, 0.0  ;;  %vm507_vm12 = vcmp.eq.s32.totalorder %v4427_v18, %v6135_v8 }
 0x1bc   : > { %v3336_v24 = vadd.f32 %v3080_v57, %v2548_v63  ;;  %v777_v40 = vsel %vm507_vm12, %v6138_v32, 0.0  ;;  %vm1297_vm13 = vcmp.eq.s32.totalorder %v4427_v18, %v6140_v44  ;;  %vm2085_vm14 = vcmp.eq.s32.totalorder %v4427_v18, %v6148_v9 }
 0x1bd   : > { %v2612_v43 = vadd.f32 %v2356_v25, %v1824_v35  ;;  %v1565_v0 = vsel %vm1297_vm13, %v6142_v42, 0.0  ;;  %v2353_v39 = vsel %vm2085_vm14, %v6150_v47, 0.0  ;;  %vm2873_vm15 = vcmp.eq.s32.totalorder %v4427_v18, %v6155_v34 }
 0x1be   : > { %3701 = vmatpush.msrb.mxu0 %v3336_v24  ;;  %v1821_v5 = vadd.f32 %v1565_v0, %v777_v40  ;;  %v3141_v41 = vsel %vm2873_vm15, %v6167_v13, 0.0  ;;  %vm571_vm0 = vcmp.eq.s32.totalorder %v4430_v19, %v6135_v8  ;;  %vm1361_vm1 = vcmp.eq.s32.totalorder %v4430_v19, %v6140_v44 }
 0x1bf   : > { %v3400_v3 = vadd.f32 %v3144_v31, %v2612_v43  ;;  %3702 = vmatmul.f32.vlgmr.msrb.gmra.mxu0 %v5918_v61  ;;  %v841_v26 = vsel %vm571_vm0, %v6138_v32, 0.0  ;;  %v1629_v4 = vsel %vm1361_vm1, %v6142_v42, 0.0  ;;  %vm2149_vm2 = vcmp.eq.s32.totalorder %v4430_v19, %v6148_v9 }
 0x1c0   : > { %v2609_v12 = vadd.f32 %v2353_v39, %v1821_v5  ;;  %v1885_v11 = vadd.f32 %v1629_v4, %v841_v26  ;;  %v2417_v2 = vsel %vm2149_vm2, %v6150_v47, 0.0  ;;  %vm2937_vm3 = vcmp.eq.s32.totalorder %v4430_v19, %v6155_v34 }
 0x1c1   : > { %3721 = vmatpush.msrb.mxu1 %v3400_v3  ;;  %v3205_v15 = vsel %vm2937_vm3, %v6167_v13, 0.0  ;;  %vm627_vm4 = vcmp.eq.s32.totalorder %v4433_v20, %v6135_v8  ;;  %vm1417_vm5 = vcmp.eq.s32.totalorder %v4433_v20, %v6140_v44  ;;  %vm2205_vm6 = vcmp.eq.s32.totalorder %v4433_v20, %v6148_v9 }
 0x1c2   : > { %3722 = vmatmul.f32.vlgmr.msrb.gmra.mxu1 %v5926_v14  ;;  %v3397_v61 = vadd.f32 %v3141_v41, %v2609_v12  ;;  %v2673_v33 = vadd.f32 %v2417_v2, %v1885_v11  ;;  %v897_v57 = vsel %vm627_vm4, %v6138_v32, 0.0  ;;  %v1685_v6 = vsel %vm1417_vm5, %v6142_v42, 0.0 }
 0x1c3   : > { %v1941_v63 = vadd.f32 %v1685_v6, %v897_v57  ;;  %v2473_v1 = vsel %vm2205_vm6, %v6150_v47, 0.0  ;;  %vm2993_vm7 = vcmp.eq.s32.totalorder %v4433_v20, %v6155_v34  ;;  %vm695_vm8 = vcmp.eq.s32.totalorder %v4436_v21, %v6135_v8 }
 0x1c4   : > { %3766 = vmatpush.msra.mxu0 %v3397_v61  ;;  %v3461_v35 = vadd.f32 %v3205_v15, %v2673_v33  ;;  %v3261_v25 = vsel %vm2993_vm7, %v6167_v13, 0.0  ;;  %v965_v14 = vsel %vm695_vm8, %v6138_v32, 0.0  ;;  %vm1485_vm9 = vcmp.eq.s32.totalorder %v4436_v21, %v6140_v44 }
 0x1c5   : > { %v2729_v31 = vadd.f32 %v2473_v1, %v1941_v63  ;;  %v1753_v24 = vsel %vm1485_vm9, %v6142_v42, 0.0  ;;  %vm2273_vm10 = vcmp.eq.s32.totalorder %v4436_v21, %v6148_v9  ;;  %vm3061_vm11 = vcmp.eq.s32.totalorder %v4436_v21, %v6155_v34 }
 0x1c6   : > { %3786 = vmatpush.msra.mxu1 %v3461_v35  ;;  %v2009_v40 = vadd.f32 %v1753_v24, %v965_v14  ;;  %v2541_v43 = vsel %vm2273_vm10, %v6150_v47, 0.0  ;;  %v3329_v0 = vsel %vm3061_vm11, %v6167_v13, 0.0  ;;  %vm503_vm12 = vcmp.eq.s32.totalorder %v4444_v27, %v6135_v8 }
 0x1c7   : > { %v3517_v39 = vadd.f32 %v3261_v25, %v2729_v31  ;;  %v773_v5 = vsel %vm503_vm12, %v6138_v32, 0.0  ;;  %vm1293_vm13 = vcmp.eq.s32.totalorder %v4444_v27, %v6140_v44  ;;  %vm2081_vm14 = vcmp.eq.s32.totalorder %v4444_v27, %v6148_v9 }
 0x1c8   : > { %v2797_v41 = vadd.f32 %v2541_v43, %v2009_v40  ;;  %v1561_v3 = vsel %vm1293_vm13, %v6142_v42, 0.0  ;;  %v2349_v26 = vsel %vm2081_vm14, %v6150_v47, 0.0  ;;  %vm2869_vm15 = vcmp.eq.s32.totalorder %v4444_v27, %v6155_v34 }
 0x1c9   : > { %3808 = vmatpush.msra.mxu2 %v3517_v39  ;;  %v1817_v4 = vadd.f32 %v1561_v3, %v773_v5  ;;  %v3137_v12 = vsel %vm2869_vm15, %v6167_v13, 0.0  ;;  %vm567_vm0 = vcmp.eq.s32.totalorder %v4447_v28, %v6135_v8  ;;  %vm1357_vm1 = vcmp.eq.s32.totalorder %v4447_v28, %v6140_v44 }
 0x1ca   : > { %v3585_v11 = vadd.f32 %v3329_v0, %v2797_v41  ;;  %v837_v2 = vsel %vm567_vm0, %v6138_v32, 0.0  ;;  %v1625_v15 = vsel %vm1357_vm1, %v6142_v42, 0.0  ;;  %vm2145_vm2 = vcmp.eq.s32.totalorder %v4447_v28, %v6148_v9 }
 0x1cb   : > { %v2605_v61 = vadd.f32 %v2349_v26, %v1817_v4  ;;  %v1881_v33 = vadd.f32 %v1625_v15, %v837_v2  ;;  %v2413_v57 = vsel %vm2145_vm2, %v6150_v47, 0.0  ;;  %vm2933_vm3 = vcmp.eq.s32.totalorder %v4447_v28, %v6155_v34 }
 0x1cc   : > { %3827 = vmatpush.msra.mxu3 %v3585_v11  ;;  %v3201_v6 = vsel %vm2933_vm3, %v6167_v13, 0.0  ;;  %vm623_vm4 = vcmp.eq.s32.totalorder %v4450_v29, %v6135_v8  ;;  %vm1413_vm5 = vcmp.eq.s32.totalorder %v4450_v29, %v6140_v44  ;;  %vm2201_vm6 = vcmp.eq.s32.totalorder %v4450_v29, %v6148_v9 }
 0x1cd   : > { %v3393_v63 = vadd.f32 %v3137_v12, %v2605_v61  ;;  %v2669_v1 = vadd.f32 %v2413_v57, %v1881_v33  ;;  %v893_v35 = vsel %vm623_vm4, %v6138_v32, 0.0  ;;  %v1681_v25 = vsel %vm1413_vm5, %v6142_v42, 0.0 }
 0x1ce   : > { %v1937_v14 = vadd.f32 %v1681_v25, %v893_v35  ;;  %v2469_v31 = vsel %vm2201_vm6, %v6150_v47, 0.0  ;;  %vm2989_vm7 = vcmp.eq.s32.totalorder %v4450_v29, %v6155_v34  ;;  %vm691_vm8 = vcmp.eq.s32.totalorder %v4453_v30, %v6135_v8 }
 0x1cf   : > { %3767 = vmatpush.msra.mxu0 %v3393_v63  ;;  %v3457_v24 = vadd.f32 %v3201_v6, %v2669_v1  ;;  %v3257_v40 = vsel %vm2989_vm7, %v6167_v13, 0.0  ;;  %v961_v43 = vsel %vm691_vm8, %v6138_v32, 0.0  ;;  %vm1481_vm9 = vcmp.eq.s32.totalorder %v4453_v30, %v6140_v44 }
 0x1d0   : > { %v2725_v0 = vadd.f32 %v2469_v31, %v1937_v14  ;;  %v1749_v39 = vsel %vm1481_vm9, %v6142_v42, 0.0  ;;  %vm2269_vm10 = vcmp.eq.s32.totalorder %v4453_v30, %v6148_v9  ;;  %vm3057_vm11 = vcmp.eq.s32.totalorder %v4453_v30, %v6155_v34 }
 0x1d1   : > { %3787 = vmatpush.msra.mxu1 %v3457_v24  ;;  %v2005_v5 = vadd.f32 %v1749_v39, %v961_v43  ;;  %v2537_v41 = vsel %vm2269_vm10, %v6150_v47, 0.0  ;;  %v3325_v3 = vsel %vm3057_vm11, %v6167_v13, 0.0  ;;  %vm499_vm12 = vcmp.eq.s32.totalorder %v4466_v36, %v6135_v8 }
 0x1d2   : > { %v3513_v26 = vadd.f32 %v3257_v40, %v2725_v0  ;;  %v769_v4 = vsel %vm499_vm12, %v6138_v32, 0.0  ;;  %vm1289_vm13 = vcmp.eq.s32.totalorder %v4466_v36, %v6140_v44  ;;  %vm2077_vm14 = vcmp.eq.s32.totalorder %v4466_v36, %v6148_v9 }
 0x1d3   : > { %v2793_v12 = vadd.f32 %v2537_v41, %v2005_v5  ;;  %v1557_v11 = vsel %vm1289_vm13, %v6142_v42, 0.0  ;;  %v2345_v2 = vsel %vm2077_vm14, %v6150_v47, 0.0  ;;  %vm2865_vm15 = vcmp.eq.s32.totalorder %v4466_v36, %v6155_v34 }
 0x1d4   : > { %3809 = vmatpush.msra.mxu2 %v3513_v26  ;;  %v1813_v15 = vadd.f32 %v1557_v11, %v769_v4  ;;  %v3133_v61 = vsel %vm2865_vm15, %v6167_v13, 0.0  ;;  %vm563_vm0 = vcmp.eq.s32.totalorder %v4469_v37, %v6135_v8  ;;  %vm1353_vm1 = vcmp.eq.s32.totalorder %v4469_v37, %v6140_v44 }
 0x1d5   : > { %v3581_v33 = vadd.f32 %v3325_v3, %v2793_v12  ;;  %v833_v57 = vsel %vm563_vm0, %v6138_v32, 0.0  ;;  %v1621_v6 = vsel %vm1353_vm1, %v6142_v42, 0.0  ;;  %vm2141_vm2 = vcmp.eq.s32.totalorder %v4469_v37, %v6148_v9 }
 0x1d6   : > { %v2601_v63 = vadd.f32 %v2345_v2, %v1813_v15  ;;  %v1877_v1 = vadd.f32 %v1621_v6, %v833_v57  ;;  %v2409_v35 = vsel %vm2141_vm2, %v6150_v47, 0.0  ;;  %vm2929_vm3 = vcmp.eq.s32.totalorder %v4469_v37, %v6155_v34 }
 0x1d7   : > { %3828 = vmatpush.msra.mxu3 %v3581_v33  ;;  %v3197_v25 = vsel %vm2929_vm3, %v6167_v13, 0.0  ;;  %vm619_vm4 = vcmp.eq.s32.totalorder %v4472_v38, %v6135_v8  ;;  %vm1409_vm5 = vcmp.eq.s32.totalorder %v4472_v38, %v6140_v44  ;;  %vm2197_vm6 = vcmp.eq.s32.totalorder %v4472_v38, %v6148_v9 }
 0x1d8   : > { %v3389_v14 = vadd.f32 %v3133_v61, %v2601_v63  ;;  %v2665_v31 = vadd.f32 %v2409_v35, %v1877_v1  ;;  %v889_v24 = vsel %vm619_vm4, %v6138_v32, 0.0  ;;  %v1677_v40 = vsel %vm1409_vm5, %v6142_v42, 0.0 }
 0x1d9   : > { %v1933_v43 = vadd.f32 %v1677_v40, %v889_v24  ;;  %v2465_v0 = vsel %vm2197_vm6, %v6150_v47, 0.0  ;;  %vm2985_vm7 = vcmp.eq.s32.totalorder %v4472_v38, %v6155_v34  ;;  %vm687_vm8 = vcmp.eq.s32.totalorder %v4643_v56, %v6135_v8 }
 0x1da   : > { %3768 = vmatpush.msra.mxu0 %v3389_v14  ;;  %v3453_v39 = vadd.f32 %v3197_v25, %v2665_v31  ;;  %v3253_v5 = vsel %vm2985_vm7, %v6167_v13, 0.0  ;;  %v957_v41 = vsel %vm687_vm8, %v6138_v32, 0.0  ;;  %vm1477_vm9 = vcmp.eq.s32.totalorder %v4643_v56, %v6140_v44 }
 0x1db   : > { %v2721_v3 = vadd.f32 %v2465_v0, %v1933_v43  ;;  %v1745_v26 = vsel %vm1477_vm9, %v6142_v42, 0.0  ;;  %vm2265_vm10 = vcmp.eq.s32.totalorder %v4643_v56, %v6148_v9  ;;  %vm3053_vm11 = vcmp.eq.s32.totalorder %v4643_v56, %v6155_v34 }
 0x1dc   : > { %3788 = vmatpush.msra.mxu1 %v3453_v39  ;;  %v2001_v4 = vadd.f32 %v1745_v26, %v957_v41  ;;  %v2533_v12 = vsel %vm2265_vm10, %v6150_v47, 0.0  ;;  %v3321_v11 = vsel %vm3053_vm11, %v6167_v13, 0.0  ;;  %vm495_vm12 = vcmp.eq.s32.totalorder %v4646_v58, %v6135_v8 }
 0x1dd   : > { %v3509_v2 = vadd.f32 %v3253_v5, %v2721_v3  ;;  %v765_v15 = vsel %vm495_vm12, %v6138_v32, 0.0  ;;  %vm1285_vm13 = vcmp.eq.s32.totalorder %v4646_v58, %v6140_v44  ;;  %vm2073_vm14 = vcmp.eq.s32.totalorder %v4646_v58, %v6148_v9 }
 0x1de   : > { %v2789_v61 = vadd.f32 %v2533_v12, %v2001_v4  ;;  %v1553_v33 = vsel %vm1285_vm13, %v6142_v42, 0.0  ;;  %v2341_v57 = vsel %vm2073_vm14, %v6150_v47, 0.0  ;;  %vm2861_vm15 = vcmp.eq.s32.totalorder %v4646_v58, %v6155_v34 }
 0x1df   : > { %3810 = vmatpush.msra.mxu2 %v3509_v2  ;;  %v1809_v6 = vadd.f32 %v1553_v33, %v765_v15  ;;  %v3129_v63 = vsel %vm2861_vm15, %v6167_v13, 0.0  ;;  %vm559_vm0 = vcmp.eq.s32.totalorder %v4649_v59, %v6135_v8  ;;  %vm1349_vm1 = vcmp.eq.s32.totalorder %v4649_v59, %v6140_v44 }
 0x1e0   : > { %v3577_v1 = vadd.f32 %v3321_v11, %v2789_v61  ;;  %v829_v35 = vsel %vm559_vm0, %v6138_v32, 0.0  ;;  %v1617_v25 = vsel %vm1349_vm1, %v6142_v42, 0.0  ;;  %vm2137_vm2 = vcmp.eq.s32.totalorder %v4649_v59, %v6148_v9 }
 0x1e1   : > { %v2597_v14 = vadd.f32 %v2341_v57, %v1809_v6  ;;  %v1873_v31 = vadd.f32 %v1617_v25, %v829_v35  ;;  %v2405_v24 = vsel %vm2137_vm2, %v6150_v47, 0.0  ;;  %vm2925_vm3 = vcmp.eq.s32.totalorder %v4649_v59, %v6155_v34 }
 0x1e2   : > { %3829 = vmatpush.msra.mxu3 %v3577_v1  ;;  %v3193_v40 = vsel %vm2925_vm3, %v6167_v13, 0.0  ;;  %vm615_vm4 = vcmp.eq.s32.totalorder %v4652_v60, %v6135_v8  ;;  %vm1405_vm5 = vcmp.eq.s32.totalorder %v4652_v60, %v6140_v44  ;;  %vm2193_vm6 = vcmp.eq.s32.totalorder %v4652_v60, %v6148_v9 }
 0x1e3   : > { %v3385_v43 = vadd.f32 %v3129_v63, %v2597_v14  ;;  %v2661_v0 = vadd.f32 %v2405_v24, %v1873_v31  ;;  %v885_v39 = vsel %vm615_vm4, %v6138_v32, 0.0  ;;  %v1673_v5 = vsel %vm1405_vm5, %v6142_v42, 0.0 }
 0x1e4   : > { %v1929_v41 = vadd.f32 %v1673_v5, %v885_v39  ;;  %v2461_v3 = vsel %vm2193_vm6, %v6150_v47, 0.0  ;;  %vm2981_vm7 = vcmp.eq.s32.totalorder %v4652_v60, %v6155_v34  ;;  %vm683_vm8 = vcmp.eq.s32.totalorder %v4702_v48, %v6135_v8 }
 0x1e5   : > { %3769 = vmatpush.msra.mxu0 %v3385_v43  ;;  %v3449_v26 = vadd.f32 %v3193_v40, %v2661_v0  ;;  %v3249_v4 = vsel %vm2981_vm7, %v6167_v13, 0.0  ;;  %v953_v12 = vsel %vm683_vm8, %v6138_v32, 0.0  ;;  %vm1473_vm9 = vcmp.eq.s32.totalorder %v4702_v48, %v6140_v44 }
 0x1e6   : > { %v2717_v11 = vadd.f32 %v2461_v3, %v1929_v41  ;;  %v1741_v2 = vsel %vm1473_vm9, %v6142_v42, 0.0  ;;  %vm2261_vm10 = vcmp.eq.s32.totalorder %v4702_v48, %v6148_v9  ;;  %vm3049_vm11 = vcmp.eq.s32.totalorder %v4702_v48, %v6155_v34 }
 0x1e7   : > { %3789 = vmatpush.msra.mxu1 %v3449_v26  ;;  %v1997_v15 = vadd.f32 %v1741_v2, %v953_v12  ;;  %v2529_v61 = vsel %vm2261_vm10, %v6150_v47, 0.0  ;;  %v3317_v33 = vsel %vm3049_vm11, %v6167_v13, 0.0  ;;  %vm491_vm12 = vcmp.eq.s32.totalorder %v4705_v49, %v6135_v8 }
 0x1e8   : > { %v3505_v57 = vadd.f32 %v3249_v4, %v2717_v11  ;;  %v761_v6 = vsel %vm491_vm12, %v6138_v32, 0.0  ;;  %vm1281_vm13 = vcmp.eq.s32.totalorder %v4705_v49, %v6140_v44  ;;  %vm2069_vm14 = vcmp.eq.s32.totalorder %v4705_v49, %v6148_v9 }
 0x1e9   : > { %v2785_v63 = vadd.f32 %v2529_v61, %v1997_v15  ;;  %v1549_v1 = vsel %vm1281_vm13, %v6142_v42, 0.0  ;;  %v2337_v35 = vsel %vm2069_vm14, %v6150_v47, 0.0  ;;  %vm2857_vm15 = vcmp.eq.s32.totalorder %v4705_v49, %v6155_v34 }
 0x1ea   : > { %3811 = vmatpush.msra.mxu2 %v3505_v57  ;;  %v1805_v25 = vadd.f32 %v1549_v1, %v761_v6  ;;  %v3125_v14 = vsel %vm2857_vm15, %v6167_v13, 0.0  ;;  %vm555_vm0 = vcmp.eq.s32.totalorder %v4709_v52, %v6135_v8  ;;  %vm1345_vm1 = vcmp.eq.s32.totalorder %v4709_v52, %v6140_v44 }
 0x1eb   : > { %v3573_v31 = vadd.f32 %v3317_v33, %v2785_v63  ;;  %v825_v24 = vsel %vm555_vm0, %v6138_v32, 0.0  ;;  %v1613_v40 = vsel %vm1345_vm1, %v6142_v42, 0.0  ;;  %vm2133_vm2 = vcmp.eq.s32.totalorder %v4709_v52, %v6148_v9 }
 0x1ec   : > { %v2593_v43 = vadd.f32 %v2337_v35, %v1805_v25  ;;  %v1869_v0 = vadd.f32 %v1613_v40, %v825_v24  ;;  %v2401_v39 = vsel %vm2133_vm2, %v6150_v47, 0.0  ;;  %vm2921_vm3 = vcmp.eq.s32.totalorder %v4709_v52, %v6155_v34 }
 0x1ed   : > { %3830 = vmatpush.msra.mxu3 %v3573_v31  ;;  %v3189_v5 = vsel %vm2921_vm3, %v6167_v13, 0.0  ;;  %vm611_vm4 = vcmp.eq.s32.totalorder %v4712_v53, %v6135_v8  ;;  %vm1401_vm5 = vcmp.eq.s32.totalorder %v4712_v53, %v6140_v44  ;;  %vm2189_vm6 = vcmp.eq.s32.totalorder %v4712_v53, %v6148_v9 }
 0x1ee   : > { %v3381_v41 = vadd.f32 %v3125_v14, %v2593_v43  ;;  %v2657_v3 = vadd.f32 %v2401_v39, %v1869_v0  ;;  %v881_v26 = vsel %vm611_vm4, %v6138_v32, 0.0  ;;  %v1669_v4 = vsel %vm1401_vm5, %v6142_v42, 0.0 }
 0x1ef   : > { %v1925_v12 = vadd.f32 %v1669_v4, %v881_v26  ;;  %v2457_v11 = vsel %vm2189_vm6, %v6150_v47, 0.0  ;;  %vm2977_vm7 = vcmp.eq.s32.totalorder %v4712_v53, %v6155_v34  ;;  %vm679_vm8 = vcmp.eq.s32.totalorder %v4762_v45, %v6135_v8 }
 0x1f0   : > { %3770 = vmatpush.msra.mxu0 %v3381_v41  ;;  %v3445_v2 = vadd.f32 %v3189_v5, %v2657_v3  ;;  %v3245_v15 = vsel %vm2977_vm7, %v6167_v13, 0.0  ;;  %v949_v61 = vsel %vm679_vm8, %v6138_v32, 0.0  ;;  %vm1469_vm9 = vcmp.eq.s32.totalorder %v4762_v45, %v6140_v44 }
 0x1f1   : > { %v2713_v33 = vadd.f32 %v2457_v11, %v1925_v12  ;;  %v1737_v57 = vsel %vm1469_vm9, %v6142_v42, 0.0  ;;  %vm2257_vm10 = vcmp.eq.s32.totalorder %v4762_v45, %v6148_v9  ;;  %vm3045_vm11 = vcmp.eq.s32.totalorder %v4762_v45, %v6155_v34 }
 0x1f2   : > { %3790 = vmatpush.msra.mxu1 %v3445_v2  ;;  %v1993_v6 = vadd.f32 %v1737_v57, %v949_v61  ;;  %v2525_v63 = vsel %vm2257_vm10, %v6150_v47, 0.0  ;;  %v3313_v1 = vsel %vm3045_vm11, %v6167_v13, 0.0  ;;  %vm487_vm12 = vcmp.eq.s32.totalorder %v4765_v46, %v6135_v8 }
 0x1f3   : > { %v3501_v35 = vadd.f32 %v3245_v15, %v2713_v33  ;;  %v757_v25 = vsel %vm487_vm12, %v6138_v32, 0.0  ;;  %vm1277_vm13 = vcmp.eq.s32.totalorder %v4765_v46, %v6140_v44  ;;  %vm2065_vm14 = vcmp.eq.s32.totalorder %v4765_v46, %v6148_v9 }
 0x1f4   : > { %v2781_v14 = vadd.f32 %v2525_v63, %v1993_v6  ;;  %v1545_v31 = vsel %vm1277_vm13, %v6142_v42, 0.0  ;;  %v2333_v24 = vsel %vm2065_vm14, %v6150_v47, 0.0  ;;  %vm2853_vm15 = vcmp.eq.s32.totalorder %v4765_v46, %v6155_v34 }
 0x1f5   : > { %3812 = vmatpush.msra.mxu2 %v3501_v35  ;;  %v1801_v40 = vadd.f32 %v1545_v31, %v757_v25  ;;  %v3121_v43 = vsel %vm2853_vm15, %v6167_v13, 0.0  ;;  %vm551_vm0 = vcmp.eq.s32.totalorder %v4769_v51, %v6135_v8  ;;  %vm1341_vm1 = vcmp.eq.s32.totalorder %v4769_v51, %v6140_v44 }
 0x1f6   : > { %v3569_v0 = vadd.f32 %v3313_v1, %v2781_v14  ;;  %v821_v39 = vsel %vm551_vm0, %v6138_v32, 0.0  ;;  %v1609_v5 = vsel %vm1341_vm1, %v6142_v42, 0.0  ;;  %vm2129_vm2 = vcmp.eq.s32.totalorder %v4769_v51, %v6148_v9 }
 0x1f7   : > { %v2589_v41 = vadd.f32 %v2333_v24, %v1801_v40  ;;  %v1865_v3 = vadd.f32 %v1609_v5, %v821_v39  ;;  %v2397_v26 = vsel %vm2129_vm2, %v6150_v47, 0.0  ;;  %vm2917_vm3 = vcmp.eq.s32.totalorder %v4769_v51, %v6155_v34 }
 0x1f8   : > { %3831 = vmatpush.msra.mxu3 %v3569_v0  ;;  %v3185_v4 = vsel %vm2917_vm3, %v6167_v13, 0.0  ;;  %vm607_vm4 = vcmp.eq.s32.totalorder %v4772_v54, %v6135_v8  ;;  %vm1397_vm5 = vcmp.eq.s32.totalorder %v4772_v54, %v6140_v44  ;;  %vm2185_vm6 = vcmp.eq.s32.totalorder %v4772_v54, %v6148_v9 }
 0x1f9   : > { %v3377_v12 = vadd.f32 %v3121_v43, %v2589_v41  ;;  %v2653_v11 = vadd.f32 %v2397_v26, %v1865_v3  ;;  %v877_v2 = vsel %vm607_vm4, %v6138_v32, 0.0  ;;  %v1665_v15 = vsel %vm1397_vm5, %v6142_v42, 0.0 }
 0x1fa   : > { %v1921_v61 = vadd.f32 %v1665_v15, %v877_v2  ;;  %v2453_v33 = vsel %vm2185_vm6, %v6150_v47, 0.0  ;;  %vm2973_vm7 = vcmp.eq.s32.totalorder %v4772_v54, %v6155_v34  ;;  %vm675_vm8 = vcmp.eq.s32.totalorder %v4822_v50, %v6135_v8 }
 0x1fb   : > { %3771 = vmatpush.msra.mxu0 %v3377_v12  ;;  %v3441_v57 = vadd.f32 %v3185_v4, %v2653_v11  ;;  %v3241_v6 = vsel %vm2973_vm7, %v6167_v13, 0.0  ;;  %v945_v63 = vsel %vm675_vm8, %v6138_v32, 0.0  ;;  %vm1465_vm9 = vcmp.eq.s32.totalorder %v4822_v50, %v6140_v44 }
 0x1fc   : > { %v2709_v1 = vadd.f32 %v2453_v33, %v1921_v61  ;;  %v1733_v35 = vsel %vm1465_vm9, %v6142_v42, 0.0  ;;  %vm2253_vm10 = vcmp.eq.s32.totalorder %v4822_v50, %v6148_v9  ;;  %vm3041_vm11 = vcmp.eq.s32.totalorder %v4822_v50, %v6155_v34  ;;  %v7997_v61 = vld [vmem:[#allocation11_spill] sm:$0xff] }
 0x1fd   : > { %3791 = vmatpush.msra.mxu1 %v3441_v57  ;;  %v1989_v25 = vadd.f32 %v1733_v35, %v945_v63  ;;  %v2521_v14 = vsel %vm2253_vm10, %v6150_v47, 0.0  ;;  %v3309_v31 = vsel %vm3041_vm11, %v6167_v13, 0.0  ;;  %vm483_vm12 = vcmp.eq.s32.totalorder %v4825_v55, %v6135_v8 }
 0x1fe   : > { %v3497_v24 = vadd.f32 %v3241_v6, %v2709_v1  ;;  %v753_v40 = vsel %vm483_vm12, %v6138_v32, 0.0  ;;  %vm1273_vm13 = vcmp.eq.s32.totalorder %v4825_v55, %v6140_v44  ;;  %vm2061_vm14 = vcmp.eq.s32.totalorder %v4825_v55, %v6148_v9 }
 0x1ff   : > { %v2777_v43 = vadd.f32 %v2521_v14, %v1989_v25  ;;  %v1541_v0 = vsel %vm1273_vm13, %v6142_v42, 0.0  ;;  %v2329_v39 = vsel %vm2061_vm14, %v6150_v47, 0.0  ;;  %vm2849_vm15 = vcmp.eq.s32.totalorder %v4825_v55, %v6155_v34  ;;  %v7998_v25 = vld [vmem:[#allocation12_spill] sm:$0xff] }
 0x200   : > { %3813 = vmatpush.msra.mxu2 %v3497_v24  ;;  %v1797_v5 = vadd.f32 %v1541_v0, %v753_v40  ;;  %v3117_v41 = vsel %vm2849_vm15, %v6167_v13, 0.0  ;;  %vm547_vm0 = vcmp.eq.s32.totalorder %v4829_v62, %v6135_v8  ;;  %vm1337_vm1 = vcmp.eq.s32.totalorder %v4829_v62, %v6140_v44 }
 0x201   : > { %v3565_v3 = vadd.f32 %v3309_v31, %v2777_v43  ;;  %v817_v26 = vsel %vm547_vm0, %v6138_v32, 0.0  ;;  %v1605_v4 = vsel %vm1337_vm1, %v6142_v42, 0.0  ;;  %vm2125_vm2 = vcmp.eq.s32.totalorder %v4829_v62, %v6148_v9 }
 0x202   : > { %v2585_v12 = vadd.f32 %v2329_v39, %v1797_v5  ;;  %v1861_v11 = vadd.f32 %v1605_v4, %v817_v26  ;;  %v2393_v2 = vsel %vm2125_vm2, %v6150_v47, 0.0  ;;  %vm2913_vm3 = vcmp.eq.s32.totalorder %v4829_v62, %v6155_v34 }
 0x203   : > { %3832 = vmatpush.msra.mxu3 %v3565_v3  ;;  %v3181_v15 = vsel %vm2913_vm3, %v6167_v13, 0.0  ;;  %vm603_vm4 = vcmp.eq.s32.totalorder %v7997_v61, %v6135_v8  ;;  %vm1393_vm5 = vcmp.eq.s32.totalorder %v7997_v61, %v6140_v44  ;;  %vm2181_vm6 = vcmp.eq.s32.totalorder %v7997_v61, %v6148_v9 }
 0x204   : > { %v3373_v33 = vadd.f32 %v3117_v41, %v2585_v12  ;;  %v2649_v57 = vadd.f32 %v2393_v2, %v1861_v11  ;;  %v873_v6 = vsel %vm603_vm4, %v6138_v32, 0.0  ;;  %v1661_v63 = vsel %vm1393_vm5, %v6142_v42, 0.0  ;;  %v7999_v41 = vld [vmem:[#allocation13_spill] sm:$0xff] }
 0x205   : > { %v1917_v1 = vadd.f32 %v1661_v63, %v873_v6  ;;  %v2449_v35 = vsel %vm2181_vm6, %v6150_v47, 0.0  ;;  %vm2969_vm7 = vcmp.eq.s32.totalorder %v7997_v61, %v6155_v34  ;;  %vm671_vm8 = vcmp.eq.s32.totalorder %v7998_v25, %v6135_v8 }
 0x206   : > { %3772 = vmatpush.msra.mxu0 %v3373_v33  ;;  %v3437_v14 = vadd.f32 %v3181_v15, %v2649_v57  ;;  %v3237_v31 = vsel %vm2969_vm7, %v6167_v13, 0.0  ;;  %v941_v24 = vsel %vm671_vm8, %v6138_v32, 0.0  ;;  %vm1461_vm9 = vcmp.eq.s32.totalorder %v7998_v25, %v6140_v44  ;;  %v8000_v33 = vld [vmem:[#allocation14_spill] sm:$0xff] }
 0x207   : > { %v2705_v40 = vadd.f32 %v2449_v35, %v1917_v1  ;;  %v1729_v43 = vsel %vm1461_vm9, %v6142_v42, 0.0  ;;  %vm2249_vm10 = vcmp.eq.s32.totalorder %v7998_v25, %v6148_v9  ;;  %vm3037_vm11 = vcmp.eq.s32.totalorder %v7998_v25, %v6155_v34 }
 0x208   : > { %3792 = vmatpush.msra.mxu1 %v3437_v14  ;;  %v1985_v0 = vadd.f32 %v1729_v43, %v941_v24  ;;  %v2517_v39 = vsel %vm2249_vm10, %v6150_v47, 0.0  ;;  %v3305_v5 = vsel %vm3037_vm11, %v6167_v13, 0.0  ;;  %vm479_vm12 = vcmp.eq.s32.totalorder %v7999_v41, %v6135_v8  ;;  %v8001_v24 = vld [vmem:[#allocation15_spill] sm:$0xff] }
 0x209   : > { %v3493_v3 = vadd.f32 %v3237_v31, %v2705_v40  ;;  %v749_v26 = vsel %vm479_vm12, %v6138_v32, 0.0  ;;  %vm1269_vm13 = vcmp.eq.s32.totalorder %v7999_v41, %v6140_v44  ;;  %vm2057_vm14 = vcmp.eq.s32.totalorder %v7999_v41, %v6148_v9 }
 0x20a   : > { %v2773_v4 = vadd.f32 %v2517_v39, %v1985_v0  ;;  %v1537_v12 = vsel %vm1269_vm13, %v6142_v42, 0.0  ;;  %v2325_v11 = vsel %vm2057_vm14, %v6150_v47, 0.0  ;;  %vm2845_vm15 = vcmp.eq.s32.totalorder %v7999_v41, %v6155_v34 }
 0x20b   : > { %3814 = vmatpush.msra.mxu2 %v3493_v3  ;;  %v1793_v2 = vadd.f32 %v1537_v12, %v749_v26  ;;  %v3113_v15 = vsel %vm2845_vm15, %v6167_v13, 0.0  ;;  %vm543_vm0 = vcmp.eq.s32.totalorder %v8000_v33, %v6135_v8  ;;  %vm1333_vm1 = vcmp.eq.s32.totalorder %v8000_v33, %v6140_v44  ;;  %v8002_v26 = vld [vmem:[#allocation16_spill] sm:$0xff] }
 0x20c   : > { %v3561_v57 = vadd.f32 %v3305_v5, %v2773_v4  ;;  %v813_v6 = vsel %vm543_vm0, %v6138_v32, 0.0  ;;  %v1601_v63 = vsel %vm1333_vm1, %v6142_v42, 0.0  ;;  %vm2121_vm2 = vcmp.eq.s32.totalorder %v8000_v33, %v6148_v9 }
 0x20d   : > { %v2581_v1 = vadd.f32 %v2325_v11, %v1793_v2  ;;  %v1857_v35 = vadd.f32 %v1601_v63, %v813_v6  ;;  %v2389_v14 = vsel %vm2121_vm2, %v6150_v47, 0.0  ;;  %vm2909_vm3 = vcmp.eq.s32.totalorder %v8000_v33, %v6155_v34 }
 0x20e   : > { %3833 = vmatpush.msra.mxu3 %v3561_v57  ;;  %v3177_v31 = vsel %vm2909_vm3, %v6167_v13, 0.0  ;;  %vm599_vm4 = vcmp.eq.s32.totalorder %v8001_v24, %v6135_v8  ;;  %vm1389_vm5 = vcmp.eq.s32.totalorder %v8001_v24, %v6140_v44  ;;  %vm2177_vm6 = vcmp.eq.s32.totalorder %v8001_v24, %v6148_v9 }
 0x20f   : > { %v3369_v40 = vadd.f32 %v3113_v15, %v2581_v1  ;;  %v2645_v43 = vadd.f32 %v2389_v14, %v1857_v35  ;;  %v869_v0 = vsel %vm599_vm4, %v6138_v32, 0.0  ;;  %v1657_v39 = vsel %vm1389_vm5, %v6142_v42, 0.0  ;;  %v8003_v1 = vld [vmem:[#allocation17_spill] sm:$0xff] }
 0x210   : > { %v1913_v5 = vadd.f32 %v1657_v39, %v869_v0  ;;  %v2445_v3 = vsel %vm2177_vm6, %v6150_v47, 0.0  ;;  %vm2965_vm7 = vcmp.eq.s32.totalorder %v8001_v24, %v6155_v34  ;;  %vm667_vm8 = vcmp.eq.s32.totalorder %v8002_v26, %v6135_v8  ;;  %v8028_v24 = vld [vmem:[#allocation9_spill] sm:$0xff] }
 0x211   : > { %3773 = vmatpush.msra.mxu0 %v3369_v40  ;;  %v3433_v4 = vadd.f32 %v3177_v31, %v2645_v43  ;;  %v3233_v12 = vsel %vm2965_vm7, %v6167_v13, 0.0  ;;  %v937_v11 = vsel %vm667_vm8, %v6138_v32, 0.0  ;;  %vm1457_vm9 = vcmp.eq.s32.totalorder %v8002_v26, %v6140_v44 }
 0x212   : > { %v2701_v2 = vadd.f32 %v2445_v3, %v1913_v5  ;;  %v1725_v15 = vsel %vm1457_vm9, %v6142_v42, 0.0  ;;  %vm2245_vm10 = vcmp.eq.s32.totalorder %v8002_v26, %v6148_v9  ;;  %vm3033_vm11 = vcmp.eq.s32.totalorder %v8002_v26, %v6155_v34  ;;  %v8004_v5 = vld [vmem:[#allocation18_spill] sm:$0xff] }
 0x213   : > { %3793 = vmatpush.msra.mxu1 %v3433_v4  ;;  %v1981_v57 = vadd.f32 %v1725_v15, %v937_v11  ;;  %v2513_v6 = vsel %vm2245_vm10, %v6150_v47, 0.0  ;;  %v3301_v63 = vsel %vm3033_vm11, %v6167_v13, 0.0  ;;  %vm475_vm12 = vcmp.eq.s32.totalorder %v8003_v1, %v6135_v8 }
 0x214   : > { %v3489_v35 = vadd.f32 %v3233_v12, %v2701_v2  ;;  %v745_v14 = vsel %vm475_vm12, %v6138_v32, 0.0  ;;  %vm1265_vm13 = vcmp.eq.s32.totalorder %v8003_v1, %v6140_v44  ;;  %vm2053_vm14 = vcmp.eq.s32.totalorder %v8003_v1, %v6148_v9 }
 0x215   : > { %v2769_v31 = vadd.f32 %v2513_v6, %v1981_v57  ;;  %v1533_v40 = vsel %vm1265_vm13, %v6142_v42, 0.0  ;;  %v2321_v43 = vsel %vm2053_vm14, %v6150_v47, 0.0  ;;  %vm2841_vm15 = vcmp.eq.s32.totalorder %v8003_v1, %v6155_v34  ;;  %v8005_v6 = vld [vmem:[#allocation19_spill] sm:$0xff] }
 0x216   : > { %3815 = vmatpush.msra.mxu2 %v3489_v35  ;;  %v1789_v0 = vadd.f32 %v1533_v40, %v745_v14  ;;  %v3109_v39 = vsel %vm2841_vm15, %v6167_v13, 0.0  ;;  %vm539_vm0 = vcmp.eq.s32.totalorder %v8004_v5, %v6135_v8  ;;  %vm1329_vm1 = vcmp.eq.s32.totalorder %v8004_v5, %v6140_v44 }
 0x217   : > { %v3557_v3 = vadd.f32 %v3301_v63, %v2769_v31  ;;  %v809_v4 = vsel %vm539_vm0, %v6138_v32, 0.0  ;;  %v1597_v12 = vsel %vm1329_vm1, %v6142_v42, 0.0  ;;  %vm2117_vm2 = vcmp.eq.s32.totalorder %v8004_v5, %v6148_v9 }
 0x218   : > { %v2577_v11 = vadd.f32 %v2321_v43, %v1789_v0  ;;  %v1853_v2 = vadd.f32 %v1597_v12, %v809_v4  ;;  %v2385_v15 = vsel %vm2117_vm2, %v6150_v47, 0.0  ;;  %vm2905_vm3 = vcmp.eq.s32.totalorder %v8004_v5, %v6155_v34  ;;  %v8006_v0 = vld [vmem:[#allocation20_spill] sm:$0xff] }
 0x219   : > { %3834 = vmatpush.msra.mxu3 %v3557_v3  ;;  %v3173_v57 = vsel %vm2905_vm3, %v6167_v13, 0.0  ;;  %vm595_vm4 = vcmp.eq.s32.totalorder %v8005_v6, %v6135_v8  ;;  %vm1385_vm5 = vcmp.eq.s32.totalorder %v8005_v6, %v6140_v44  ;;  %vm2173_vm6 = vcmp.eq.s32.totalorder %v8005_v6, %v6148_v9 }
 0x21a   : > { %v3365_v63 = vadd.f32 %v3109_v39, %v2577_v11  ;;  %v2641_v35 = vadd.f32 %v2385_v15, %v1853_v2  ;;  %v865_v14 = vsel %vm595_vm4, %v6138_v32, 0.0  ;;  %v1653_v31 = vsel %vm1385_vm5, %v6142_v42, 0.0 }
 0x21b   : > { %v1909_v40 = vadd.f32 %v1653_v31, %v865_v14  ;;  %v2441_v43 = vsel %vm2173_vm6, %v6150_v47, 0.0  ;;  %vm2961_vm7 = vcmp.eq.s32.totalorder %v8005_v6, %v6155_v34  ;;  %vm663_vm8 = vcmp.eq.s32.totalorder %v8006_v0, %v6135_v8 }
 0x21c   : > { %3774 = vmatpush.msra.mxu0 %v3365_v63  ;;  %v3429_v3 = vadd.f32 %v3173_v57, %v2641_v35  ;;  %v3229_v4 = vsel %vm2961_vm7, %v6167_v13, 0.0  ;;  %v933_v39 = vsel %vm663_vm8, %v6138_v32, 0.0  ;;  %vm1453_vm9 = vcmp.eq.s32.totalorder %v8006_v0, %v6140_v44  ;;  %v8007_v63 = vld [vmem:[#allocation21_spill] sm:$0xff] }
 0x21d   : > { %v2697_v12 = vadd.f32 %v2441_v43, %v1909_v40  ;;  %v1721_v11 = vsel %vm1453_vm9, %v6142_v42, 0.0  ;;  %vm2241_vm10 = vcmp.eq.s32.totalorder %v8006_v0, %v6148_v9  ;;  %vm3029_vm11 = vcmp.eq.s32.totalorder %v8006_v0, %v6155_v34 }
 0x21e   : > { %3794 = vmatpush.msra.mxu1 %v3429_v3  ;;  %v1977_v2 = vadd.f32 %v1721_v11, %v933_v39  ;;  %v2509_v15 = vsel %vm2241_vm10, %v6150_v47, 0.0  ;;  %v3297_v57 = vsel %vm3029_vm11, %v6167_v13, 0.0  ;;  %vm471_vm12 = vcmp.eq.s32.totalorder %v8007_v63, %v6135_v8  ;;  %v8008_v39 = vld [vmem:[#allocation22_spill] sm:$0xff] }
 0x21f   : > { %v3485_v35 = vadd.f32 %v3229_v4, %v2697_v12  ;;  %v741_v14 = vsel %vm471_vm12, %v6138_v32, 0.0  ;;  %vm1261_vm13 = vcmp.eq.s32.totalorder %v8007_v63, %v6140_v44  ;;  %vm2049_vm14 = vcmp.eq.s32.totalorder %v8007_v63, %v6148_v9 }
 0x220   : > { %v2765_v31 = vadd.f32 %v2509_v15, %v1977_v2  ;;  %v1529_v40 = vsel %vm1261_vm13, %v6142_v42, 0.0  ;;  %v2317_v43 = vsel %vm2049_vm14, %v6150_v47, 0.0  ;;  %vm2837_vm15 = vcmp.eq.s32.totalorder %v8007_v63, %v6155_v34 }
 0x221   : > { %3816 = vmatpush.msra.mxu2 %v3485_v35  ;;  %v1785_v3 = vadd.f32 %v1529_v40, %v741_v14  ;;  %v3105_v4 = vsel %vm2837_vm15, %v6167_v13, 0.0  ;;  %vm535_vm0 = vcmp.eq.s32.totalorder %v8008_v39, %v6135_v8  ;;  %vm1325_vm1 = vcmp.eq.s32.totalorder %v8008_v39, %v6140_v44  ;;  %v8009_v40 = vld [vmem:[#allocation23_spill] sm:$0xff] }
 0x222   : > { %v3553_v12 = vadd.f32 %v3297_v57, %v2765_v31  ;;  %v805_v11 = vsel %vm535_vm0, %v6138_v32, 0.0  ;;  %v1593_v2 = vsel %vm1325_vm1, %v6142_v42, 0.0  ;;  %vm2113_vm2 = vcmp.eq.s32.totalorder %v8008_v39, %v6148_v9 }
 0x223   : > { %v2573_v15 = vadd.f32 %v2317_v43, %v1785_v3  ;;  %v1849_v63 = vadd.f32 %v1593_v2, %v805_v11  ;;  %v2381_v35 = vsel %vm2113_vm2, %v6150_v47, 0.0  ;;  %vm2901_vm3 = vcmp.eq.s32.totalorder %v8008_v39, %v6155_v34  ;;  %v8010_v2 = vld [vmem:[#allocation24_spill] sm:$0xff] }
 0x224   : > { %3835 = vmatpush.msra.mxu3 %v3553_v12  ;;  %v3169_v14 = vsel %vm2901_vm3, %v6167_v13, 0.0  ;;  %vm591_vm4 = vcmp.eq.s32.totalorder %v8009_v40, %v6135_v8  ;;  %vm1381_vm5 = vcmp.eq.s32.totalorder %v8009_v40, %v6140_v44  ;;  %vm2169_vm6 = vcmp.eq.s32.totalorder %v8009_v40, %v6148_v9 }
 0x225   : > { %v3361_v57 = vadd.f32 %v3105_v4, %v2573_v15  ;;  %v2637_v31 = vadd.f32 %v2381_v35, %v1849_v63  ;;  %v861_v43 = vsel %vm591_vm4, %v6138_v32, 0.0  ;;  %v1649_v3 = vsel %vm1381_vm5, %v6142_v42, 0.0 }
 0x226   : > { %v1905_v11 = vadd.f32 %v1649_v3, %v861_v43  ;;  %v2437_v12 = vsel %vm2169_vm6, %v6150_v47, 0.0  ;;  %vm2957_vm7 = vcmp.eq.s32.totalorder %v8009_v40, %v6155_v34  ;;  %vm659_vm8 = vcmp.eq.s32.totalorder %v8010_v2, %v6135_v8 }
 0x227   : > { %3775 = vmatpush.msra.mxu0 %v3361_v57  ;;  %v3425_v39 = vadd.f32 %v3169_v14, %v2637_v31  ;;  %v3225_v0 = vsel %vm2957_vm7, %v6167_v13, 0.0  ;;  %v929_v4 = vsel %vm659_vm8, %v6138_v32, 0.0  ;;  %vm1449_vm9 = vcmp.eq.s32.totalorder %v8010_v2, %v6140_v44  ;;  %v8011_v31 = vld [vmem:[#allocation25_spill] sm:$0xff] }
 0x228   : > { %v2693_v63 = vadd.f32 %v2437_v12, %v1905_v11  ;;  %v1717_v15 = vsel %vm1449_vm9, %v6142_v42, 0.0  ;;  %vm2237_vm10 = vcmp.eq.s32.totalorder %v8010_v2, %v6148_v9  ;;  %vm3025_vm11 = vcmp.eq.s32.totalorder %v8010_v2, %v6155_v34 }
 0x229   : > { %3795 = vmatpush.msra.mxu1 %v3425_v39  ;;  %v1973_v35 = vadd.f32 %v1717_v15, %v929_v4  ;;  %v2505_v14 = vsel %vm2237_vm10, %v6150_v47, 0.0  ;;  %v3293_v57 = vsel %vm3025_vm11, %v6167_v13, 0.0  ;;  %vm467_vm12 = vcmp.eq.s32.totalorder %v8011_v31, %v6135_v8 }
 0x22a   : > { %v3481_v43 = vadd.f32 %v3225_v0, %v2693_v63  ;;  %v737_v3 = vsel %vm467_vm12, %v6138_v32, 0.0  ;;  %vm1257_vm13 = vcmp.eq.s32.totalorder %v8011_v31, %v6140_v44  ;;  %vm2045_vm14 = vcmp.eq.s32.totalorder %v8011_v31, %v6148_v9  ;;  %v8012_v63 = vld [vmem:[#allocation26_spill] sm:$0xff] }
 0x22b   : > { %v2761_v11 = vadd.f32 %v2505_v14, %v1973_v35  ;;  %v1525_v39 = vsel %vm1257_vm13, %v6142_v42, 0.0  ;;  %v2313_v12 = vsel %vm2045_vm14, %v6150_v47, 0.0  ;;  %vm2833_vm15 = vcmp.eq.s32.totalorder %v8011_v31, %v6155_v34 }
 0x22c   : > { %3817 = vmatpush.msra.mxu2 %v3481_v43  ;;  %v1781_v4 = vadd.f32 %v1525_v39, %v737_v3  ;;  %v3101_v0 = vsel %vm2833_vm15, %v6167_v13, 0.0  ;;  %vm531_vm0 = vcmp.eq.s32.totalorder %v8012_v63, %v6135_v8  ;;  %vm1321_vm1 = vcmp.eq.s32.totalorder %v8012_v63, %v6140_v44  ;;  %v8013_v39 = vld [vmem:[#allocation27_spill] sm:$0xff] }
 0x22d   : > { %v3549_v15 = vadd.f32 %v3293_v57, %v2761_v11  ;;  %v801_v35 = vsel %vm531_vm0, %v6138_v32, 0.0  ;;  %v1589_v14 = vsel %vm1321_vm1, %v6142_v42, 0.0  ;;  %vm2109_vm2 = vcmp.eq.s32.totalorder %v8012_v63, %v6148_v9 }
 0x22e   : > { %v2569_v2 = vadd.f32 %v2313_v12, %v1781_v4  ;;  %v1845_v31 = vadd.f32 %v1589_v14, %v801_v35  ;;  %v2377_v43 = vsel %vm2109_vm2, %v6150_v47, 0.0  ;;  %vm2897_vm3 = vcmp.eq.s32.totalorder %v8012_v63, %v6155_v34  ;;  %v8014_v14 = vld [vmem:[#allocation28_spill] sm:$0xff] }
 0x22f   : > { %3836 = vmatpush.msra.mxu3 %v3549_v15  ;;  %v3165_v3 = vsel %vm2897_vm3, %v6167_v13, 0.0  ;;  %vm587_vm4 = vcmp.eq.s32.totalorder %v8013_v39, %v6135_v8  ;;  %vm1377_vm5 = vcmp.eq.s32.totalorder %v8013_v39, %v6140_v44  ;;  %vm2165_vm6 = vcmp.eq.s32.totalorder %v8013_v39, %v6148_v9 }
 0x230   : > { %v3357_v57 = vadd.f32 %v3101_v0, %v2569_v2  ;;  %v2633_v11 = vadd.f32 %v2377_v43, %v1845_v31  ;;  %v857_v12 = vsel %vm587_vm4, %v6138_v32, 0.0  ;;  %v1645_v4 = vsel %vm1377_vm5, %v6142_v42, 0.0 }
 0x231   : > { %v1901_v35 = vadd.f32 %v1645_v4, %v857_v12  ;;  %v2433_v15 = vsel %vm2165_vm6, %v6150_v47, 0.0  ;;  %vm2953_vm7 = vcmp.eq.s32.totalorder %v8013_v39, %v6155_v34  ;;  %vm655_vm8 = vcmp.eq.s32.totalorder %v8014_v14, %v6135_v8 }
 0x232   : > { %3776 = vmatpush.msra.mxu0 %v3357_v57  ;;  %v3421_v63 = vadd.f32 %v3165_v3, %v2633_v11  ;;  %v3221_v40 = vsel %vm2953_vm7, %v6167_v13, 0.0  ;;  %v925_v2 = vsel %vm655_vm8, %v6138_v32, 0.0  ;;  %vm1445_vm9 = vcmp.eq.s32.totalorder %v8014_v14, %v6140_v44  ;;  %v8015_v11 = vld [vmem:[#allocation29_spill] sm:$0xff] }
 0x233   : > { %v2689_v31 = vadd.f32 %v2433_v15, %v1901_v35  ;;  %v1713_v0 = vsel %vm1445_vm9, %v6142_v42, 0.0  ;;  %vm2233_vm10 = vcmp.eq.s32.totalorder %v8014_v14, %v6148_v9  ;;  %vm3021_vm11 = vcmp.eq.s32.totalorder %v8014_v14, %v6155_v34 }
 0x234   : > { %3796 = vmatpush.msra.mxu1 %v3421_v63  ;;  %v1969_v43 = vadd.f32 %v1713_v0, %v925_v2  ;;  %v2501_v3 = vsel %vm2233_vm10, %v6150_v47, 0.0  ;;  %v3289_v57 = vsel %vm3021_vm11, %v6167_v13, 0.0  ;;  %vm463_vm12 = vcmp.eq.s32.totalorder %v8015_v11, %v6135_v8 }
 0x235   : > { %v3477_v12 = vadd.f32 %v3221_v40, %v2689_v31  ;;  %v733_v4 = vsel %vm463_vm12, %v6138_v32, 0.0  ;;  %vm1253_vm13 = vcmp.eq.s32.totalorder %v8015_v11, %v6140_v44  ;;  %vm2041_vm14 = vcmp.eq.s32.totalorder %v8015_v11, %v6148_v9  ;;  %v8016_v31 = vld [vmem:[#allocation30_spill] sm:$0xff] }
 0x236   : > { %v2757_v35 = vadd.f32 %v2501_v3, %v1969_v43  ;;  %v1521_v63 = vsel %vm1253_vm13, %v6142_v42, 0.0  ;;  %v2309_v15 = vsel %vm2041_vm14, %v6150_v47, 0.0  ;;  %vm2829_vm15 = vcmp.eq.s32.totalorder %v8015_v11, %v6155_v34 }
 0x237   : > { %3818 = vmatpush.msra.mxu2 %v3477_v12  ;;  %v1777_v2 = vadd.f32 %v1521_v63, %v733_v4  ;;  %v3097_v40 = vsel %vm2829_vm15, %v6167_v13, 0.0  ;;  %vm527_vm0 = vcmp.eq.s32.totalorder %v8016_v31, %v6135_v8  ;;  %vm1317_vm1 = vcmp.eq.s32.totalorder %v8016_v31, %v6140_v44  ;;  %v8017_v63 = vld [vmem:[#allocation31_spill] sm:$0xff] }
 0x238   : > { %v3545_v0 = vadd.f32 %v3289_v57, %v2757_v35  ;;  %v797_v43 = vsel %vm527_vm0, %v6138_v32, 0.0  ;;  %v1585_v3 = vsel %vm1317_vm1, %v6142_v42, 0.0  ;;  %vm2105_vm2 = vcmp.eq.s32.totalorder %v8016_v31, %v6148_v9 }
 0x239   : > { %v2565_v14 = vadd.f32 %v2309_v15, %v1777_v2  ;;  %v1841_v11 = vadd.f32 %v1585_v3, %v797_v43  ;;  %v2373_v12 = vsel %vm2105_vm2, %v6150_v47, 0.0  ;;  %vm2893_vm3 = vcmp.eq.s32.totalorder %v8016_v31, %v6155_v34  ;;  %v8018_v3 = vld [vmem:[#allocation32_spill] sm:$0xff] }
 0x23a   : > { %3837 = vmatpush.msra.mxu3 %v3545_v0  ;;  %v3161_v4 = vsel %vm2893_vm3, %v6167_v13, 0.0  ;;  %vm583_vm4 = vcmp.eq.s32.totalorder %v8017_v63, %v6135_v8  ;;  %vm1373_vm5 = vcmp.eq.s32.totalorder %v8017_v63, %v6140_v44  ;;  %vm2161_vm6 = vcmp.eq.s32.totalorder %v8017_v63, %v6148_v9 }
 0x23b   : > { %v3353_v57 = vadd.f32 %v3097_v40, %v2565_v14  ;;  %v2629_v35 = vadd.f32 %v2373_v12, %v1841_v11  ;;  %v853_v15 = vsel %vm583_vm4, %v6138_v32, 0.0  ;;  %v1641_v2 = vsel %vm1373_vm5, %v6142_v42, 0.0 }
 0x23c   : > { %v1897_v43 = vadd.f32 %v1641_v2, %v853_v15  ;;  %v2429_v0 = vsel %vm2161_vm6, %v6150_v47, 0.0  ;;  %vm2949_vm7 = vcmp.eq.s32.totalorder %v8017_v63, %v6155_v34  ;;  %vm651_vm8 = vcmp.eq.s32.totalorder %v8018_v3, %v6135_v8 }
 0x23d   : > { %3777 = vmatpush.msra.mxu0 %v3353_v57  ;;  %v3417_v31 = vadd.f32 %v3161_v4, %v2629_v35  ;;  %v3217_v39 = vsel %vm2949_vm7, %v6167_v13, 0.0  ;;  %v921_v14 = vsel %vm651_vm8, %v6138_v32, 0.0  ;;  %vm1441_vm9 = vcmp.eq.s32.totalorder %v8018_v3, %v6140_v44  ;;  %v8019_v35 = vld [vmem:[#allocation33_spill] sm:$0xff] }
 0x23e   : > { %v2685_v11 = vadd.f32 %v2429_v0, %v1897_v43  ;;  %v1709_v40 = vsel %vm1441_vm9, %v6142_v42, 0.0  ;;  %vm2229_vm10 = vcmp.eq.s32.totalorder %v8018_v3, %v6148_v9  ;;  %vm3017_vm11 = vcmp.eq.s32.totalorder %v8018_v3, %v6155_v34 }
 0x23f   : > { %3797 = vmatpush.msra.mxu1 %v3417_v31  ;;  %v1965_v12 = vadd.f32 %v1709_v40, %v921_v14  ;;  %v2497_v4 = vsel %vm2229_vm10, %v6150_v47, 0.0  ;;  %v3285_v57 = vsel %vm3017_vm11, %v6167_v13, 0.0  ;;  %vm459_vm12 = vcmp.eq.s32.totalorder %v8019_v35, %v6135_v8 }
 0x240   : > { %v3473_v15 = vadd.f32 %v3217_v39, %v2685_v11  ;;  %v729_v2 = vsel %vm459_vm12, %v6138_v32, 0.0  ;;  %vm1249_vm13 = vcmp.eq.s32.totalorder %v8019_v35, %v6140_v44  ;;  %vm2037_vm14 = vcmp.eq.s32.totalorder %v8019_v35, %v6148_v9  ;;  %v8020_v11 = vld [vmem:[#allocation34_spill] sm:$0xff] }
 0x241   : > { %v2753_v43 = vadd.f32 %v2497_v4, %v1965_v12  ;;  %v1517_v31 = vsel %vm1249_vm13, %v6142_v42, 0.0  ;;  %v2305_v0 = vsel %vm2037_vm14, %v6150_v47, 0.0  ;;  %vm2825_vm15 = vcmp.eq.s32.totalorder %v8019_v35, %v6155_v34 }
 0x242   : > { %3819 = vmatpush.msra.mxu2 %v3473_v15  ;;  %v1773_v14 = vadd.f32 %v1517_v31, %v729_v2  ;;  %v3093_v39 = vsel %vm2825_vm15, %v6167_v13, 0.0  ;;  %vm523_vm0 = vcmp.eq.s32.totalorder %v8020_v11, %v6135_v8  ;;  %vm1313_vm1 = vcmp.eq.s32.totalorder %v8020_v11, %v6140_v44  ;;  %v8021_v31 = vld [vmem:[#allocation35_spill] sm:$0xff] }
 0x243   : > { %v3541_v40 = vadd.f32 %v3285_v57, %v2753_v43  ;;  %v793_v12 = vsel %vm523_vm0, %v6138_v32, 0.0  ;;  %v1581_v4 = vsel %vm1313_vm1, %v6142_v42, 0.0  ;;  %vm2101_vm2 = vcmp.eq.s32.totalorder %v8020_v11, %v6148_v9 }
 0x244   : > { %v2561_v3 = vadd.f32 %v2305_v0, %v1773_v14  ;;  %v1837_v35 = vadd.f32 %v1581_v4, %v793_v12  ;;  %v2369_v15 = vsel %vm2101_vm2, %v6150_v47, 0.0  ;;  %vm2889_vm3 = vcmp.eq.s32.totalorder %v8020_v11, %v6155_v34  ;;  %v8022_v4 = vld [vmem:[#allocation36_spill] sm:$0xff] }
 0x245   : > { %3838 = vmatpush.msra.mxu3 %v3541_v40  ;;  %v3157_v2 = vsel %vm2889_vm3, %v6167_v13, 0.0  ;;  %vm579_vm4 = vcmp.eq.s32.totalorder %v8021_v31, %v6135_v8  ;;  %vm1369_vm5 = vcmp.eq.s32.totalorder %v8021_v31, %v6140_v44  ;;  %vm2157_vm6 = vcmp.eq.s32.totalorder %v8021_v31, %v6148_v9 }
 0x246   : > { %v3349_v57 = vadd.f32 %v3093_v39, %v2561_v3  ;;  %v2625_v43 = vadd.f32 %v2369_v15, %v1837_v35  ;;  %v849_v0 = vsel %vm579_vm4, %v6138_v32, 0.0  ;;  %v1637_v14 = vsel %vm1369_vm5, %v6142_v42, 0.0 }
 0x247   : > { %v1893_v12 = vadd.f32 %v1637_v14, %v849_v0  ;;  %v2425_v40 = vsel %vm2157_vm6, %v6150_v47, 0.0  ;;  %vm2945_vm7 = vcmp.eq.s32.totalorder %v8021_v31, %v6155_v34  ;;  %vm647_vm8 = vcmp.eq.s32.totalorder %v8022_v4, %v6135_v8 }
 0x248   : > { %3778 = vmatpush.msra.mxu0 %v3349_v57  ;;  %v3413_v11 = vadd.f32 %v3157_v2, %v2625_v43  ;;  %v3213_v63 = vsel %vm2945_vm7, %v6167_v13, 0.0  ;;  %v917_v3 = vsel %vm647_vm8, %v6138_v32, 0.0  ;;  %vm1437_vm9 = vcmp.eq.s32.totalorder %v8022_v4, %v6140_v44  ;;  %v8023_v43 = vld [vmem:[#allocation37_spill] sm:$0xff] }
 0x249   : > { %v2681_v35 = vadd.f32 %v2425_v40, %v1893_v12  ;;  %v1705_v39 = vsel %vm1437_vm9, %v6142_v42, 0.0  ;;  %vm2225_vm10 = vcmp.eq.s32.totalorder %v8022_v4, %v6148_v9  ;;  %vm3013_vm11 = vcmp.eq.s32.totalorder %v8022_v4, %v6155_v34 }
 0x24a   : > { %3798 = vmatpush.msra.mxu1 %v3413_v11  ;;  %v1961_v15 = vadd.f32 %v1705_v39, %v917_v3  ;;  %v2493_v2 = vsel %vm2225_vm10, %v6150_v47, 0.0  ;;  %v3281_v57 = vsel %vm3013_vm11, %v6167_v13, 0.0  ;;  %vm455_vm12 = vcmp.eq.s32.totalorder %v8023_v43, %v6135_v8 }
 0x24b   : > { %v3469_v0 = vadd.f32 %v3213_v63, %v2681_v35  ;;  %v725_v14 = vsel %vm455_vm12, %v6138_v32, 0.0  ;;  %vm1245_vm13 = vcmp.eq.s32.totalorder %v8023_v43, %v6140_v44  ;;  %vm2033_vm14 = vcmp.eq.s32.totalorder %v8023_v43, %v6148_v9  ;;  %v8024_v35 = vld [vmem:[#allocation38_spill] sm:$0xff] }
 0x24c   : > { %v2749_v12 = vadd.f32 %v2493_v2, %v1961_v15  ;;  %v1513_v11 = vsel %vm1245_vm13, %v6142_v42, 0.0  ;;  %v2301_v40 = vsel %vm2033_vm14, %v6150_v47, 0.0  ;;  %vm2821_vm15 = vcmp.eq.s32.totalorder %v8023_v43, %v6155_v34 }
 0x24d   : > { %3820 = vmatpush.msra.mxu2 %v3469_v0  ;;  %v1769_v3 = vadd.f32 %v1513_v11, %v725_v14  ;;  %v3089_v63 = vsel %vm2821_vm15, %v6167_v13, 0.0  ;;  %vm519_vm0 = vcmp.eq.s32.totalorder %v8024_v35, %v6135_v8  ;;  %vm1309_vm1 = vcmp.eq.s32.totalorder %v8024_v35, %v6140_v44  ;;  %v8025_v11 = vld [vmem:[#allocation39_spill] sm:$0xff] }
 0x24e   : > { %v3537_v39 = vadd.f32 %v3281_v57, %v2749_v12  ;;  %v789_v15 = vsel %vm519_vm0, %v6138_v32, 0.0  ;;  %v1577_v2 = vsel %vm1309_vm1, %v6142_v42, 0.0  ;;  %vm2097_vm2 = vcmp.eq.s32.totalorder %v8024_v35, %v6148_v9 }
 0x24f   : > { %v2557_v4 = vadd.f32 %v2301_v40, %v1769_v3  ;;  %v1833_v43 = vadd.f32 %v1577_v2, %v789_v15  ;;  %v2365_v0 = vsel %vm2097_vm2, %v6150_v47, 0.0  ;;  %vm2885_vm3 = vcmp.eq.s32.totalorder %v8024_v35, %v6155_v34  ;;  %v8026_v2 = vld [vmem:[#allocation40_spill] sm:$0xff] }
 0x250   : > { %3839 = vmatpush.msra.mxu3 %v3537_v39  ;;  %v3153_v14 = vsel %vm2885_vm3, %v6167_v13, 0.0  ;;  %vm575_vm4 = vcmp.eq.s32.totalorder %v8025_v11, %v6135_v8  ;;  %vm1365_vm5 = vcmp.eq.s32.totalorder %v8025_v11, %v6140_v44  ;;  %vm2153_vm6 = vcmp.eq.s32.totalorder %v8025_v11, %v6148_v9 }
 0x251   : > { %v3345_v57 = vadd.f32 %v3089_v63, %v2557_v4  ;;  %v2621_v12 = vadd.f32 %v2365_v0, %v1833_v43  ;;  %v845_v40 = vsel %vm575_vm4, %v6138_v32, 0.0  ;;  %v1633_v3 = vsel %vm1365_vm5, %v6142_v42, 0.0 }
 0x252   : > { %v1889_v15 = vadd.f32 %v1633_v3, %v845_v40  ;;  %v2421_v39 = vsel %vm2153_vm6, %v6150_v47, 0.0  ;;  %vm2941_vm7 = vcmp.eq.s32.totalorder %v8025_v11, %v6155_v34  ;;  %vm643_vm8 = vcmp.eq.s32.totalorder %v8026_v2, %v6135_v8  ;;  %v4158_v11 = vld [vmem:[%s4375_s25 + $0x8] sm:$0xff] }
 0x253   : > { %3779 = vmatpush.msra.mxu0 %v3345_v57  ;;  %v3409_v35 = vadd.f32 %v3153_v14, %v2621_v12  ;;  %v3209_v31 = vsel %vm2941_vm7, %v6167_v13, 0.0  ;;  %v913_v4 = vsel %vm643_vm8, %v6138_v32, 0.0  ;;  %vm1433_vm9 = vcmp.eq.s32.totalorder %v8026_v2, %v6140_v44  ;;  %v8027_v12 = vld [vmem:[#allocation10_spill] sm:$0xff] }
 0x254   : > { %v2677_v43 = vadd.f32 %v2421_v39, %v1889_v15  ;;  %v1701_v63 = vsel %vm1433_vm9, %v6142_v42, 0.0  ;;  %vm2221_vm10 = vcmp.eq.s32.totalorder %v8026_v2, %v6148_v9  ;;  %vm3009_vm11 = vcmp.eq.s32.totalorder %v8026_v2, %v6155_v34 }
 0x255   : > { %3799 = vmatpush.msra.mxu1 %v3409_v35  ;;  %v1957_v0 = vadd.f32 %v1701_v63, %v913_v4  ;;  %v2489_v14 = vsel %vm2221_vm10, %v6150_v47, 0.0  ;;  %v3277_v57 = vsel %vm3009_vm11, %v6167_v13, 0.0  ;;  %v440_v40 = vperm.slane %v8027_v12, 4 }
 0x256   : > { %v3465_v3 = vadd.f32 %v3209_v31, %v2677_v43  ;;  %v706_v6 = vperm.slane %v4158_v11, 4  ;;  %v1230_v15 = vperm.slane %v8027_v12, 5  ;;  %v1494_v39 = vperm.slane %v4158_v11, 5 }
 0x257   : > { %v2745_v5 = vadd.f32 %v2489_v14, %v1957_v0  ;;  %v6928_v1 = vperm.slane %v440_v40, 0  ;;  %v2018_v26 = vperm.slane %v8027_v12, 6  ;;  %v2282_v2 = vperm.slane %v4158_v11, 6  ;;  %v4159_v14 = vld.sshfl [vmem:[#allocation1 + $0x10] sm:$0xff pattern:$0x75316420] }
 0x258   : > { %3821 = vmatpush.msra.mxu2 %v3465_v3  ;;  %v6931_v35 = vperm.slane %v706_v6, 0  ;;  %v6933_v4 = vperm.slane %v1230_v15, 1  ;;  %v6935_v63 = vperm.slane %v1494_v39, 1  ;;  %v2806_v31 = vperm.slane %v8027_v12, 7 }
 0x259   : > { %v3533_v43 = vadd.f32 %v3277_v57, %v2745_v5  ;;  %vm636_vm12 = vcmp.eq.s32.totalorder %v8028_v24, %v6928_v1  ;;  %v6940_v33 = vperm.slane %v2018_v26, 2  ;;  %v6942_v0 = vperm.slane %v2282_v2, 2  ;;  %3822 = vmatmul.f32.vlgmr.msra.gmra.mxu2 %v4159_v14  ;;  %v8029_v26 = vld [vmem:[#allocation41_spill] sm:$0xff] }
 0x25a   : > { %v906_v40 = vsel %vm636_vm12, %v6931_v35, 0.0  ;;  %vm1426_vm13 = vcmp.eq.s32.totalorder %v8028_v24, %v6933_v4  ;;  %v6947_v6 = vperm.slane %v2806_v31, 3  ;;  %v3070_v3 = vperm.slane %v4158_v11, 7 }
 0x25b   : > { %3840 = vmatpush.msra.mxu3 %v3533_v43  ;;  %v1694_v5 = vsel %vm1426_vm13, %v6935_v63, 0.0  ;;  %vm2214_vm14 = vcmp.eq.s32.totalorder %v8028_v24, %v6940_v33  ;;  %vm451_vm15 = vcmp.eq.s32.totalorder %v8029_v26, %v6135_v8  ;;  %vm1241_vm0 = vcmp.eq.s32.totalorder %v8029_v26, %v6140_v44 }
 0x25c   : > { %v1950_v2 = vadd.f32 %v1694_v5, %v906_v40  ;;  %v2482_v57 = vsel %vm2214_vm14, %v6942_v0, 0.0  ;;  %vm3002_vm1 = vcmp.eq.s32.totalorder %v8028_v24, %v6947_v6  ;;  %v6959_v12 = vperm.slane %v3070_v3, 3 }
 0x25d   : > { %v721_v11 = vsel %vm451_vm15, %v6138_v32, 0.0  ;;  %v1509_v15 = vsel %vm1241_vm0, %v6142_v42, 0.0  ;;  %vm2029_vm2 = vcmp.eq.s32.totalorder %v8029_v26, %v6148_v9  ;;  %vm2817_vm3 = vcmp.eq.s32.totalorder %v8029_v26, %v6155_v34 }
 0x25e   : > { %v2738_v39 = vadd.f32 %v2482_v57, %v1950_v2  ;;  %v3270_v31 = vsel %vm3002_vm1, %v6959_v12, 0.0  ;;  %v1765_v43 = vadd.f32 %v1509_v15, %v721_v11  ;;  %v2297_v14 = vsel %vm2029_vm2, %v6150_v47, 0.0 }
 0x25f   : > { %v3085_v24 = vsel %vm2817_vm3, %v6167_v13, 0.0  ;;  %vm515_vm4 = vcmp.eq.s32.totalorder %v7996_v23, %v6135_v8  ;;  %vm1305_vm5 = vcmp.eq.s32.totalorder %v7996_v23, %v6140_v44  ;;  %vm2093_vm6 = vcmp.eq.s32.totalorder %v7996_v23, %v6148_v9 }
 0x260   : > { %v3526_v40 = vadd.f32 %v3270_v31, %v2738_v39  ;;  %v2553_v3 = vadd.f32 %v2297_v14, %v1765_v43  ;;  %v785_v5 = vsel %vm515_vm4, %v6138_v32, 0.0  ;;  %v1573_v2 = vsel %vm1305_vm5, %v6142_v42, 0.0 }
 0x261   : > { %v1829_v57 = vadd.f32 %v1573_v2, %v785_v5  ;;  %v2361_v11 = vsel %vm2093_vm6, %v6150_v47, 0.0  ;;  %vm2881_vm7 = vcmp.eq.s32.totalorder %v7996_v23, %v6155_v34  ;;  %vm639_vm8 = vcmp.eq.s32.totalorder %v5381_v22, %v6135_v8 }
 0x262   : > { %3886 = vmatpush.msrb.mxu2 %v3526_v40  ;;  %v3341_v15 = vadd.f32 %v3085_v24, %v2553_v3  ;;  %v3149_v26 = vsel %vm2881_vm7, %v6167_v13, 0.0  ;;  %v909_v39 = vsel %vm639_vm8, %v6138_v32, 0.0  ;;  %vm1429_vm9 = vcmp.eq.s32.totalorder %v5381_v22, %v6140_v44 }
 0x263   : > { %v2617_v31 = vadd.f32 %v2361_v11, %v1829_v57  ;;  %v1697_v43 = vsel %vm1429_vm9, %v6142_v42, 0.0  ;;  %vm2217_vm10 = vcmp.eq.s32.totalorder %v5381_v22, %v6148_v9  ;;  %vm3005_vm11 = vcmp.eq.s32.totalorder %v5381_v22, %v6155_v34 }
 0x264   : > { %3780 = vmatpush.msra.mxu0 %v3341_v15  ;;  %v1953_v14 = vadd.f32 %v1697_v43, %v909_v39  ;;  %v2485_v24 = vsel %vm2217_vm10, %v6150_v47, 0.0  ;;  %v3273_v40 = vsel %vm3005_vm11, %v6167_v13, 0.0  ;;  %vm632_vm12 = vcmp.eq.s32.totalorder %v4421_v16, %v6928_v1 }
 0x265   : > { %v3405_v3 = vadd.f32 %v3149_v26, %v2617_v31  ;;  %v902_v5 = vsel %vm632_vm12, %v6931_v35, 0.0  ;;  %vm1422_vm13 = vcmp.eq.s32.totalorder %v4421_v16, %v6933_v4  ;;  %vm2210_vm14 = vcmp.eq.s32.totalorder %v4421_v16, %v6940_v33 }
 0x266   : > { %v2741_v2 = vadd.f32 %v2485_v24, %v1953_v14  ;;  %v1690_v57 = vsel %vm1422_vm13, %v6935_v63, 0.0  ;;  %v2478_v11 = vsel %vm2210_vm14, %v6942_v0, 0.0  ;;  %vm2998_vm15 = vcmp.eq.s32.totalorder %v4421_v16, %v6947_v6 }
 0x267   : > { %3800 = vmatpush.msra.mxu1 %v3405_v3  ;;  %v1946_v15 = vadd.f32 %v1690_v57, %v902_v5  ;;  %v3266_v26 = vsel %vm2998_vm15, %v6959_v12, 0.0  ;;  %vm700_vm0 = vcmp.eq.s32.totalorder %v4424_v17, %v6928_v1  ;;  %vm1490_vm1 = vcmp.eq.s32.totalorder %v4424_v17, %v6933_v4 }
 0x268   : > { %v3529_v39 = vadd.f32 %v3273_v40, %v2741_v2  ;;  %v970_v31 = vsel %vm700_vm0, %v6931_v35, 0.0  ;;  %v1758_v43 = vsel %vm1490_vm1, %v6935_v63, 0.0  ;;  %vm2278_vm2 = vcmp.eq.s32.totalorder %v4424_v17, %v6940_v33 }
 0x269   : > { %v2734_v14 = vadd.f32 %v2478_v11, %v1946_v15  ;;  %v2014_v16 = vadd.f32 %v1758_v43, %v970_v31  ;;  %v2546_v24 = vsel %vm2278_vm2, %v6942_v0, 0.0  ;;  %vm3066_vm3 = vcmp.eq.s32.totalorder %v4424_v17, %v6947_v6  ;;  %v4160_v11 = vld.sshfl [vmem:[#allocation1 + $0x18] sm:$0xff pattern:$0x75316420] }
 0x26a   : > { %3841 = vmatpush.msra.mxu3 %v3529_v39  ;;  %v3334_v3 = vsel %vm3066_vm3, %v6959_v12, 0.0  ;;  %vm447_vm4 = vcmp.eq.s32.totalorder %v4404_v7, %v6135_v8  ;;  %vm1237_vm5 = vcmp.eq.s32.totalorder %v4404_v7, %v6140_v44  ;;  %vm2025_vm6 = vcmp.eq.s32.totalorder %v4404_v7, %v6148_v9 }
 0x26b   : > { %v3522_v40 = vadd.f32 %v3266_v26, %v2734_v14  ;;  %v2802_v5 = vadd.f32 %v2546_v24, %v2014_v16  ;;  %v717_v2 = vsel %vm447_vm4, %v6138_v32, 0.0  ;;  %v1505_v57 = vsel %vm1237_vm5, %v6142_v42, 0.0  ;;  %3842 = vmatmul.f32.vlgmr.msra.gmra.mxu3 %v4160_v11 }
 0x26c   : > { %v1761_v17 = vadd.f32 %v1505_v57, %v717_v2  ;;  %v2293_v15 = vsel %vm2025_vm6, %v6150_v47, 0.0  ;;  %vm2813_vm7 = vcmp.eq.s32.totalorder %v4404_v7, %v6155_v34  ;;  %vm511_vm8 = vcmp.eq.s32.totalorder %v5431_v10, %v6135_v8  ;;  %v4161_v2 = vld.sshfl [vmem:[#allocation1] sm:$0xff pattern:$0x75316420] }
 0x26d   : > { %3887 = vmatpush.msrb.mxu2 %v3522_v40  ;;  %v3590_v39 = vadd.f32 %v3334_v3, %v2802_v5  ;;  %v3081_v26 = vsel %vm2813_vm7, %v6167_v13, 0.0  ;;  %v781_v31 = vsel %vm511_vm8, %v6138_v32, 0.0  ;;  %vm1301_vm9 = vcmp.eq.s32.totalorder %v5431_v10, %v6140_v44 }
 0x26e   : > { %v2549_v43 = vadd.f32 %v2293_v15, %v1761_v17  ;;  %v1569_v14 = vsel %vm1301_vm9, %v6142_v42, 0.0  ;;  %vm2089_vm10 = vcmp.eq.s32.totalorder %v5431_v10, %v6148_v9  ;;  %vm2877_vm11 = vcmp.eq.s32.totalorder %v5431_v10, %v6155_v34 }
 0x26f   : > { %3906 = vmatpush.msrb.mxu3 %v3590_v39  ;;  %v1825_v8 = vadd.f32 %v1569_v14, %v781_v31  ;;  %v2357_v16 = vsel %vm2089_vm10, %v6150_v47, 0.0  ;;  %v3145_v24 = vsel %vm2877_vm11, %v6167_v13, 0.0  ;;  %vm508_vm12 = vcmp.eq.s32.totalorder %v4427_v18, %v6928_v1 }
 0x270   : > { %v3337_v32 = vadd.f32 %v3081_v26, %v2549_v43  ;;  %v778_v44 = vsel %vm508_vm12, %v6931_v35, 0.0  ;;  %vm1298_vm13 = vcmp.eq.s32.totalorder %v4427_v18, %v6933_v4  ;;  %vm2086_vm14 = vcmp.eq.s32.totalorder %v4427_v18, %v6940_v33  ;;  %v4162_v43 = vld.sshfl [vmem:[#allocation1 + $0x8] sm:$0xff pattern:$0x75316420] }
 0x271   : > { %v2613_v42 = vadd.f32 %v2357_v16, %v1825_v8  ;;  %v1566_v9 = vsel %vm1298_vm13, %v6935_v63, 0.0  ;;  %v2354_v34 = vsel %vm2086_vm14, %v6942_v0, 0.0  ;;  %vm2874_vm15 = vcmp.eq.s32.totalorder %v4427_v18, %v6947_v6 }
 0x272   : > { %3781 = vmatpush.msra.mxu0 %v3337_v32  ;;  %v1822_v47 = vadd.f32 %v1566_v9, %v778_v44  ;;  %v3142_v13 = vsel %vm2874_vm15, %v6959_v12, 0.0  ;;  %vm572_vm0 = vcmp.eq.s32.totalorder %v4430_v19, %v6928_v1  ;;  %vm1362_vm1 = vcmp.eq.s32.totalorder %v4430_v19, %v6933_v4 }
 0x273   : > { %v3401_v3 = vadd.f32 %v3145_v24, %v2613_v42  ;;  %v842_v40 = vsel %vm572_vm0, %v6931_v35, 0.0  ;;  %v1630_v5 = vsel %vm1362_vm1, %v6935_v63, 0.0  ;;  %vm2150_vm2 = vcmp.eq.s32.totalorder %v4430_v19, %v6940_v33  ;;  %3782 = vmatmul.f32.vlgmr.msra.gmra.mxu0 %v4161_v2 }
 0x274   : > { %v2610_v18 = vadd.f32 %v2354_v34, %v1822_v47  ;;  %v1886_v57 = vadd.f32 %v1630_v5, %v842_v40  ;;  %v2418_v11 = vsel %vm2150_vm2, %v6942_v0, 0.0  ;;  %vm2938_vm3 = vcmp.eq.s32.totalorder %v4430_v19, %v6947_v6 }
 0x275   : > { %3801 = vmatpush.msra.mxu1 %v3401_v3  ;;  %v3206_v17 = vsel %vm2938_vm3, %v6959_v12, 0.0  ;;  %vm628_vm4 = vcmp.eq.s32.totalorder %v4433_v20, %v6928_v1  ;;  %vm1418_vm5 = vcmp.eq.s32.totalorder %v4433_v20, %v6933_v4  ;;  %vm2206_vm6 = vcmp.eq.s32.totalorder %v4433_v20, %v6940_v33 }
 0x276   : > { %v3398_v15 = vadd.f32 %v3142_v13, %v2610_v18  ;;  %v2674_v39 = vadd.f32 %v2418_v11, %v1886_v57  ;;  %v898_v26 = vsel %vm628_vm4, %v6931_v35, 0.0  ;;  %v1686_v31 = vsel %vm1418_vm5, %v6935_v63, 0.0  ;;  %3802 = vmatmul.f32.vlgmr.msra.gmra.mxu1 %v4162_v43 }
 0x277   : > { %v1942_v19 = vadd.f32 %v1686_v31, %v898_v26  ;;  %v2474_v14 = vsel %vm2206_vm6, %v6942_v0, 0.0  ;;  %vm2994_vm7 = vcmp.eq.s32.totalorder %v4433_v20, %v6947_v6  ;;  %vm696_vm8 = vcmp.eq.s32.totalorder %v4436_v21, %v6928_v1 }
 0x278   : > { %3846 = vmatpush.msrb.mxu0 %v3398_v15  ;;  %v3462_v8 = vadd.f32 %v3206_v17, %v2674_v39  ;;  %v3262_v16 = vsel %vm2994_vm7, %v6959_v12, 0.0  ;;  %v966_v24 = vsel %vm696_vm8, %v6931_v35, 0.0  ;;  %vm1486_vm9 = vcmp.eq.s32.totalorder %v4436_v21, %v6933_v4 }
 0x279   : > { %v2730_v32 = vadd.f32 %v2474_v14, %v1942_v19  ;;  %v1754_v44 = vsel %vm1486_vm9, %v6935_v63, 0.0  ;;  %vm2274_vm10 = vcmp.eq.s32.totalorder %v4436_v21, %v6940_v33  ;;  %vm3062_vm11 = vcmp.eq.s32.totalorder %v4436_v21, %v6947_v6 }
 0x27a   : > { %3866 = vmatpush.msrb.mxu1 %v3462_v8  ;;  %v2010_v20 = vadd.f32 %v1754_v44, %v966_v24  ;;  %v2542_v42 = vsel %vm2274_vm10, %v6942_v0, 0.0  ;;  %v3330_v9 = vsel %vm3062_vm11, %v6959_v12, 0.0  ;;  %vm504_vm12 = vcmp.eq.s32.totalorder %v4444_v27, %v6928_v1 }
 0x27b   : > { %v3518_v34 = vadd.f32 %v3262_v16, %v2730_v32  ;;  %v774_v47 = vsel %vm504_vm12, %v6931_v35, 0.0  ;;  %vm1294_vm13 = vcmp.eq.s32.totalorder %v4444_v27, %v6933_v4  ;;  %vm2082_vm14 = vcmp.eq.s32.totalorder %v4444_v27, %v6940_v33 }
 0x27c   : > { %v2798_v13 = vadd.f32 %v2542_v42, %v2010_v20  ;;  %v1562_v21 = vsel %vm1294_vm13, %v6935_v63, 0.0  ;;  %v2350_v3 = vsel %vm2082_vm14, %v6942_v0, 0.0  ;;  %vm2870_vm15 = vcmp.eq.s32.totalorder %v4444_v27, %v6947_v6 }
 0x27d   : > { %3888 = vmatpush.msrb.mxu2 %v3518_v34  ;;  %v1818_v40 = vadd.f32 %v1562_v21, %v774_v47  ;;  %v3138_v5 = vsel %vm2870_vm15, %v6959_v12, 0.0  ;;  %vm568_vm0 = vcmp.eq.s32.totalorder %v4447_v28, %v6928_v1  ;;  %vm1358_vm1 = vcmp.eq.s32.totalorder %v4447_v28, %v6933_v4 }
 0x27e   : > { %v3586_v2 = vadd.f32 %v3330_v9, %v2798_v13  ;;  %v838_v18 = vsel %vm568_vm0, %v6931_v35, 0.0  ;;  %v1626_v57 = vsel %vm1358_vm1, %v6935_v63, 0.0  ;;  %vm2146_vm2 = vcmp.eq.s32.totalorder %v4447_v28, %v6940_v33 }
 0x27f   : > { %v2606_v11 = vadd.f32 %v2350_v3, %v1818_v40  ;;  %v1882_v27 = vadd.f32 %v1626_v57, %v838_v18  ;;  %v2414_v17 = vsel %vm2146_vm2, %v6942_v0, 0.0  ;;  %vm2934_vm3 = vcmp.eq.s32.totalorder %v4447_v28, %v6947_v6 }
 0x280   : > { %3907 = vmatpush.msrb.mxu3 %v3586_v2  ;;  %v3202_v15 = vsel %vm2934_vm3, %v6959_v12, 0.0  ;;  %vm624_vm4 = vcmp.eq.s32.totalorder %v4450_v29, %v6928_v1  ;;  %vm1414_vm5 = vcmp.eq.s32.totalorder %v4450_v29, %v6933_v4  ;;  %vm2202_vm6 = vcmp.eq.s32.totalorder %v4450_v29, %v6940_v33 }
 0x281   : > { %v3394_v39 = vadd.f32 %v3138_v5, %v2606_v11  ;;  %v2670_v26 = vadd.f32 %v2414_v17, %v1882_v27  ;;  %v894_v31 = vsel %vm624_vm4, %v6931_v35, 0.0  ;;  %v1682_v43 = vsel %vm1414_vm5, %v6935_v63, 0.0 }
 0x282   : > { %v1938_v19 = vadd.f32 %v1682_v43, %v894_v31  ;;  %v2470_v28 = vsel %vm2202_vm6, %v6942_v0, 0.0  ;;  %vm2990_vm7 = vcmp.eq.s32.totalorder %v4450_v29, %v6947_v6  ;;  %vm692_vm8 = vcmp.eq.s32.totalorder %v4453_v30, %v6928_v1 }
 0x283   : > { %3847 = vmatpush.msrb.mxu0 %v3394_v39  ;;  %v3458_v14 = vadd.f32 %v3202_v15, %v2670_v26  ;;  %v3258_v8 = vsel %vm2990_vm7, %v6959_v12, 0.0  ;;  %v962_v16 = vsel %vm692_vm8, %v6931_v35, 0.0  ;;  %vm1482_vm9 = vcmp.eq.s32.totalorder %v4453_v30, %v6933_v4 }
 0x284   : > { %v2726_v24 = vadd.f32 %v2470_v28, %v1938_v19  ;;  %v1750_v32 = vsel %vm1482_vm9, %v6935_v63, 0.0  ;;  %vm2270_vm10 = vcmp.eq.s32.totalorder %v4453_v30, %v6940_v33  ;;  %vm3058_vm11 = vcmp.eq.s32.totalorder %v4453_v30, %v6947_v6 }
 0x285   : > { %3867 = vmatpush.msrb.mxu1 %v3458_v14  ;;  %v2006_v29 = vadd.f32 %v1750_v32, %v962_v16  ;;  %v2538_v44 = vsel %vm2270_vm10, %v6942_v0, 0.0  ;;  %v3326_v20 = vsel %vm3058_vm11, %v6959_v12, 0.0  ;;  %vm500_vm12 = vcmp.eq.s32.totalorder %v4466_v36, %v6928_v1 }
 0x286   : > { %v3514_v42 = vadd.f32 %v3258_v8, %v2726_v24  ;;  %v770_v9 = vsel %vm500_vm12, %v6931_v35, 0.0  ;;  %vm1290_vm13 = vcmp.eq.s32.totalorder %v4466_v36, %v6933_v4  ;;  %vm2078_vm14 = vcmp.eq.s32.totalorder %v4466_v36, %v6940_v33 }
 0x287   : > { %v2794_v34 = vadd.f32 %v2538_v44, %v2006_v29  ;;  %v1558_v30 = vsel %vm1290_vm13, %v6935_v63, 0.0  ;;  %v2346_v47 = vsel %vm2078_vm14, %v6942_v0, 0.0  ;;  %vm2866_vm15 = vcmp.eq.s32.totalorder %v4466_v36, %v6947_v6 }
 0x288   : > { %3889 = vmatpush.msrb.mxu2 %v3514_v42  ;;  %v1814_v13 = vadd.f32 %v1558_v30, %v770_v9  ;;  %v3134_v21 = vsel %vm2866_vm15, %v6959_v12, 0.0  ;;  %vm564_vm0 = vcmp.eq.s32.totalorder %v4469_v37, %v6928_v1  ;;  %vm1354_vm1 = vcmp.eq.s32.totalorder %v4469_v37, %v6933_v4 }
 0x289   : > { %v3582_v3 = vadd.f32 %v3326_v20, %v2794_v34  ;;  %v834_v40 = vsel %vm564_vm0, %v6931_v35, 0.0  ;;  %v1622_v5 = vsel %vm1354_vm1, %v6935_v63, 0.0  ;;  %vm2142_vm2 = vcmp.eq.s32.totalorder %v4469_v37, %v6940_v33 }
 0x28a   : > { %v2602_v2 = vadd.f32 %v2346_v47, %v1814_v13  ;;  %v1878_v36 = vadd.f32 %v1622_v5, %v834_v40  ;;  %v2410_v18 = vsel %vm2142_vm2, %v6942_v0, 0.0  ;;  %vm2930_vm3 = vcmp.eq.s32.totalorder %v4469_v37, %v6947_v6 }
 0x28b   : > { %3908 = vmatpush.msrb.mxu3 %v3582_v3  ;;  %v3198_v57 = vsel %vm2930_vm3, %v6959_v12, 0.0  ;;  %vm620_vm4 = vcmp.eq.s32.totalorder %v4472_v38, %v6928_v1  ;;  %vm1410_vm5 = vcmp.eq.s32.totalorder %v4472_v38, %v6933_v4  ;;  %vm2198_vm6 = vcmp.eq.s32.totalorder %v4472_v38, %v6940_v33 }
 0x28c   : > { %v3390_v11 = vadd.f32 %v3134_v21, %v2602_v2  ;;  %v2666_v27 = vadd.f32 %v2410_v18, %v1878_v36  ;;  %v890_v17 = vsel %vm620_vm4, %v6931_v35, 0.0  ;;  %v1678_v15 = vsel %vm1410_vm5, %v6935_v63, 0.0 }
 0x28d   : > { %v1934_v39 = vadd.f32 %v1678_v15, %v890_v17  ;;  %v2466_v37 = vsel %vm2198_vm6, %v6942_v0, 0.0  ;;  %vm2986_vm7 = vcmp.eq.s32.totalorder %v4472_v38, %v6947_v6  ;;  %vm688_vm8 = vcmp.eq.s32.totalorder %v4643_v56, %v6928_v1 }
 0x28e   : > { %3848 = vmatpush.msrb.mxu0 %v3390_v11  ;;  %v3454_v26 = vadd.f32 %v3198_v57, %v2666_v27  ;;  %v3254_v31 = vsel %vm2986_vm7, %v6959_v12, 0.0  ;;  %v958_v43 = vsel %vm688_vm8, %v6931_v35, 0.0  ;;  %vm1478_vm9 = vcmp.eq.s32.totalorder %v4643_v56, %v6933_v4 }
 0x28f   : > { %v2722_v19 = vadd.f32 %v2466_v37, %v1934_v39  ;;  %v1746_v28 = vsel %vm1478_vm9, %v6935_v63, 0.0  ;;  %vm2266_vm10 = vcmp.eq.s32.totalorder %v4643_v56, %v6940_v33  ;;  %vm3054_vm11 = vcmp.eq.s32.totalorder %v4643_v56, %v6947_v6 }
 0x290   : > { %3868 = vmatpush.msrb.mxu1 %v3454_v26  ;;  %v2002_v38 = vadd.f32 %v1746_v28, %v958_v43  ;;  %v2534_v14 = vsel %vm2266_vm10, %v6942_v0, 0.0  ;;  %v3322_v8 = vsel %vm3054_vm11, %v6959_v12, 0.0  ;;  %vm496_vm12 = vcmp.eq.s32.totalorder %v4646_v58, %v6928_v1 }
 0x291   : > { %v3510_v16 = vadd.f32 %v3254_v31, %v2722_v19  ;;  %v766_v24 = vsel %vm496_vm12, %v6931_v35, 0.0  ;;  %vm1286_vm13 = vcmp.eq.s32.totalorder %v4646_v58, %v6933_v4  ;;  %vm2074_vm14 = vcmp.eq.s32.totalorder %v4646_v58, %v6940_v33 }
 0x292   : > { %v2790_v32 = vadd.f32 %v2534_v14, %v2002_v38  ;;  %v1554_v56 = vsel %vm1286_vm13, %v6935_v63, 0.0  ;;  %v2342_v29 = vsel %vm2074_vm14, %v6942_v0, 0.0  ;;  %vm2862_vm15 = vcmp.eq.s32.totalorder %v4646_v58, %v6947_v6 }
 0x293   : > { %3890 = vmatpush.msrb.mxu2 %v3510_v16  ;;  %v1810_v44 = vadd.f32 %v1554_v56, %v766_v24  ;;  %v3130_v20 = vsel %vm2862_vm15, %v6959_v12, 0.0  ;;  %vm560_vm0 = vcmp.eq.s32.totalorder %v4649_v59, %v6928_v1  ;;  %vm1350_vm1 = vcmp.eq.s32.totalorder %v4649_v59, %v6933_v4 }
 0x294   : > { %v3578_v42 = vadd.f32 %v3322_v8, %v2790_v32  ;;  %v830_v9 = vsel %vm560_vm0, %v6931_v35, 0.0  ;;  %v1618_v34 = vsel %vm1350_vm1, %v6935_v63, 0.0  ;;  %vm2138_vm2 = vcmp.eq.s32.totalorder %v4649_v59, %v6940_v33 }
 0x295   : > { %v2598_v30 = vadd.f32 %v2342_v29, %v1810_v44  ;;  %v1874_v58 = vadd.f32 %v1618_v34, %v830_v9  ;;  %v2406_v47 = vsel %vm2138_vm2, %v6942_v0, 0.0  ;;  %vm2926_vm3 = vcmp.eq.s32.totalorder %v4649_v59, %v6947_v6 }
 0x296   : > { %3909 = vmatpush.msrb.mxu3 %v3578_v42  ;;  %v3194_v13 = vsel %vm2926_vm3, %v6959_v12, 0.0  ;;  %vm616_vm4 = vcmp.eq.s32.totalorder %v4652_v60, %v6928_v1  ;;  %vm1406_vm5 = vcmp.eq.s32.totalorder %v4652_v60, %v6933_v4  ;;  %vm2194_vm6 = vcmp.eq.s32.totalorder %v4652_v60, %v6940_v33 }
 0x297   : > { %v3386_v21 = vadd.f32 %v3130_v20, %v2598_v30  ;;  %v2662_v3 = vadd.f32 %v2406_v47, %v1874_v58  ;;  %v886_v40 = vsel %vm616_vm4, %v6931_v35, 0.0  ;;  %v1674_v5 = vsel %vm1406_vm5, %v6935_v63, 0.0 }
 0x298   : > { %v1930_v2 = vadd.f32 %v1674_v5, %v886_v40  ;;  %v2462_v59 = vsel %vm2194_vm6, %v6942_v0, 0.0  ;;  %vm2982_vm7 = vcmp.eq.s32.totalorder %v4652_v60, %v6947_v6  ;;  %vm684_vm8 = vcmp.eq.s32.totalorder %v4702_v48, %v6928_v1 }
 0x299   : > { %3849 = vmatpush.msrb.mxu0 %v3386_v21  ;;  %v3450_v36 = vadd.f32 %v3194_v13, %v2662_v3  ;;  %v3250_v18 = vsel %vm2982_vm7, %v6959_v12, 0.0  ;;  %v954_v57 = vsel %vm684_vm8, %v6931_v35, 0.0  ;;  %vm1474_vm9 = vcmp.eq.s32.totalorder %v4702_v48, %v6933_v4 }
 0x29a   : > { %v2718_v11 = vadd.f32 %v2462_v59, %v1930_v2  ;;  %v1742_v27 = vsel %vm1474_vm9, %v6935_v63, 0.0  ;;  %vm2262_vm10 = vcmp.eq.s32.totalorder %v4702_v48, %v6940_v33  ;;  %vm3050_vm11 = vcmp.eq.s32.totalorder %v4702_v48, %v6947_v6 }
 0x29b   : > { %3869 = vmatpush.msrb.mxu1 %v3450_v36  ;;  %v1998_v60 = vadd.f32 %v1742_v27, %v954_v57  ;;  %v2530_v17 = vsel %vm2262_vm10, %v6942_v0, 0.0  ;;  %v3318_v15 = vsel %vm3050_vm11, %v6959_v12, 0.0  ;;  %vm492_vm12 = vcmp.eq.s32.totalorder %v4705_v49, %v6928_v1 }
 0x29c   : > { %v3506_v39 = vadd.f32 %v3250_v18, %v2718_v11  ;;  %v762_v37 = vsel %vm492_vm12, %v6931_v35, 0.0  ;;  %vm1282_vm13 = vcmp.eq.s32.totalorder %v4705_v49, %v6933_v4  ;;  %vm2070_vm14 = vcmp.eq.s32.totalorder %v4705_v49, %v6940_v33 }
 0x29d   : > { %v2786_v26 = vadd.f32 %v2530_v17, %v1998_v60  ;;  %v1550_v48 = vsel %vm1282_vm13, %v6935_v63, 0.0  ;;  %v2338_v31 = vsel %vm2070_vm14, %v6942_v0, 0.0  ;;  %vm2858_vm15 = vcmp.eq.s32.totalorder %v4705_v49, %v6947_v6 }
 0x29e   : > { %3891 = vmatpush.msrb.mxu2 %v3506_v39  ;;  %v1806_v43 = vadd.f32 %v1550_v48, %v762_v37  ;;  %v3126_v19 = vsel %vm2858_vm15, %v6959_v12, 0.0  ;;  %vm556_vm0 = vcmp.eq.s32.totalorder %v4709_v52, %v6928_v1  ;;  %vm1346_vm1 = vcmp.eq.s32.totalorder %v4709_v52, %v6933_v4 }
 0x29f   : > { %v3574_v28 = vadd.f32 %v3318_v15, %v2786_v26  ;;  %v826_v38 = vsel %vm556_vm0, %v6931_v35, 0.0  ;;  %v1614_v14 = vsel %vm1346_vm1, %v6935_v63, 0.0  ;;  %vm2134_vm2 = vcmp.eq.s32.totalorder %v4709_v52, %v6940_v33 }
 0x2a0   : > { %v2594_v8 = vadd.f32 %v2338_v31, %v1806_v43  ;;  %v1870_v49 = vadd.f32 %v1614_v14, %v826_v38  ;;  %v2402_v16 = vsel %vm2134_vm2, %v6942_v0, 0.0  ;;  %vm2922_vm3 = vcmp.eq.s32.totalorder %v4709_v52, %v6947_v6 }
 0x2a1   : > { %3910 = vmatpush.msrb.mxu3 %v3574_v28  ;;  %v3190_v24 = vsel %vm2922_vm3, %v6959_v12, 0.0  ;;  %vm612_vm4 = vcmp.eq.s32.totalorder %v4712_v53, %v6928_v1  ;;  %vm1402_vm5 = vcmp.eq.s32.totalorder %v4712_v53, %v6933_v4  ;;  %vm2190_vm6 = vcmp.eq.s32.totalorder %v4712_v53, %v6940_v33 }
 0x2a2   : > { %v3382_v32 = vadd.f32 %v3126_v19, %v2594_v8  ;;  %v2658_v56 = vadd.f32 %v2402_v16, %v1870_v49  ;;  %v882_v29 = vsel %vm612_vm4, %v6931_v35, 0.0  ;;  %v1670_v44 = vsel %vm1402_vm5, %v6935_v63, 0.0 }
 0x2a3   : > { %v1926_v20 = vadd.f32 %v1670_v44, %v882_v29  ;;  %v2458_v52 = vsel %vm2190_vm6, %v6942_v0, 0.0  ;;  %vm2978_vm7 = vcmp.eq.s32.totalorder %v4712_v53, %v6947_v6  ;;  %vm680_vm8 = vcmp.eq.s32.totalorder %v4762_v45, %v6928_v1 }
 0x2a4   : > { %3850 = vmatpush.msrb.mxu0 %v3382_v32  ;;  %v3446_v42 = vadd.f32 %v3190_v24, %v2658_v56  ;;  %v3246_v9 = vsel %vm2978_vm7, %v6959_v12, 0.0  ;;  %v950_v34 = vsel %vm680_vm8, %v6931_v35, 0.0  ;;  %vm1470_vm9 = vcmp.eq.s32.totalorder %v4762_v45, %v6933_v4 }
 0x2a5   : > { %v2714_v30 = vadd.f32 %v2458_v52, %v1926_v20  ;;  %v1738_v58 = vsel %vm1470_vm9, %v6935_v63, 0.0  ;;  %vm2258_vm10 = vcmp.eq.s32.totalorder %v4762_v45, %v6940_v33  ;;  %vm3046_vm11 = vcmp.eq.s32.totalorder %v4762_v45, %v6947_v6 }
 0x2a6   : > { %3870 = vmatpush.msrb.mxu1 %v3446_v42  ;;  %v1994_v53 = vadd.f32 %v1738_v58, %v950_v34  ;;  %v2526_v47 = vsel %vm2258_vm10, %v6942_v0, 0.0  ;;  %v3314_v13 = vsel %vm3046_vm11, %v6959_v12, 0.0  ;;  %vm488_vm12 = vcmp.eq.s32.totalorder %v4765_v46, %v6928_v1 }
 0x2a7   : > { %v3502_v21 = vadd.f32 %v3246_v9, %v2714_v30  ;;  %v758_v3 = vsel %vm488_vm12, %v6931_v35, 0.0  ;;  %vm1278_vm13 = vcmp.eq.s32.totalorder %v4765_v46, %v6933_v4  ;;  %vm2066_vm14 = vcmp.eq.s32.totalorder %v4765_v46, %v6940_v33 }
 0x2a8   : > { %v2782_v40 = vadd.f32 %v2526_v47, %v1994_v53  ;;  %v1546_v45 = vsel %vm1278_vm13, %v6935_v63, 0.0  ;;  %v2334_v5 = vsel %vm2066_vm14, %v6942_v0, 0.0  ;;  %vm2854_vm15 = vcmp.eq.s32.totalorder %v4765_v46, %v6947_v6 }
 0x2a9   : > { %3892 = vmatpush.msrb.mxu2 %v3502_v21  ;;  %v1802_v2 = vadd.f32 %v1546_v45, %v758_v3  ;;  %v3122_v59 = vsel %vm2854_vm15, %v6959_v12, 0.0  ;;  %vm552_vm0 = vcmp.eq.s32.totalorder %v4769_v51, %v6928_v1  ;;  %vm1342_vm1 = vcmp.eq.s32.totalorder %v4769_v51, %v6933_v4 }
 0x2aa   : > { %v3570_v36 = vadd.f32 %v3314_v13, %v2782_v40  ;;  %v822_v18 = vsel %vm552_vm0, %v6931_v35, 0.0  ;;  %v1610_v57 = vsel %vm1342_vm1, %v6935_v63, 0.0  ;;  %vm2130_vm2 = vcmp.eq.s32.totalorder %v4769_v51, %v6940_v33 }
 0x2ab   : > { %v2590_v11 = vadd.f32 %v2334_v5, %v1802_v2  ;;  %v1866_v46 = vadd.f32 %v1610_v57, %v822_v18  ;;  %v2398_v27 = vsel %vm2130_vm2, %v6942_v0, 0.0  ;;  %vm2918_vm3 = vcmp.eq.s32.totalorder %v4769_v51, %v6947_v6 }
 0x2ac   : > { %3911 = vmatpush.msrb.mxu3 %v3570_v36  ;;  %v3186_v60 = vsel %vm2918_vm3, %v6959_v12, 0.0  ;;  %vm608_vm4 = vcmp.eq.s32.totalorder %v4772_v54, %v6928_v1  ;;  %vm1398_vm5 = vcmp.eq.s32.totalorder %v4772_v54, %v6933_v4  ;;  %vm2186_vm6 = vcmp.eq.s32.totalorder %v4772_v54, %v6940_v33 }
 0x2ad   : > { %v3378_v17 = vadd.f32 %v3122_v59, %v2590_v11  ;;  %v2654_v15 = vadd.f32 %v2398_v27, %v1866_v46  ;;  %v878_v39 = vsel %vm608_vm4, %v6931_v35, 0.0  ;;  %v1666_v37 = vsel %vm1398_vm5, %v6935_v63, 0.0  ;;  %v8030_v27 = vld [vmem:[#allocation14_spill] sm:$0xff] }
 0x2ae   : > { %v1922_v26 = vadd.f32 %v1666_v37, %v878_v39  ;;  %v2454_v51 = vsel %vm2186_vm6, %v6942_v0, 0.0  ;;  %vm2974_vm7 = vcmp.eq.s32.totalorder %v4772_v54, %v6947_v6  ;;  %vm676_vm8 = vcmp.eq.s32.totalorder %v4822_v50, %v6928_v1 }
 0x2af   : > { %3851 = vmatpush.msrb.mxu0 %v3378_v17  ;;  %v3442_v48 = vadd.f32 %v3186_v60, %v2654_v15  ;;  %v3242_v31 = vsel %vm2974_vm7, %v6959_v12, 0.0  ;;  %v946_v43 = vsel %vm676_vm8, %v6931_v35, 0.0  ;;  %vm1466_vm9 = vcmp.eq.s32.totalorder %v4822_v50, %v6933_v4 }
 0x2b0   : > { %v2710_v19 = vadd.f32 %v2454_v51, %v1922_v26  ;;  %v1734_v28 = vsel %vm1466_vm9, %v6935_v63, 0.0  ;;  %vm2254_vm10 = vcmp.eq.s32.totalorder %v4822_v50, %v6940_v33  ;;  %vm3042_vm11 = vcmp.eq.s32.totalorder %v4822_v50, %v6947_v6  ;;  %v8031_v51 = vld [vmem:[#allocation15_spill] sm:$0xff] }
 0x2b1   : > { %3871 = vmatpush.msrb.mxu1 %v3442_v48  ;;  %v1990_v54 = vadd.f32 %v1734_v28, %v946_v43  ;;  %v2522_v38 = vsel %vm2254_vm10, %v6942_v0, 0.0  ;;  %v3310_v14 = vsel %vm3042_vm11, %v6959_v12, 0.0  ;;  %vm484_vm12 = vcmp.eq.s32.totalorder %v4825_v55, %v6928_v1 }
 0x2b2   : > { %v3498_v8 = vadd.f32 %v3242_v31, %v2710_v19  ;;  %v754_v49 = vsel %vm484_vm12, %v6931_v35, 0.0  ;;  %vm1274_vm13 = vcmp.eq.s32.totalorder %v4825_v55, %v6933_v4  ;;  %vm2062_vm14 = vcmp.eq.s32.totalorder %v4825_v55, %v6940_v33 }
 0x2b3   : > { %v2778_v16 = vadd.f32 %v2522_v38, %v1990_v54  ;;  %v1542_v50 = vsel %vm1274_vm13, %v6935_v63, 0.0  ;;  %v2330_v24 = vsel %vm2062_vm14, %v6942_v0, 0.0  ;;  %vm2850_vm15 = vcmp.eq.s32.totalorder %v4825_v55, %v6947_v6  ;;  %v8032_v38 = vld [vmem:[#allocation16_spill] sm:$0xff] }
 0x2b4   : > { %3893 = vmatpush.msrb.mxu2 %v3498_v8  ;;  %v1798_v32 = vadd.f32 %v1542_v50, %v754_v49  ;;  %v3118_v56 = vsel %vm2850_vm15, %v6959_v12, 0.0  ;;  %vm548_vm0 = vcmp.eq.s32.totalorder %v4829_v62, %v6928_v1  ;;  %vm1338_vm1 = vcmp.eq.s32.totalorder %v4829_v62, %v6933_v4 }
 0x2b5   : > { %v3566_v29 = vadd.f32 %v3310_v14, %v2778_v16  ;;  %v818_v44 = vsel %vm548_vm0, %v6931_v35, 0.0  ;;  %v1606_v20 = vsel %vm1338_vm1, %v6935_v63, 0.0  ;;  %vm2126_vm2 = vcmp.eq.s32.totalorder %v4829_v62, %v6940_v33 }
 0x2b6   : > { %v2586_v52 = vadd.f32 %v2330_v24, %v1798_v32  ;;  %v1862_v55 = vadd.f32 %v1606_v20, %v818_v44  ;;  %v2394_v42 = vsel %vm2126_vm2, %v6942_v0, 0.0  ;;  %vm2914_vm3 = vcmp.eq.s32.totalorder %v4829_v62, %v6947_v6 }
 0x2b7   : > { %3912 = vmatpush.msrb.mxu3 %v3566_v29  ;;  %v3182_v9 = vsel %vm2914_vm3, %v6959_v12, 0.0  ;;  %vm604_vm4 = vcmp.eq.s32.totalorder %v7997_v61, %v6928_v1  ;;  %vm1394_vm5 = vcmp.eq.s32.totalorder %v7997_v61, %v6933_v4  ;;  %vm2182_vm6 = vcmp.eq.s32.totalorder %v7997_v61, %v6940_v33  ;;  %v8033_v29 = vld [vmem:[#allocation17_spill] sm:$0xff] }
 0x2b8   : > { %v3374_v34 = vadd.f32 %v3118_v56, %v2586_v52  ;;  %v2650_v30 = vadd.f32 %v2394_v42, %v1862_v55  ;;  %v874_v58 = vsel %vm604_vm4, %v6931_v35, 0.0  ;;  %v1662_v53 = vsel %vm1394_vm5, %v6935_v63, 0.0 }
 0x2b9   : > { %v1918_v47 = vadd.f32 %v1662_v53, %v874_v58  ;;  %v2450_v62 = vsel %vm2182_vm6, %v6942_v0, 0.0  ;;  %vm2970_vm7 = vcmp.eq.s32.totalorder %v7997_v61, %v6947_v6  ;;  %vm672_vm8 = vcmp.eq.s32.totalorder %v7998_v25, %v6928_v1 }
 0x2ba   : > { %3852 = vmatpush.msrb.mxu0 %v3374_v34  ;;  %v3438_v13 = vadd.f32 %v3182_v9, %v2650_v30  ;;  %v3238_v21 = vsel %vm2970_vm7, %v6959_v12, 0.0  ;;  %v942_v3 = vsel %vm672_vm8, %v6931_v35, 0.0  ;;  %vm1462_vm9 = vcmp.eq.s32.totalorder %v7998_v25, %v6933_v4  ;;  %v8034_v30 = vld [vmem:[#allocation18_spill] sm:$0xff] }
 0x2bb   : > { %v2706_v40 = vadd.f32 %v2450_v62, %v1918_v47  ;;  %v1730_v45 = vsel %vm1462_vm9, %v6935_v63, 0.0  ;;  %vm2250_vm10 = vcmp.eq.s32.totalorder %v7998_v25, %v6940_v33  ;;  %vm3038_vm11 = vcmp.eq.s32.totalorder %v7998_v25, %v6947_v6 }
 0x2bc   : > { %3872 = vmatpush.msrb.mxu1 %v3438_v13  ;;  %v1986_v61 = vadd.f32 %v1730_v45, %v942_v3  ;;  %v2518_v5 = vsel %vm2250_vm10, %v6942_v0, 0.0  ;;  %v3306_v2 = vsel %vm3038_vm11, %v6959_v12, 0.0  ;;  %vm480_vm12 = vcmp.eq.s32.totalorder %v7999_v41, %v6928_v1 }
 0x2bd   : > { %v3494_v59 = vadd.f32 %v3238_v21, %v2706_v40  ;;  %v750_v36 = vsel %vm480_vm12, %v6931_v35, 0.0  ;;  %vm1270_vm13 = vcmp.eq.s32.totalorder %v7999_v41, %v6933_v4  ;;  %vm2058_vm14 = vcmp.eq.s32.totalorder %v7999_v41, %v6940_v33  ;;  %v8035_v40 = vld [vmem:[#allocation19_spill] sm:$0xff] }
 0x2be   : > { %v2774_v18 = vadd.f32 %v2518_v5, %v1986_v61  ;;  %v1538_v25 = vsel %vm1270_vm13, %v6935_v63, 0.0  ;;  %v2326_v57 = vsel %vm2058_vm14, %v6942_v0, 0.0  ;;  %vm2846_vm15 = vcmp.eq.s32.totalorder %v7999_v41, %v6947_v6 }
 0x2bf   : > { %3894 = vmatpush.msrb.mxu2 %v3494_v59  ;;  %v1794_v11 = vadd.f32 %v1538_v25, %v750_v36  ;;  %v3114_v46 = vsel %vm2846_vm15, %v6959_v12, 0.0  ;;  %vm544_vm0 = vcmp.eq.s32.totalorder %v8030_v27, %v6928_v1  ;;  %vm1334_vm1 = vcmp.eq.s32.totalorder %v8030_v27, %v6933_v4 }
 0x2c0   : > { %v3562_v60 = vadd.f32 %v3306_v2, %v2774_v18  ;;  %v814_v17 = vsel %vm544_vm0, %v6931_v35, 0.0  ;;  %v1602_v15 = vsel %vm1334_vm1, %v6935_v63, 0.0  ;;  %vm2122_vm2 = vcmp.eq.s32.totalorder %v8030_v27, %v6940_v33  ;;  %v8036_v18 = vld [vmem:[#allocation20_spill] sm:$0xff] }
 0x2c1   : > { %v2582_v39 = vadd.f32 %v2326_v57, %v1794_v11  ;;  %v1858_v41 = vadd.f32 %v1602_v15, %v814_v17  ;;  %v2390_v37 = vsel %vm2122_vm2, %v6942_v0, 0.0  ;;  %vm2910_vm3 = vcmp.eq.s32.totalorder %v8030_v27, %v6947_v6 }
 0x2c2   : > { %3913 = vmatpush.msrb.mxu3 %v3562_v60  ;;  %v3178_v26 = vsel %vm2910_vm3, %v6959_v12, 0.0  ;;  %vm600_vm4 = vcmp.eq.s32.totalorder %v8031_v51, %v6928_v1  ;;  %vm1390_vm5 = vcmp.eq.s32.totalorder %v8031_v51, %v6933_v4  ;;  %vm2178_vm6 = vcmp.eq.s32.totalorder %v8031_v51, %v6940_v33 }
 0x2c3   : > { %v3370_v48 = vadd.f32 %v3114_v46, %v2582_v39  ;;  %v2646_v31 = vadd.f32 %v2390_v37, %v1858_v41  ;;  %v870_v43 = vsel %vm600_vm4, %v6931_v35, 0.0  ;;  %v1658_v19 = vsel %vm1390_vm5, %v6935_v63, 0.0  ;;  %v8037_v39 = vld [vmem:[#allocation21_spill] sm:$0xff] }
 0x2c4   : > { %v1914_v28 = vadd.f32 %v1658_v19, %v870_v43  ;;  %v2446_v54 = vsel %vm2178_vm6, %v6942_v0, 0.0  ;;  %vm2966_vm7 = vcmp.eq.s32.totalorder %v8031_v51, %v6947_v6  ;;  %vm668_vm8 = vcmp.eq.s32.totalorder %v8032_v38, %v6928_v1  ;;  %v8038_v19 = vld [vmem:[#allocation22_spill] sm:$0xff] }
 0x2c5   : > { %3853 = vmatpush.msrb.mxu0 %v3370_v48  ;;  %v3434_v14 = vadd.f32 %v3178_v26, %v2646_v31  ;;  %v3234_v8 = vsel %vm2966_vm7, %v6959_v12, 0.0  ;;  %v938_v49 = vsel %vm668_vm8, %v6931_v35, 0.0  ;;  %vm1458_vm9 = vcmp.eq.s32.totalorder %v8032_v38, %v6933_v4 }
 0x2c6   : > { %v2702_v16 = vadd.f32 %v2446_v54, %v1914_v28  ;;  %v1726_v50 = vsel %vm1458_vm9, %v6935_v63, 0.0  ;;  %vm2246_vm10 = vcmp.eq.s32.totalorder %v8032_v38, %v6940_v33  ;;  %vm3034_vm11 = vcmp.eq.s32.totalorder %v8032_v38, %v6947_v6 }
 0x2c7   : > { %3873 = vmatpush.msrb.mxu1 %v3434_v14  ;;  %v1982_v24 = vadd.f32 %v1726_v50, %v938_v49  ;;  %v2514_v32 = vsel %vm2246_vm10, %v6942_v0, 0.0  ;;  %v3302_v56 = vsel %vm3034_vm11, %v6959_v12, 0.0  ;;  %vm476_vm12 = vcmp.eq.s32.totalorder %v8033_v29, %v6928_v1  ;;  %v8039_v50 = vld [vmem:[#allocation23_spill] sm:$0xff] }
 0x2c8   : > { %v3490_v44 = vadd.f32 %v3234_v8, %v2702_v16  ;;  %v746_v20 = vsel %vm476_vm12, %v6931_v35, 0.0  ;;  %vm1266_vm13 = vcmp.eq.s32.totalorder %v8033_v29, %v6933_v4  ;;  %vm2054_vm14 = vcmp.eq.s32.totalorder %v8033_v29, %v6940_v33 }
 0x2c9   : > { %v2770_v52 = vadd.f32 %v2514_v32, %v1982_v24  ;;  %v1534_v55 = vsel %vm1266_vm13, %v6935_v63, 0.0  ;;  %v2322_v42 = vsel %vm2054_vm14, %v6942_v0, 0.0  ;;  %vm2842_vm15 = vcmp.eq.s32.totalorder %v8033_v29, %v6947_v6 }
 0x2ca   : > { %3895 = vmatpush.msrb.mxu2 %v3490_v44  ;;  %v1790_v9 = vadd.f32 %v1534_v55, %v746_v20  ;;  %v3110_v34 = vsel %vm2842_vm15, %v6959_v12, 0.0  ;;  %vm540_vm0 = vcmp.eq.s32.totalorder %v8034_v30, %v6928_v1  ;;  %vm1330_vm1 = vcmp.eq.s32.totalorder %v8034_v30, %v6933_v4 }
 0x2cb   : > { %v3558_v58 = vadd.f32 %v3302_v56, %v2770_v52  ;;  %v810_v53 = vsel %vm540_vm0, %v6931_v35, 0.0  ;;  %v1598_v47 = vsel %vm1330_vm1, %v6935_v63, 0.0  ;;  %vm2118_vm2 = vcmp.eq.s32.totalorder %v8034_v30, %v6940_v33  ;;  %v8040_v52 = vld [vmem:[#allocation24_spill] sm:$0xff] }
 0x2cc   : > { %v2578_v62 = vadd.f32 %v2322_v42, %v1790_v9  ;;  %v1854_v13 = vadd.f32 %v1598_v47, %v810_v53  ;;  %v2386_v21 = vsel %vm2118_vm2, %v6942_v0, 0.0  ;;  %vm2906_vm3 = vcmp.eq.s32.totalorder %v8034_v30, %v6947_v6 }
 0x2cd   : > { %3914 = vmatpush.msrb.mxu3 %v3558_v58  ;;  %v3174_v3 = vsel %vm2906_vm3, %v6959_v12, 0.0  ;;  %vm596_vm4 = vcmp.eq.s32.totalorder %v8035_v40, %v6928_v1  ;;  %vm1386_vm5 = vcmp.eq.s32.totalorder %v8035_v40, %v6933_v4  ;;  %vm2174_vm6 = vcmp.eq.s32.totalorder %v8035_v40, %v6940_v33 }
 0x2ce   : > { %v3366_v45 = vadd.f32 %v3110_v34, %v2578_v62  ;;  %v2642_v61 = vadd.f32 %v2386_v21, %v1854_v13  ;;  %v866_v5 = vsel %vm596_vm4, %v6931_v35, 0.0  ;;  %v1654_v2 = vsel %vm1386_vm5, %v6935_v63, 0.0  ;;  %v8041_v62 = vld [vmem:[#allocation25_spill] sm:$0xff] }
 0x2cf   : > { %v1910_v59 = vadd.f32 %v1654_v2, %v866_v5  ;;  %v2442_v36 = vsel %vm2174_vm6, %v6942_v0, 0.0  ;;  %vm2962_vm7 = vcmp.eq.s32.totalorder %v8035_v40, %v6947_v6  ;;  %vm664_vm8 = vcmp.eq.s32.totalorder %v8036_v18, %v6928_v1  ;;  %v8042_v2 = vld [vmem:[#allocation26_spill] sm:$0xff] }
 0x2d0   : > { %3854 = vmatpush.msrb.mxu0 %v3366_v45  ;;  %v3430_v25 = vadd.f32 %v3174_v3, %v2642_v61  ;;  %v3230_v57 = vsel %vm2962_vm7, %v6959_v12, 0.0  ;;  %v934_v11 = vsel %vm664_vm8, %v6931_v35, 0.0  ;;  %vm1454_vm9 = vcmp.eq.s32.totalorder %v8036_v18, %v6933_v4 }
 0x2d1   : > { %v2698_v46 = vadd.f32 %v2442_v36, %v1910_v59  ;;  %v1722_v27 = vsel %vm1454_vm9, %v6935_v63, 0.0  ;;  %vm2242_vm10 = vcmp.eq.s32.totalorder %v8036_v18, %v6940_v33  ;;  %vm3030_vm11 = vcmp.eq.s32.totalorder %v8036_v18, %v6947_v6 }
 0x2d2   : > { %3874 = vmatpush.msrb.mxu1 %v3430_v25  ;;  %v1978_v60 = vadd.f32 %v1722_v27, %v934_v11  ;;  %v2510_v17 = vsel %vm2242_vm10, %v6942_v0, 0.0  ;;  %v3298_v15 = vsel %vm3030_vm11, %v6959_v12, 0.0  ;;  %vm472_vm12 = vcmp.eq.s32.totalorder %v8037_v39, %v6928_v1  ;;  %v8043_v27 = vld [vmem:[#allocation27_spill] sm:$0xff] }
 0x2d3   : > { %v3486_v41 = vadd.f32 %v3230_v57, %v2698_v46  ;;  %v742_v37 = vsel %vm472_vm12, %v6931_v35, 0.0  ;;  %vm1262_vm13 = vcmp.eq.s32.totalorder %v8037_v39, %v6933_v4  ;;  %vm2050_vm14 = vcmp.eq.s32.totalorder %v8037_v39, %v6940_v33 }
 0x2d4   : > { %v2766_v26 = vadd.f32 %v2510_v17, %v1978_v60  ;;  %v1530_v51 = vsel %vm1262_vm13, %v6935_v63, 0.0  ;;  %v2318_v48 = vsel %vm2050_vm14, %v6942_v0, 0.0  ;;  %vm2838_vm15 = vcmp.eq.s32.totalorder %v8037_v39, %v6947_v6 }
 0x2d5   : > { %3896 = vmatpush.msrb.mxu2 %v3486_v41  ;;  %v1786_v31 = vadd.f32 %v1530_v51, %v742_v37  ;;  %v3106_v43 = vsel %vm2838_vm15, %v6959_v12, 0.0  ;;  %vm536_vm0 = vcmp.eq.s32.totalorder %v8038_v19, %v6928_v1  ;;  %vm1326_vm1 = vcmp.eq.s32.totalorder %v8038_v19, %v6933_v4 }
 0x2d6   : > { %v3554_v28 = vadd.f32 %v3298_v15, %v2766_v26  ;;  %v806_v54 = vsel %vm536_vm0, %v6931_v35, 0.0  ;;  %v1594_v38 = vsel %vm1326_vm1, %v6935_v63, 0.0  ;;  %vm2114_vm2 = vcmp.eq.s32.totalorder %v8038_v19, %v6940_v33  ;;  %v8044_v26 = vld [vmem:[#allocation28_spill] sm:$0xff] }
 0x2d7   : > { %v2574_v14 = vadd.f32 %v2318_v48, %v1786_v31  ;;  %v1850_v8 = vadd.f32 %v1594_v38, %v806_v54  ;;  %v2382_v49 = vsel %vm2114_vm2, %v6942_v0, 0.0  ;;  %vm2902_vm3 = vcmp.eq.s32.totalorder %v8038_v19, %v6947_v6 }
 0x2d8   : > { %3915 = vmatpush.msrb.mxu3 %v3554_v28  ;;  %v3170_v16 = vsel %vm2902_vm3, %v6959_v12, 0.0  ;;  %vm592_vm4 = vcmp.eq.s32.totalorder %v8039_v50, %v6928_v1  ;;  %vm1382_vm5 = vcmp.eq.s32.totalorder %v8039_v50, %v6933_v4  ;;  %vm2170_vm6 = vcmp.eq.s32.totalorder %v8039_v50, %v6940_v33 }
 0x2d9   : > { %v3362_v24 = vadd.f32 %v3106_v43, %v2574_v14  ;;  %v2638_v32 = vadd.f32 %v2382_v49, %v1850_v8  ;;  %v862_v56 = vsel %vm592_vm4, %v6931_v35, 0.0  ;;  %v1650_v29 = vsel %vm1382_vm5, %v6935_v63, 0.0  ;;  %v8045_v14 = vld [vmem:[#allocation29_spill] sm:$0xff] }
 0x2da   : > { %v1906_v44 = vadd.f32 %v1650_v29, %v862_v56  ;;  %v2438_v20 = vsel %vm2170_vm6, %v6942_v0, 0.0  ;;  %vm2958_vm7 = vcmp.eq.s32.totalorder %v8039_v50, %v6947_v6  ;;  %vm660_vm8 = vcmp.eq.s32.totalorder %v8040_v52, %v6928_v1  ;;  %v8046_v29 = vld [vmem:[#allocation30_spill] sm:$0xff] }
 0x2db   : > { %3855 = vmatpush.msrb.mxu0 %v3362_v24  ;;  %v3426_v55 = vadd.f32 %v3170_v16, %v2638_v32  ;;  %v3226_v42 = vsel %vm2958_vm7, %v6959_v12, 0.0  ;;  %v930_v9 = vsel %vm660_vm8, %v6931_v35, 0.0  ;;  %vm1450_vm9 = vcmp.eq.s32.totalorder %v8040_v52, %v6933_v4 }
 0x2dc   : > { %v2694_v34 = vadd.f32 %v2438_v20, %v1906_v44  ;;  %v1718_v30 = vsel %vm1450_vm9, %v6935_v63, 0.0  ;;  %vm2238_vm10 = vcmp.eq.s32.totalorder %v8040_v52, %v6940_v33  ;;  %vm3026_vm11 = vcmp.eq.s32.totalorder %v8040_v52, %v6947_v6 }
 0x2dd   : > { %3875 = vmatpush.msrb.mxu1 %v3426_v55  ;;  %v1974_v58 = vadd.f32 %v1718_v30, %v930_v9  ;;  %v2506_v53 = vsel %vm2238_vm10, %v6942_v0, 0.0  ;;  %v3294_v47 = vsel %vm3026_vm11, %v6959_v12, 0.0  ;;  %vm468_vm12 = vcmp.eq.s32.totalorder %v8041_v62, %v6928_v1  ;;  %v8047_v30 = vld [vmem:[#allocation31_spill] sm:$0xff] }
 0x2de   : > { %v3482_v13 = vadd.f32 %v3226_v42, %v2694_v34  ;;  %v738_v21 = vsel %vm468_vm12, %v6931_v35, 0.0  ;;  %vm1258_vm13 = vcmp.eq.s32.totalorder %v8041_v62, %v6933_v4  ;;  %vm2046_vm14 = vcmp.eq.s32.totalorder %v8041_v62, %v6940_v33 }
 0x2df   : > { %v2762_v3 = vadd.f32 %v2506_v53, %v1974_v58  ;;  %v1526_v40 = vsel %vm1258_vm13, %v6935_v63, 0.0  ;;  %v2314_v45 = vsel %vm2046_vm14, %v6942_v0, 0.0  ;;  %vm2834_vm15 = vcmp.eq.s32.totalorder %v8041_v62, %v6947_v6 }
 0x2e0   : > { %3897 = vmatpush.msrb.mxu2 %v3482_v13  ;;  %v1782_v61 = vadd.f32 %v1526_v40, %v738_v21  ;;  %v3102_v5 = vsel %vm2834_vm15, %v6959_v12, 0.0  ;;  %vm532_vm0 = vcmp.eq.s32.totalorder %v8042_v2, %v6928_v1  ;;  %vm1322_vm1 = vcmp.eq.s32.totalorder %v8042_v2, %v6933_v4 }
 0x2e1   : > { %v3550_v59 = vadd.f32 %v3294_v47, %v2762_v3  ;;  %v802_v36 = vsel %vm532_vm0, %v6931_v35, 0.0  ;;  %v1590_v18 = vsel %vm1322_vm1, %v6935_v63, 0.0  ;;  %vm2110_vm2 = vcmp.eq.s32.totalorder %v8042_v2, %v6940_v33  ;;  %v8048_v3 = vld [vmem:[#allocation32_spill] sm:$0xff] }
 0x2e2   : > { %v2570_v25 = vadd.f32 %v2314_v45, %v1782_v61  ;;  %v1846_v57 = vadd.f32 %v1590_v18, %v802_v36  ;;  %v2378_v11 = vsel %vm2110_vm2, %v6942_v0, 0.0  ;;  %vm2898_vm3 = vcmp.eq.s32.totalorder %v8042_v2, %v6947_v6 }
 0x2e3   : > { %3916 = vmatpush.msrb.mxu3 %v3550_v59  ;;  %v3166_v46 = vsel %vm2898_vm3, %v6959_v12, 0.0  ;;  %vm588_vm4 = vcmp.eq.s32.totalorder %v8043_v27, %v6928_v1  ;;  %vm1378_vm5 = vcmp.eq.s32.totalorder %v8043_v27, %v6933_v4  ;;  %vm2166_vm6 = vcmp.eq.s32.totalorder %v8043_v27, %v6940_v33 }
 0x2e4   : > { %v3358_v60 = vadd.f32 %v3102_v5, %v2570_v25  ;;  %v2634_v17 = vadd.f32 %v2378_v11, %v1846_v57  ;;  %v858_v15 = vsel %vm588_vm4, %v6931_v35, 0.0  ;;  %v1646_v39 = vsel %vm1378_vm5, %v6935_v63, 0.0  ;;  %v8049_v25 = vld [vmem:[#allocation33_spill] sm:$0xff] }
 0x2e5   : > { %v1902_v41 = vadd.f32 %v1646_v39, %v858_v15  ;;  %v2434_v37 = vsel %vm2166_vm6, %v6942_v0, 0.0  ;;  %vm2954_vm7 = vcmp.eq.s32.totalorder %v8043_v27, %v6947_v6  ;;  %vm656_vm8 = vcmp.eq.s32.totalorder %v8044_v26, %v6928_v1  ;;  %v8050_v39 = vld [vmem:[#allocation34_spill] sm:$0xff] }
 0x2e6   : > { %3856 = vmatpush.msrb.mxu0 %v3358_v60  ;;  %v3422_v51 = vadd.f32 %v3166_v46, %v2634_v17  ;;  %v3222_v48 = vsel %vm2954_vm7, %v6959_v12, 0.0  ;;  %v926_v31 = vsel %vm656_vm8, %v6931_v35, 0.0  ;;  %vm1446_vm9 = vcmp.eq.s32.totalorder %v8044_v26, %v6933_v4 }
 0x2e7   : > { %v2690_v43 = vadd.f32 %v2434_v37, %v1902_v41  ;;  %v1714_v19 = vsel %vm1446_vm9, %v6935_v63, 0.0  ;;  %vm2234_vm10 = vcmp.eq.s32.totalorder %v8044_v26, %v6940_v33  ;;  %vm3022_vm11 = vcmp.eq.s32.totalorder %v8044_v26, %v6947_v6 }
 0x2e8   : > { %3876 = vmatpush.msrb.mxu1 %v3422_v51  ;;  %v1970_v28 = vadd.f32 %v1714_v19, %v926_v31  ;;  %v2502_v54 = vsel %vm2234_vm10, %v6942_v0, 0.0  ;;  %v3290_v38 = vsel %vm3022_vm11, %v6959_v12, 0.0  ;;  %vm464_vm12 = vcmp.eq.s32.totalorder %v8045_v14, %v6928_v1  ;;  %v8051_v19 = vld [vmem:[#allocation35_spill] sm:$0xff] }
 0x2e9   : > { %v3478_v8 = vadd.f32 %v3222_v48, %v2690_v43  ;;  %v734_v49 = vsel %vm464_vm12, %v6931_v35, 0.0  ;;  %vm1254_vm13 = vcmp.eq.s32.totalorder %v8045_v14, %v6933_v4  ;;  %vm2042_vm14 = vcmp.eq.s32.totalorder %v8045_v14, %v6940_v33 }
 0x2ea   : > { %v2758_v16 = vadd.f32 %v2502_v54, %v1970_v28  ;;  %v1522_v50 = vsel %vm1254_vm13, %v6935_v63, 0.0  ;;  %v2310_v24 = vsel %vm2042_vm14, %v6942_v0, 0.0  ;;  %vm2830_vm15 = vcmp.eq.s32.totalorder %v8045_v14, %v6947_v6 }
 0x2eb   : > { %3898 = vmatpush.msrb.mxu2 %v3478_v8  ;;  %v1778_v32 = vadd.f32 %v1522_v50, %v734_v49  ;;  %v3098_v56 = vsel %vm2830_vm15, %v6959_v12, 0.0  ;;  %vm528_vm0 = vcmp.eq.s32.totalorder %v8046_v29, %v6928_v1  ;;  %vm1318_vm1 = vcmp.eq.s32.totalorder %v8046_v29, %v6933_v4 }
 0x2ec   : > { %v3546_v44 = vadd.f32 %v3290_v38, %v2758_v16  ;;  %v798_v20 = vsel %vm528_vm0, %v6931_v35, 0.0  ;;  %v1586_v52 = vsel %vm1318_vm1, %v6935_v63, 0.0  ;;  %vm2106_vm2 = vcmp.eq.s32.totalorder %v8046_v29, %v6940_v33  ;;  %v8052_v16 = vld [vmem:[#allocation36_spill] sm:$0xff] }
 0x2ed   : > { %v2566_v55 = vadd.f32 %v2310_v24, %v1778_v32  ;;  %v1842_v42 = vadd.f32 %v1586_v52, %v798_v20  ;;  %v2374_v9 = vsel %vm2106_vm2, %v6942_v0, 0.0  ;;  %vm2894_vm3 = vcmp.eq.s32.totalorder %v8046_v29, %v6947_v6 }
 0x2ee   : > { %3917 = vmatpush.msrb.mxu3 %v3546_v44  ;;  %v3162_v34 = vsel %vm2894_vm3, %v6959_v12, 0.0  ;;  %vm584_vm4 = vcmp.eq.s32.totalorder %v8047_v30, %v6928_v1  ;;  %vm1374_vm5 = vcmp.eq.s32.totalorder %v8047_v30, %v6933_v4  ;;  %vm2162_vm6 = vcmp.eq.s32.totalorder %v8047_v30, %v6940_v33 }
 0x2ef   : > { %v3354_v58 = vadd.f32 %v3098_v56, %v2566_v55  ;;  %v2630_v53 = vadd.f32 %v2374_v9, %v1842_v42  ;;  %v854_v47 = vsel %vm584_vm4, %v6931_v35, 0.0  ;;  %v1642_v62 = vsel %vm1374_vm5, %v6935_v63, 0.0  ;;  %v8053_v55 = vld [vmem:[#allocation37_spill] sm:$0xff] }
 0x2f0   : > { %v1898_v13 = vadd.f32 %v1642_v62, %v854_v47  ;;  %v2430_v21 = vsel %vm2162_vm6, %v6942_v0, 0.0  ;;  %vm2950_vm7 = vcmp.eq.s32.totalorder %v8047_v30, %v6947_v6  ;;  %vm652_vm8 = vcmp.eq.s32.totalorder %v8048_v3, %v6928_v1  ;;  %v8054_v62 = vld [vmem:[#allocation38_spill] sm:$0xff] }
 0x2f1   : > { %3857 = vmatpush.msrb.mxu0 %v3354_v58  ;;  %v3418_v40 = vadd.f32 %v3162_v34, %v2630_v53  ;;  %v3218_v45 = vsel %vm2950_vm7, %v6959_v12, 0.0  ;;  %v922_v61 = vsel %vm652_vm8, %v6931_v35, 0.0  ;;  %vm1442_vm9 = vcmp.eq.s32.totalorder %v8048_v3, %v6933_v4 }
 0x2f2   : > { %v2686_v5 = vadd.f32 %v2430_v21, %v1898_v13  ;;  %v1710_v2 = vsel %vm1442_vm9, %v6935_v63, 0.0  ;;  %vm2230_vm10 = vcmp.eq.s32.totalorder %v8048_v3, %v6940_v33  ;;  %vm3018_vm11 = vcmp.eq.s32.totalorder %v8048_v3, %v6947_v6 }
 0x2f3   : > { %3877 = vmatpush.msrb.mxu1 %v3418_v40  ;;  %v1966_v59 = vadd.f32 %v1710_v2, %v922_v61  ;;  %v2498_v36 = vsel %vm2230_vm10, %v6942_v0, 0.0  ;;  %v3286_v18 = vsel %vm3018_vm11, %v6959_v12, 0.0  ;;  %vm460_vm12 = vcmp.eq.s32.totalorder %v8049_v25, %v6928_v1  ;;  %v8055_v2 = vld [vmem:[#allocation39_spill] sm:$0xff] }
 0x2f4   : > { %v3474_v57 = vadd.f32 %v3218_v45, %v2686_v5  ;;  %v730_v11 = vsel %vm460_vm12, %v6931_v35, 0.0  ;;  %vm1250_vm13 = vcmp.eq.s32.totalorder %v8049_v25, %v6933_v4  ;;  %vm2038_vm14 = vcmp.eq.s32.totalorder %v8049_v25, %v6940_v33 }
 0x2f5   : > { %v2754_v46 = vadd.f32 %v2498_v36, %v1966_v59  ;;  %v1518_v27 = vsel %vm1250_vm13, %v6935_v63, 0.0  ;;  %v2306_v60 = vsel %vm2038_vm14, %v6942_v0, 0.0  ;;  %vm2826_vm15 = vcmp.eq.s32.totalorder %v8049_v25, %v6947_v6 }
 0x2f6   : > { %3899 = vmatpush.msrb.mxu2 %v3474_v57  ;;  %v1774_v17 = vadd.f32 %v1518_v27, %v730_v11  ;;  %v3094_v15 = vsel %vm2826_vm15, %v6959_v12, 0.0  ;;  %vm524_vm0 = vcmp.eq.s32.totalorder %v8050_v39, %v6928_v1  ;;  %vm1314_vm1 = vcmp.eq.s32.totalorder %v8050_v39, %v6933_v4 }
 0x2f7   : > { %v3542_v41 = vadd.f32 %v3286_v18, %v2754_v46  ;;  %v794_v37 = vsel %vm524_vm0, %v6931_v35, 0.0  ;;  %v1582_v26 = vsel %vm1314_vm1, %v6935_v63, 0.0  ;;  %vm2102_vm2 = vcmp.eq.s32.totalorder %v8050_v39, %v6940_v33  ;;  %v8056_v46 = vld [vmem:[#allocation40_spill] sm:$0xff] }
 0x2f8   : > { %v2562_v51 = vadd.f32 %v2306_v60, %v1774_v17  ;;  %v1838_v48 = vadd.f32 %v1582_v26, %v794_v37  ;;  %v2370_v31 = vsel %vm2102_vm2, %v6942_v0, 0.0  ;;  %vm2890_vm3 = vcmp.eq.s32.totalorder %v8050_v39, %v6947_v6 }
 0x2f9   : > { %3918 = vmatpush.msrb.mxu3 %v3542_v41  ;;  %v3158_v43 = vsel %vm2890_vm3, %v6959_v12, 0.0  ;;  %vm580_vm4 = vcmp.eq.s32.totalorder %v8051_v19, %v6928_v1  ;;  %vm1370_vm5 = vcmp.eq.s32.totalorder %v8051_v19, %v6933_v4  ;;  %vm2158_vm6 = vcmp.eq.s32.totalorder %v8051_v19, %v6940_v33 }
 0x2fa   : > { %v3350_v28 = vadd.f32 %v3094_v15, %v2562_v51  ;;  %v2626_v54 = vadd.f32 %v2370_v31, %v1838_v48  ;;  %v850_v38 = vsel %vm580_vm4, %v6931_v35, 0.0  ;;  %v1638_v14 = vsel %vm1370_vm5, %v6935_v63, 0.0  ;;  %v8057_v51 = vld [vmem:[#allocation41_spill] sm:$0xff] }
 0x2fb   : > { %v1894_v8 = vadd.f32 %v1638_v14, %v850_v38  ;;  %v2426_v49 = vsel %vm2158_vm6, %v6942_v0, 0.0  ;;  %vm2946_vm7 = vcmp.eq.s32.totalorder %v8051_v19, %v6947_v6  ;;  %vm648_vm8 = vcmp.eq.s32.totalorder %v8052_v16, %v6928_v1  ;;  %v3643_v19 = vpop.f32.mrf.mxu1 }
 0x2fc   : > { %3858 = vmatpush.msrb.mxu0 %v3350_v28  ;;  %v3414_v50 = vadd.f32 %v3158_v43, %v2626_v54  ;;  %v3214_v24 = vsel %vm2946_vm7, %v6959_v12, 0.0  ;;  %v918_v32 = vsel %vm648_vm8, %v6931_v35, 0.0  ;;  %vm1438_vm9 = vcmp.eq.s32.totalorder %v8052_v16, %v6933_v4  ;;  %v7721_v43 = vpop.f32.mrf.mxu0 }
 0x2fd   : > { %v2682_v56 = vadd.f32 %v2426_v49, %v1894_v8  ;;  %v1706_v29 = vsel %vm1438_vm9, %v6935_v63, 0.0  ;;  %vm2226_vm10 = vcmp.eq.s32.totalorder %v8052_v16, %v6940_v33  ;;  %vm3014_vm11 = vcmp.eq.s32.totalorder %v8052_v16, %v6947_v6  ;;  %v3663_v49 = vpop.f32.mrf.mxu2 }
 0x2fe   : > { %3878 = vmatpush.msrb.mxu1 %v3414_v50  ;;  %v1962_v44 = vadd.f32 %v1706_v29, %v918_v32  ;;  %v2494_v20 = vsel %vm2226_vm10, %v6942_v0, 0.0  ;;  %v3282_v52 = vsel %vm3014_vm11, %v6959_v12, 0.0  ;;  %vm456_vm12 = vcmp.eq.s32.totalorder %v8053_v55, %v6928_v1  ;;  %v4163_v50 = vld.sshfl [vmem:[#allocation1 + $0x10] sm:$0xff pattern:$0x75316420] }
 0x2ff   : > { %v3470_v42 = vadd.f32 %v3214_v24, %v2682_v56  ;;  %v726_v9 = vsel %vm456_vm12, %v6931_v35, 0.0  ;;  %vm1246_vm13 = vcmp.eq.s32.totalorder %v8053_v55, %v6933_v4  ;;  %vm2034_vm14 = vcmp.eq.s32.totalorder %v8053_v55, %v6940_v33 }
 0x300   : > { %v2750_v34 = vadd.f32 %v2494_v20, %v1962_v44  ;;  %v1514_v30 = vsel %vm1246_vm13, %v6935_v63, 0.0  ;;  %v2302_v58 = vsel %vm2034_vm14, %v6942_v0, 0.0  ;;  %vm2822_vm15 = vcmp.eq.s32.totalorder %v8053_v55, %v6947_v6  ;;  %v3683_v20 = vpop.f32.mrf.mxu3 }
 0x301   : > { %3900 = vmatpush.msrb.mxu2 %v3470_v42  ;;  %v1770_v53 = vadd.f32 %v1514_v30, %v726_v9  ;;  %v3090_v47 = vsel %vm2822_vm15, %v6959_v12, 0.0  ;;  %vm520_vm0 = vcmp.eq.s32.totalorder %v8054_v62, %v6928_v1  ;;  %vm1310_vm1 = vcmp.eq.s32.totalorder %v8054_v62, %v6933_v4 }
 0x302   : > { %v3538_v13 = vadd.f32 %v3282_v52, %v2750_v34  ;;  %v790_v21 = vsel %vm520_vm0, %v6931_v35, 0.0  ;;  %v1578_v3 = vsel %vm1310_vm1, %v6935_v63, 0.0  ;;  %vm2098_vm2 = vcmp.eq.s32.totalorder %v8054_v62, %v6940_v33 }
 0x303   : > { %v2558_v40 = vadd.f32 %v2302_v58, %v1770_v53  ;;  %v1834_v45 = vadd.f32 %v1578_v3, %v790_v21  ;;  %v2366_v61 = vsel %vm2098_vm2, %v6942_v0, 0.0  ;;  %vm2886_vm3 = vcmp.eq.s32.totalorder %v8054_v62, %v6947_v6 }
 0x304   : > { %3919 = vmatpush.msrb.mxu3 %v3538_v13  ;;  %v3154_v5 = vsel %vm2886_vm3, %v6959_v12, 0.0  ;;  %vm576_vm4 = vcmp.eq.s32.totalorder %v8055_v2, %v6928_v1  ;;  %vm1366_vm5 = vcmp.eq.s32.totalorder %v8055_v2, %v6933_v4  ;;  %vm2154_vm6 = vcmp.eq.s32.totalorder %v8055_v2, %v6940_v33 }
 0x305   : > { %v3346_v59 = vadd.f32 %v3090_v47, %v2558_v40  ;;  %v2622_v36 = vadd.f32 %v2366_v61, %v1834_v45  ;;  %v846_v18 = vsel %vm576_vm4, %v6931_v35, 0.0  ;;  %v1634_v25 = vsel %vm1366_vm5, %v6935_v63, 0.0  ;;  %v3703_v40 = vpop.f32.mrf.mxu0  ;;  %v3723_v45 = vpop.f32.mrf.mxu1 }
 0x306   : > { %v1890_v57 = vadd.f32 %v1634_v25, %v846_v18  ;;  %v2422_v11 = vsel %vm2154_vm6, %v6942_v0, 0.0  ;;  %vm2942_vm7 = vcmp.eq.s32.totalorder %v8055_v2, %v6947_v6  ;;  %vm644_vm8 = vcmp.eq.s32.totalorder %v8056_v46, %v6928_v1  ;;  %v4164_v25 = vld.sshfl [vmem:[#allocation1 + $0x18] sm:$0xff pattern:$0x75316420] }
 0x307   : > { %3859 = vmatpush.msrb.mxu0 %v3346_v59  ;;  %v3410_v27 = vadd.f32 %v3154_v5, %v2622_v36  ;;  %v3210_v60 = vsel %vm2942_vm7, %v6959_v12, 0.0  ;;  %v914_v17 = vsel %vm644_vm8, %v6931_v35, 0.0  ;;  %vm1434_vm9 = vcmp.eq.s32.totalorder %v8056_v46, %v6933_v4 }
 0x308   : > { %v2678_v15 = vadd.f32 %v2422_v11, %v1890_v57  ;;  %v1702_v39 = vsel %vm1434_vm9, %v6935_v63, 0.0  ;;  %vm2222_vm10 = vcmp.eq.s32.totalorder %v8056_v46, %v6940_v33  ;;  %vm3010_vm11 = vcmp.eq.s32.totalorder %v8056_v46, %v6947_v6  ;;  %v3763_v57 = vpop.f32.mrf.mxu3 }
 0x309   : > { %3879 = vmatpush.msrb.mxu1 %v3410_v27  ;;  %v1958_v41 = vadd.f32 %v1702_v39, %v914_v17  ;;  %v2490_v37 = vsel %vm2222_vm10, %v6942_v0, 0.0  ;;  %v3278_v26 = vsel %vm3010_vm11, %v6959_v12, 0.0  ;;  %vm452_vm12 = vcmp.eq.s32.totalorder %v8057_v51, %v6928_v1 }
 0x30a   : > { %v3466_v48 = vadd.f32 %v3210_v60, %v2678_v15  ;;  %v722_v31 = vsel %vm452_vm12, %v6931_v35, 0.0  ;;  %vm1242_vm13 = vcmp.eq.s32.totalorder %v8057_v51, %v6933_v4  ;;  %vm2030_vm14 = vcmp.eq.s32.totalorder %v8057_v51, %v6940_v33  ;;  %v362_v60 = vld [vmem:[%s4393_s16] sm:$0x77]  ;;  %v4166_v15 = vld.sshfl [vmem:[#allocation1 + $0x8] sm:$0xff pattern:$0x75316420] }
 0x30b   : > { %v2746_v28 = vadd.f32 %v2490_v37, %v1958_v41  ;;  %v1510_v54 = vsel %vm1242_vm13, %v6935_v63, 0.0  ;;  %v2298_v38 = vsel %vm2030_vm14, %v6942_v0, 0.0  ;;  %vm2818_vm15 = vcmp.eq.s32.totalorder %v8057_v51, %v6947_v6 }
 0x30c   : > { %3901 = vmatpush.msrb.mxu2 %v3466_v48  ;;  %v1766_v14 = vadd.f32 %v1510_v54, %v722_v31  ;;  %v3086_v8 = vsel %vm2818_vm15, %v6959_v12, 0.0  ;;  %vm516_vm0 = vcmp.eq.s32.totalorder %v7996_v23, %v6928_v1  ;;  %vm1306_vm1 = vcmp.eq.s32.totalorder %v7996_v23, %v6933_v4 }
 0x30d   : > { %v3534_v16 = vadd.f32 %v3278_v26, %v2746_v28  ;;  %3902 = vmatmul.f32.vlgmr.msrb.gmra.mxu2 %v4163_v50  ;;  %v786_v24 = vsel %vm516_vm0, %v6931_v35, 0.0  ;;  %v1574_v32 = vsel %vm1306_vm1, %v6935_v63, 0.0  ;;  %vm2094_vm2 = vcmp.eq.s32.totalorder %v7996_v23, %v6940_v33  ;;  %v3783_v41 = vpop.f32.mrf.mxu0  ;;  %v3803_v37 = vpop.f32.mrf.mxu1 }
 0x30e   : > { %v2554_v56 = vadd.f32 %v2298_v38, %v1766_v14  ;;  %v1830_v29 = vadd.f32 %v1574_v32, %v786_v24  ;;  %v2362_v44 = vsel %vm2094_vm2, %v6942_v0, 0.0  ;;  %vm2882_vm3 = vcmp.eq.s32.totalorder %v7996_v23, %v6947_v6 }
 0x30f   : > { %3920 = vmatpush.msrb.mxu3 %v3534_v16  ;;  %v3150_v52 = vsel %vm2882_vm3, %v6959_v12, 0.0  ;;  %vm640_vm4 = vcmp.eq.s32.totalorder %v5381_v22, %v6928_v1  ;;  %vm1430_vm5 = vcmp.eq.s32.totalorder %v5381_v22, %v6933_v4  ;;  %vm2218_vm6 = vcmp.eq.s32.totalorder %v5381_v22, %v6940_v33  ;;  %v363_v16 = vld [vmem:[%s4393_s16 + $0x8] sm:$0x77] }
 0x310   : > { %v3342_v55 = vadd.f32 %v3086_v8, %v2554_v56  ;;  %v2618_v42 = vadd.f32 %v2362_v44, %v1830_v29  ;;  %v910_v9 = vsel %vm640_vm4, %v6931_v35, 0.0  ;;  %v1698_v34 = vsel %vm1430_vm5, %v6935_v63, 0.0  ;;  %v3843_v51 = vpop.f32.mrf.mxu3 }
 0x311   : > { %v1954_v23 = vadd.f32 %v1698_v34, %v910_v9  ;;  %v2486_v30 = vsel %vm2218_vm6, %v6942_v0, 0.0  ;;  %vm3006_vm7 = vcmp.eq.s32.totalorder %v5381_v22, %v6947_v6  ;;  %vm448_vm8 = vcmp.eq.s32.totalorder %v4404_v7, %v6928_v1 }
 0x312   : > { %3860 = vmatpush.msrb.mxu0 %v3342_v55  ;;  %v3406_v58 = vadd.f32 %v3150_v52, %v2618_v42  ;;  %v3274_v53 = vsel %vm3006_vm7, %v6959_v12, 0.0  ;;  %v718_v47 = vsel %vm448_vm8, %v6931_v35, 0.0  ;;  %vm1238_vm9 = vcmp.eq.s32.totalorder %v4404_v7, %v6933_v4 }
 0x313   : > { %v2742_v62 = vadd.f32 %v2486_v30, %v1954_v23  ;;  %v1506_v13 = vsel %vm1238_vm9, %v6935_v63, 0.0  ;;  %vm2026_vm10 = vcmp.eq.s32.totalorder %v4404_v7, %v6940_v33  ;;  %vm2814_vm11 = vcmp.eq.s32.totalorder %v4404_v7, %v6947_v6 }
 0x314   : > { %3880 = vmatpush.msrb.mxu1 %v3406_v58  ;;  %v1762_v22 = vadd.f32 %v1506_v13, %v718_v47  ;;  %v2294_v21 = vsel %vm2026_vm10, %v6942_v0, 0.0  ;;  %v3082_v3 = vsel %vm2814_vm11, %v6959_v12, 0.0  ;;  %vm512_vm12 = vcmp.eq.s32.totalorder %v5431_v10, %v6928_v1  ;;  %v3743_v1 = vpop.f32.mrf.mxu2 }
 0x315   : > { %v3530_v61 = vadd.f32 %v3274_v53, %v2742_v62  ;;  %v782_v5 = vsel %vm512_vm12, %v6931_v35, 0.0  ;;  %vm1302_vm13 = vcmp.eq.s32.totalorder %v5431_v10, %v6933_v4  ;;  %vm2090_vm14 = vcmp.eq.s32.totalorder %v5431_v10, %v6940_v33 }
 0x316   : > { %v2550_v7 = vadd.f32 %v2294_v21, %v1762_v22  ;;  %v1570_v2 = vsel %vm1302_vm13, %v6935_v63, 0.0  ;;  %v2358_v59 = vsel %vm2090_vm14, %v6942_v0, 0.0  ;;  %vm2878_vm15 = vcmp.eq.s32.totalorder %v5431_v10, %v6947_v6  ;;  %v4165_v10 = vld.sshfl [vmem:[#allocation1] sm:$0xff pattern:$0x75316420] }
 0x317   : > { %3921 = vmatpush.msrb.mxu3 %v3530_v61  ;;  %v1826_v36 = vadd.f32 %v1570_v2, %v782_v5  ;;  %v3644_v18 = vadd.f32 %v3643_v19, %v7721_v43  ;;  %v3724_v35 = vadd.f32 %v3723_v45, %v3703_v40  ;;  %v3146_v33 = vsel %vm2878_vm15, %v6959_v12, 0.0 }
 0x318   : > { %3922 = vmatmul.f32.vlgmr.msrb.gmra.mxu3 %v4164_v25  ;;  %v3338_v4 = vadd.f32 %v3082_v3, %v2550_v7  ;;  %vm3932_vm0 = vcmask 1043456   ;;  %v3804_v31 = vadd.f32 %v3803_v37, %v3783_v41 }
 0x319   : > { %v2614_v11 = vadd.f32 %v2358_v59, %v1826_v36  ;;  %v3664_v63 = vadd.f32 %v3663_v49, %v3644_v18  ;;  %v3744_v0 = vadd.f32 %v3743_v1, %v3724_v35 }
 0x31a   : > { %3861 = vmatpush.msrb.mxu0 %v3338_v4 }
 0x31b   : > { %v3402_v46 = vadd.f32 %v3146_v33, %v2614_v11  ;;  %3862 = vmatmul.f32.vlgmr.msrb.gmra.mxu0 %v4165_v10  ;;  %v3764_v6 = vadd.f32 %v3763_v57, %v3744_v0  ;;  %v3684_v27 = vadd.f32 %v3683_v20, %v3664_v63 }
 0x31c   : > { %v3823_v26 = vpop.f32.mrf.mxu2 }
 0x31d   : > { %3881 = vmatpush.msrb.mxu1 %v3402_v46  ;;  %v3930_v17 = vrot.slane %v3764_v6, 4  ;;  %v3824_v38 = vadd.f32 %v3823_v26, %v3804_v31 }
 0x31e   : > { %3882 = vmatmul.f32.vlgmr.msrb.gmra.mxu1 %v4166_v15 }
 0x31f   : > { %v3933_v39 = vsel %vm3932_vm0, %v3684_v27, %v3930_v17  ;;  %v3844_v49 = vadd.f32 %v3843_v51, %v3824_v38 }
 0x320   : > { %v3937_v12 = vadd.f32 %v3933_v39, %v362_v60 }
 0x322   : > { %3939 = vst [vmem:[%s4393_s16] sm:$0x77] %v3937_v12 }
 0x390   : > { %v3903_v19 = vpop.f32.mrf.mxu2 }
 0x398   : > { %v3863_v48 = vpop.f32.mrf.mxu0 }
 0x39b   : > { %v3883_v43 = vpop.f32.mrf.mxu1  ;;  %v3923_v54 = vpop.f32.mrf.mxu3 }
 0x39c   : > { %v3884_v28 = vadd.f32 %v3883_v43, %v3863_v48 }
 0x39e   : > { %v3904_v14 = vadd.f32 %v3903_v19, %v3884_v28 }
 0x3a0   : > { %v3924_v8 = vadd.f32 %v3923_v54, %v3904_v14 }
 0x3a2   : > { %v3931_v50 = vrot.slane %v3924_v8, 4 }
 0x3a4   : > { %v3934_v24 = vsel %vm3932_vm0, %v3844_v49, %v3931_v50 }
 0x3a5   : > { %v3938_v32 = vadd.f32 %v3934_v24, %v363_v16 }
 0x3a7   : > { %3940 = vst [vmem:[%s4393_s16 + $0x8] sm:$0x77] %v3938_v32 }
 0x3a8 PF: > { %s31_s29 = sadd.s32 1, %s4273_s29   ;;  %s8058_s26 = smov %s4257_s27 }
 0x3a9   : > { %p28_p3 = scmp.ge.s32.totalorder %s31_s29, 4   ;;  %s8059_s27 = smov %s4261_s0 }
 0x3aa   : > { %s8060_s0 = smov %s4363_s11  ;;  %s8061_s28 = smov %s4269_s1 }
 0x3ab   : > { %s8062_s1 = smov %s8064_s6  ;;  %30 = sbr.rel (!%p28_p3) target bundleno = 11 (0xb), region = 87 }
 0x3b0   :  { %3971 = vsyncpa [#allocation6], 1 }
 0x3b1   :  { %3973 = vsyncpa [#allocation6 + $0x1], 1 }

</bundles_post_ra>
